<compile_context>
chip_gen: v6e
topology: v6e:2x2x1
jax: 0.10.0
libtpu: 0.0.40
codegen_flags: <defaults>
</compile_context>

<pallas_src>
import functools
import math

import jax
import jax.numpy as jnp
from jax.experimental import pallas as pl
from jax.experimental.pallas import tpu as pltpu


# ---------------------------------------------------------------------------
# helpers
# ---------------------------------------------------------------------------
_GELU_C = math.sqrt(2.0 / math.pi)


def _gelu_tanh(x):
    # TODO(synk): PyTorch nn.GELU() default is the exact erf formulation; Mosaic has no
    # guaranteed erf lowering, so both kernel and reference use the tanh approximation
    # (max deviation ~1e-3 on typical activations).
    return 0.5 * x * (1.0 + jnp.tanh(_GELU_C * (x + 0.044715 * x * x * x)))


def build_2d_sincos_pos_embed(w, h, embed_dim, temperature=10000.0):
    """Exact replica of AIFI.build_2d_sincos_position_embedding -> (1, w*h, embed_dim) f32."""
    assert embed_dim % 4 == 0
    grid_w = jnp.arange(w, dtype=jnp.float32)
    grid_h = jnp.arange(h, dtype=jnp.float32)
    gw, gh = jnp.meshgrid(grid_w, grid_h, indexing="ij")        # (w, h)
    pos_dim = embed_dim // 4
    omega = jnp.arange(pos_dim, dtype=jnp.float32) / pos_dim
    omega = 1.0 / (temperature ** omega)
    out_w = gw.reshape(-1)[:, None] * omega[None, :]            # (w*h, pos_dim)
    out_h = gh.reshape(-1)[:, None] * omega[None, :]
    pe = jnp.concatenate(
        [jnp.sin(out_w), jnp.cos(out_w), jnp.sin(out_h), jnp.cos(out_h)], axis=1)
    return pe[None]                                             # (1, w*h, embed_dim)


def _layer_norm_f32(x, gamma, beta, eps):
    mu = jnp.mean(x, axis=-1, keepdims=True)
    d = x - mu
    var = jnp.mean(d * d, axis=-1, keepdims=True)
    return d * jax.lax.rsqrt(var + eps) * gamma + beta


# ---------------------------------------------------------------------------
# Fused kernel: (pos-folded QKV proj + MHA + out-proj + LN1 + FFN + LN2), grid = (B,)
# ---------------------------------------------------------------------------
def _aifi_kernel(src_ref, wqkv_ref, bqkv_ref, wo_ref, bo_ref, g1_ref, be1_ref,
                 w1_ref, b1_ref, w2_ref, b2_ref, g2_ref, be2_ref,
                 out_ref, qkv_sc, o_sc, *, num_heads, head_dim, eps):
    C = src_ref.shape[1]

    # Single (C, S) -> (S, C) relayout per batch element (NCHW consumed natively from HBM).
    x = src_ref[0].astype(jnp.float32).T                          # (S, C) f32

    # Fused QKV projection: one N=3C matmul.  pos-embed, in-proj biases and the
    # 1/sqrt(head_dim) scale are already folded into wqkv / bqkv (wrapper).
    qkv_sc[...] = jnp.dot(x, wqkv_ref[...].astype(jnp.float32),
                          preferred_element_type=jnp.float32) + bqkv_ref[...]

    # Per-head attention with static lane slices of the VMEM-staged QKV buffer.
    # Each head's chain ends in a VMEM store, keeping vreg live ranges per-head.
    for h in range(num_heads):
        lo = h * head_dim
        q_h = qkv_sc[:, lo:lo + head_dim]                         # (S, hd), pre-scaled
        k_h = qkv_sc[:, C + lo:C + lo + head_dim]                 # (S, hd)
        v_h = qkv_sc[:, 2 * C + lo:2 * C + lo + head_dim]         # (S, hd)
        s = jnp.einsum("qd,kd->qk", q_h, k_h, preferred_element_type=jnp.float32)
        s = s - jnp.max(s, axis=-1, keepdims=True)
        e = jnp.exp(s)                                            # EUP
        p = e * pl.reciprocal(jnp.sum(e, axis=-1, keepdims=True), approx=True)  # EUP recip
        o_sc[:, lo:lo + head_dim] = jnp.dot(p, v_h, preferred_element_type=jnp.float32)

    # Single full-width out-projection + residual + LayerNorm1.
    attn = jnp.dot(o_sc[...], wo_ref[...].astype(jnp.float32),
                   preferred_element_type=jnp.float32) + bo_ref[...].astype(jnp.float32)
    y1 = _layer_norm_f32(x + attn, g1_ref[...].astype(jnp.float32),
                         be1_ref[...].astype(jnp.float32), eps)

    # FFN: fc1 -> GELU -> fc2 -> residual -> LayerNorm2 (no HBM round trip for y1).
    hdn = jnp.dot(y1, w1_ref[...].astype(jnp.float32),
                  preferred_element_type=jnp.float32) + b1_ref[...].astype(jnp.float32)
    hdn = _gelu_tanh(hdn)
    z = jnp.dot(hdn, w2_ref[...].astype(jnp.float32),
                preferred_element_type=jnp.float32) + b2_ref[...].astype(jnp.float32)
    y2 = _layer_norm_f32(y1 + z, g2_ref[...].astype(jnp.float32),
                         be2_ref[...].astype(jnp.float32), eps)

    # Lane-dense store (C on lanes).  The final (B,S,C)->(B,C,H,W) relayout is one XLA
    # transpose in the wrapper instead of per-batch in-kernel transposes + masked stores.
    out_ref[0] = y2.astype(out_ref.dtype)


# ---------------------------------------------------------------------------
# Wrapper
# ---------------------------------------------------------------------------
def aifi_forward(x, params, num_heads=8, ln_eps=1e-5):
    """x: (B, C, H, W). Returns (B, C, H, W). Dropout is 0 (AIFI default)."""
    B, C, Hs, Ws = x.shape
    S = Hs * Ws
    assert C % 4 == 0 and C % num_heads == 0
    hd = C // num_heads
    CM = params["w1"].shape[1]
    dt = x.dtype

    # ---- One-time parameter prep (weights only; activations are never re-laid-out) ----
    pos = build_2d_sincos_pos_embed(Ws, Hs, C)[0]                 # (S, C) f32 (stays f32)
    scale = 1.0 / math.sqrt(hd)
    wq = params["wq"].astype(jnp.float32) * scale                 # fold softmax scale into Wq
    bq = params["bq"].astype(jnp.float32) * scale
    wk = params["wk"].astype(jnp.float32)
    bk = params["bk"].astype(jnp.float32)
    wv = params["wv"].astype(jnp.float32)
    bv = params["bv"].astype(jnp.float32)

    # Fused in-proj weight (C, 3C); pos-embed + biases folded into an (S, 3C) additive term:
    #   q = (x+pos)@Wq' + bq' = x@Wq' + (pos@Wq' + bq'), same for k; v has no pos term.
    # TODO(synk): for bf16 production weights, keep wqkv/wo/w1/w2 bf16 (MXU fast path) and
    #             only bqkv / LN params / accumulation in f32.
    wqkv = jnp.concatenate([wq, wk, wv], axis=1)                  # (C, 3C) f32
    bqkv = jnp.concatenate([pos @ wq + bq[None, :],
                            pos @ wk + bk[None, :],
                            jnp.broadcast_to(bv[None, :], (S, C))], axis=1)  # (S, 3C) f32

    x3 = x.reshape(B, C, S)                                       # free reshape (NCHW-native)

    flops = 2 * B * (S * C * 3 * C + num_heads * 2 * S * S * hd + S * C * C + 2 * S * C * CM)
    transcend = B * (num_heads * S * S + S * CM + 8 * S)
    bytes_acc = 4 * (2 * B * S * C + 3 * C * C + S * 3 * C + C * C + 2 * C * CM + 6 * C + CM)

    kern = pl.pallas_call(
        functools.partial(_aifi_kernel, num_heads=num_heads, head_dim=hd, eps=ln_eps),
        out_shape=jax.ShapeDtypeStruct((B, S, C), dt),
        grid_spec=pltpu.PrefetchScalarGridSpec(
            num_scalar_prefetch=0,
            grid=(B,),                                            # batch: parallel (v7x 2 TCs)
            in_specs=[
                pl.BlockSpec((1, C, S), lambda b: (b, 0, 0)),     # src, NCHW-native
                pl.BlockSpec((C, 3 * C), lambda b: (0, 0)),       # fused QKV weight (resident)
                pl.BlockSpec((S, 3 * C), lambda b: (0, 0)),       # fused QKV bias (+pos, +scale)
                pl.BlockSpec((C, C), lambda b: (0, 0)),           # Wo
                pl.BlockSpec((1, C), lambda b: (0, 0)),           # bo
                pl.BlockSpec((1, C), lambda b: (0, 0)),           # LN1 gamma
                pl.BlockSpec((1, C), lambda b: (0, 0)),           # LN1 beta
                pl.BlockSpec((C, CM), lambda b: (0, 0)),          # fc1 weight
                pl.BlockSpec((1, CM), lambda b: (0, 0)),          # fc1 bias
                pl.BlockSpec((CM, C), lambda b: (0, 0)),          # fc2 weight
                pl.BlockSpec((1, C), lambda b: (0, 0)),           # fc2 bias
                pl.BlockSpec((1, C), lambda b: (0, 0)),           # LN2 gamma
                pl.BlockSpec((1, C), lambda b: (0, 0)),           # LN2 beta
            ],
            out_specs=pl.BlockSpec((1, S, C), lambda b: (b, 0, 0)),
            scratch_shapes=[
                pltpu.VMEM((S, 3 * C), jnp.float32),              # staged QKV activations
                pltpu.VMEM((S, C), jnp.float32),                  # per-head attention outputs
            ],
        ),
        compiler_params=pltpu.CompilerParams(
            dimension_semantics=("parallel",),
            vmem_limit_bytes=32 * 1024 * 1024),
        cost_estimate=pl.CostEstimate(flops=flops, transcendentals=transcend,
                                      bytes_accessed=bytes_acc),
    )
    y = kern(x3, wqkv, bqkv,
             params["wo"], params["bo"].reshape(1, C),
             params["g1"].reshape(1, C), params["be1"].reshape(1, C),
             params["w1"], params["b1"].reshape(1, CM), params["w2"],
             params["b2"].reshape(1, C), params["g2"].reshape(1, C),
             params["be2"].reshape(1, C))

    # Single wrapper-side relayout back to NCHW (kernel stores stayed lane-dense in C).
    return jnp.transpose(y, (0, 2, 1)).reshape(B, C, Hs, Ws)


# ---------------------------------------------------------------------------
# Pure-JAX reference (mirrors the PyTorch module with the same parameterization)
# ---------------------------------------------------------------------------
def aifi_ref(x, p, num_heads=8, ln_eps=1e-5):
    B, C, Hs, Ws = x.shape
    S = Hs * Ws
    hd = C // num_heads
    hi = jax.lax.Precision.HIGHEST

    pos = build_2d_sincos_pos_embed(Ws, Hs, C)                          # (1, S, C) f32
    src = jnp.transpose(x.reshape(B, C, S), (0, 2, 1)).astype(jnp.float32)
    xp = src + pos

    q = jnp.einsum("bsc,cd->bsd", xp, p["wq"], precision=hi) + p["bq"]
    k = jnp.einsum("bsc,cd->bsd", xp, p["wk"], precision=hi) + p["bk"]
    v = jnp.einsum("bsc,cd->bsd", src, p["wv"], precision=hi) + p["bv"]

    def split(t):
        return t.reshape(B, S, num_heads, hd).transpose(0, 2, 1, 3)

    qh, kh, vh = split(q), split(k), split(v)
    s = jnp.einsum("bhqd,bhkd->bhqk", qh, kh, precision=hi) / math.sqrt(hd)
    a = jax.nn.softmax(s, axis=-1)
    oh = jnp.einsum("bhqk,bhkd->bhqd", a, vh, precision=hi)
    o = oh.transpose(0, 2, 1, 3).reshape(B, S, C)
    o = jnp.einsum("bsc,cd->bsd", o, p["wo"], precision=hi) + p["bo"]

    y = _layer_norm_f32(src + o, p["g1"], p["be1"], ln_eps)
    hdn = _gelu_tanh(jnp.einsum("bsc,cm->bsm", y, p["w1"], precision=hi) + p["b1"])
    z = jnp.einsum("bsm,mc->bsc", hdn, p["w2"], precision=hi) + p["b2"]
    y2 = _layer_norm_f32(y + z, p["g2"], p["be2"], ln_eps)

    return jnp.transpose(y2, (0, 2, 1)).reshape(B, C, Hs, Ws).astype(x.dtype)


# ---------------------------------------------------------------------------
if __name__ == "__main__":
    key = jax.random.PRNGKey(0)
    B, C, Hs, Ws = 2, 128, 8, 8          # c1=128 (lane-dense), seq = H*W = 64
    num_heads, CM = 8, 256               # head_dim = 16, FFN hidden = 256

    keys = jax.random.split(key, 17)

    def nrm(k, shape, s):
        return (s * jax.random.normal(k, shape)).astype(jnp.float32)

    params = dict(
        wq=nrm(keys[0], (C, C), 0.05), bq=nrm(keys[1], (C,), 0.02),
        wk=nrm(keys[2], (C, C), 0.05), bk=nrm(keys[3], (C,), 0.02),
        wv=nrm(keys[4], (C, C), 0.05), bv=nrm(keys[5], (C,), 0.02),
        wo=nrm(keys[6], (C, C), 0.05), bo=nrm(keys[7], (C,), 0.02),
        w1=nrm(keys[8], (C, CM), 0.05), b1=nrm(keys[9], (CM,), 0.02),
        w2=nrm(keys[10], (CM, C), 0.05), b2=nrm(keys[11], (C,), 0.02),
        g1=(1.0 + nrm(keys[12], (C,), 0.05)), be1=nrm(keys[13], (C,), 0.05),
        g2=(1.0 + nrm(keys[14], (C,), 0.05)), be2=nrm(keys[15], (C,), 0.05),
    )
    x = nrm(keys[16], (B, C, Hs, Ws), 1.0)

    out = aifi_forward(x, params, num_heads=num_heads)
    out = jax.block_until_ready(out)

    ref = aifi_ref(x, params, num_heads=num_heads)
    assert out.shape == (B, C, Hs, Ws)
    max_err = float(jnp.max(jnp.abs(out - ref)))
    # Tolerance covers the approximate (EUP) softmax reciprocal plus fp reordering from the
    # pos/scale folding; reference uses the same tanh-GELU so that term does not contribute.
    assert jnp.allclose(out, ref, atol=5e-3, rtol=5e-3), max_err
    print("KERNEL_OK")
</pallas_src>

<mosaic_0001>
module attributes {stable_mosaic.version = 11 : i64} {
  func.func @_aifi_kernel(%arg0: i32, %arg1: memref<1x128x64xf32, #tpu.memory_space<vmem>>, %arg2: memref<128x384xf32, #tpu.memory_space<vmem>>, %arg3: memref<64x384xf32, #tpu.memory_space<vmem>>, %arg4: memref<128x128xf32, #tpu.memory_space<vmem>>, %arg5: memref<1x128xf32, #tpu.memory_space<vmem>>, %arg6: memref<1x128xf32, #tpu.memory_space<vmem>>, %arg7: memref<1x128xf32, #tpu.memory_space<vmem>>, %arg8: memref<128x256xf32, #tpu.memory_space<vmem>>, %arg9: memref<1x256xf32, #tpu.memory_space<vmem>>, %arg10: memref<256x128xf32, #tpu.memory_space<vmem>>, %arg11: memref<1x128xf32, #tpu.memory_space<vmem>>, %arg12: memref<1x128xf32, #tpu.memory_space<vmem>>, %arg13: memref<1x128xf32, #tpu.memory_space<vmem>>, %arg14: memref<1x64x128xf32, #tpu.memory_space<vmem>>, %arg15: memref<64x384xf32, #tpu.memory_space<vmem>>, %arg16: memref<64x128xf32, #tpu.memory_space<vmem>>) attributes {dimension_semantics = [#tpu.dimension_semantics<parallel>], iteration_bounds = array<i64: 2>, scalar_prefetch = 0 : i64, scratch_operands = 2 : i64, tpu.core_type = #tpu.core_type<tc>, window_params = [{transform_indices = @transform_0, window_bounds = array<i64: 1, 128, 64>}, {pipeline_mode = #tpu.pipeline_mode<synchronous>, transform_indices = @transform_1, window_bounds = array<i64: 128, 384>}, {pipeline_mode = #tpu.pipeline_mode<synchronous>, transform_indices = @transform_2, window_bounds = array<i64: 64, 384>}, {pipeline_mode = #tpu.pipeline_mode<synchronous>, transform_indices = @transform_3, window_bounds = array<i64: 128, 128>}, {pipeline_mode = #tpu.pipeline_mode<synchronous>, transform_indices = @transform_4, window_bounds = array<i64: 1, 128>}, {pipeline_mode = #tpu.pipeline_mode<synchronous>, transform_indices = @transform_5, window_bounds = array<i64: 1, 128>}, {pipeline_mode = #tpu.pipeline_mode<synchronous>, transform_indices = @transform_6, window_bounds = array<i64: 1, 128>}, {pipeline_mode = #tpu.pipeline_mode<synchronous>, transform_indices = @transform_7, window_bounds = array<i64: 128, 256>}, {pipeline_mode = #tpu.pipeline_mode<synchronous>, transform_indices = @transform_8, window_bounds = array<i64: 1, 256>}, {pipeline_mode = #tpu.pipeline_mode<synchronous>, transform_indices = @transform_9, window_bounds = array<i64: 256, 128>}, {pipeline_mode = #tpu.pipeline_mode<synchronous>, transform_indices = @transform_10, window_bounds = array<i64: 1, 128>}, {pipeline_mode = #tpu.pipeline_mode<synchronous>, transform_indices = @transform_11, window_bounds = array<i64: 1, 128>}, {pipeline_mode = #tpu.pipeline_mode<synchronous>, transform_indices = @transform_12, window_bounds = array<i64: 1, 128>}, {transform_indices = @transform_13, window_bounds = array<i64: 1, 64, 128>}]} {
    %c0 = arith.constant 0 : index
    %c0_0 = arith.constant 0 : index
    %c0_1 = arith.constant 0 : index
    %0 = vector.load %arg1[%c0, %c0_0, %c0_1] : memref<1x128x64xf32, #tpu.memory_space<vmem>>, vector<1x128x64xf32>
    %1 = vector.shape_cast %0 : vector<1x128x64xf32> to vector<128x64xf32>
    %2 = tpu.transpose %1, [1, 0] : vector<128x64xf32> -> vector<64x128xf32>
    %c0_2 = arith.constant 0 : index
    %c0_3 = arith.constant 0 : index
    %3 = vector.load %arg2[%c0_2, %c0_3] : memref<128x384xf32, #tpu.memory_space<vmem>>, vector<128x384xf32>
    %cst = arith.constant dense<0.000000e+00> : vector<64x384xf32>
    %4 = tpu.matmul %2, %3, %cst {dimension_numbers = #tpu.dot_dimension_numbers<[1], [0], [0], [1], [0, 0, 1, 1], [], []>} : vector<64x128xf32>, vector<128x384xf32>, vector<64x384xf32> -> vector<64x384xf32>
    %c0_4 = arith.constant 0 : index
    %c0_5 = arith.constant 0 : index
    %5 = vector.load %arg3[%c0_4, %c0_5] : memref<64x384xf32, #tpu.memory_space<vmem>>, vector<64x384xf32>
    %6 = arith.addf %4, %5 : vector<64x384xf32>
    %c0_6 = arith.constant 0 : index
    %c0_7 = arith.constant 0 : index
    %7 = vector.load %arg15[%c0_6, %c0_7] : memref<64x384xf32, #tpu.memory_space<vmem>>, vector<64x384xf32>
    tpu.vector_store %arg15[%c0_6, %c0_7], %6 {strides = array<i32>} : memref<64x384xf32, #tpu.memory_space<vmem>>, vector<64x384xf32>,
    %c0_8 = arith.constant 0 : index
    %c0_9 = arith.constant 0 : index
    %8 = vector.load %arg15[%c0_8, %c0_9] : memref<64x384xf32, #tpu.memory_space<vmem>>, vector<64x16xf32>
    %c0_10 = arith.constant 0 : index
    %c128 = arith.constant 128 : index
    %9 = vector.load %arg15[%c0_10, %c128] : memref<64x384xf32, #tpu.memory_space<vmem>>, vector<64x16xf32>
    %c0_11 = arith.constant 0 : index
    %c256 = arith.constant 256 : index
    %10 = vector.load %arg15[%c0_11, %c256] : memref<64x384xf32, #tpu.memory_space<vmem>>, vector<64x16xf32>
    "tpu.trace_start"() <{level = 10 : i32, message = "qd,kd->qk"}> : () -> ()
    %cst_12 = arith.constant dense<0.000000e+00> : vector<64x64xf32>
    %11 = tpu.matmul %8, %9, %cst_12 {dimension_numbers = #tpu.dot_dimension_numbers<[1], [1], [0], [0], [0, 0, 1, 0], [], []>} : vector<64x16xf32>, vector<64x16xf32>, vector<64x64xf32> -> vector<64x64xf32>
    "tpu.trace_stop"() : () -> ()
    %cst_13 = arith.constant dense<0xFF800000> : vector<64xf32>
    %12 = vector.multi_reduction <maximumf>, %11, %cst_13 [1] : vector<64x64xf32> to vector<64xf32>
    %13 = vector.shape_cast %12 : vector<64xf32> to vector<64x1xf32>
    %14 = vector.broadcast %13 : vector<64x1xf32> to vector<64x64xf32>
    %15 = arith.subf %11, %14 : vector<64x64xf32>
    %16 = math.exp %15 : vector<64x64xf32>
    %cst_14 = arith.constant dense<0.000000e+00> : vector<64xf32>
    %17 = vector.multi_reduction <add>, %16, %cst_14 [1] : vector<64x64xf32> to vector<64xf32>
    %18 = vector.shape_cast %17 : vector<64xf32> to vector<64x1xf32>
    %19 = tpu.reciprocal %18 {approx = true} : vector<64x1xf32> -> vector<64x1xf32>
    %20 = vector.broadcast %19 : vector<64x1xf32> to vector<64x64xf32>
    %21 = arith.mulf %16, %20 : vector<64x64xf32>
    %cst_15 = arith.constant dense<0.000000e+00> : vector<64x16xf32>
    %22 = tpu.matmul %21, %10, %cst_15 {dimension_numbers = #tpu.dot_dimension_numbers<[1], [0], [0], [1], [0, 0, 1, 1], [], []>} : vector<64x64xf32>, vector<64x16xf32>, vector<64x16xf32> -> vector<64x16xf32>
    %c0_16 = arith.constant 0 : index
    %c0_17 = arith.constant 0 : index
    %23 = vector.load %arg16[%c0_16, %c0_17] : memref<64x128xf32, #tpu.memory_space<vmem>>, vector<64x16xf32>
    tpu.vector_store %arg16[%c0_16, %c0_17], %22 {strides = array<i32>} : memref<64x128xf32, #tpu.memory_space<vmem>>, vector<64x16xf32>,
    %c0_18 = arith.constant 0 : index
    %c16 = arith.constant 16 : index
    %24 = vector.load %arg15[%c0_18, %c16] : memref<64x384xf32, #tpu.memory_space<vmem>>, vector<64x16xf32>
    %c0_19 = arith.constant 0 : index
    %c144 = arith.constant 144 : index
    %25 = vector.load %arg15[%c0_19, %c144] : memref<64x384xf32, #tpu.memory_space<vmem>>, vector<64x16xf32>
    %c0_20 = arith.constant 0 : index
    %c272 = arith.constant 272 : index
    %26 = vector.load %arg15[%c0_20, %c272] : memref<64x384xf32, #tpu.memory_space<vmem>>, vector<64x16xf32>
    "tpu.trace_start"() <{level = 10 : i32, message = "qd,kd->qk"}> : () -> ()
    %cst_21 = arith.constant dense<0.000000e+00> : vector<64x64xf32>
    %27 = tpu.matmul %24, %25, %cst_21 {dimension_numbers = #tpu.dot_dimension_numbers<[1], [1], [0], [0], [0, 0, 1, 0], [], []>} : vector<64x16xf32>, vector<64x16xf32>, vector<64x64xf32> -> vector<64x64xf32>
    "tpu.trace_stop"() : () -> ()
    %cst_22 = arith.constant dense<0xFF800000> : vector<64xf32>
    %28 = vector.multi_reduction <maximumf>, %27, %cst_22 [1] : vector<64x64xf32> to vector<64xf32>
    %29 = vector.shape_cast %28 : vector<64xf32> to vector<64x1xf32>
    %30 = vector.broadcast %29 : vector<64x1xf32> to vector<64x64xf32>
    %31 = arith.subf %27, %30 : vector<64x64xf32>
    %32 = math.exp %31 : vector<64x64xf32>
    %cst_23 = arith.constant dense<0.000000e+00> : vector<64xf32>
    %33 = vector.multi_reduction <add>, %32, %cst_23 [1] : vector<64x64xf32> to vector<64xf32>
    %34 = vector.shape_cast %33 : vector<64xf32> to vector<64x1xf32>
    %35 = tpu.reciprocal %34 {approx = true} : vector<64x1xf32> -> vector<64x1xf32>
    %36 = vector.broadcast %35 : vector<64x1xf32> to vector<64x64xf32>
    %37 = arith.mulf %32, %36 : vector<64x64xf32>
    %cst_24 = arith.constant dense<0.000000e+00> : vector<64x16xf32>
    %38 = tpu.matmul %37, %26, %cst_24 {dimension_numbers = #tpu.dot_dimension_numbers<[1], [0], [0], [1], [0, 0, 1, 1], [], []>} : vector<64x64xf32>, vector<64x16xf32>, vector<64x16xf32> -> vector<64x16xf32>
    %c0_25 = arith.constant 0 : index
    %c16_26 = arith.constant 16 : index
    %39 = vector.load %arg16[%c0_25, %c16_26] : memref<64x128xf32, #tpu.memory_space<vmem>>, vector<64x16xf32>
    tpu.vector_store %arg16[%c0_25, %c16_26], %38 {strides = array<i32>} : memref<64x128xf32, #tpu.memory_space<vmem>>, vector<64x16xf32>,
    %c0_27 = arith.constant 0 : index
    %c32 = arith.constant 32 : index
    %40 = vector.load %arg15[%c0_27, %c32] : memref<64x384xf32, #tpu.memory_space<vmem>>, vector<64x16xf32>
    %c0_28 = arith.constant 0 : index
    %c160 = arith.constant 160 : index
    %41 = vector.load %arg15[%c0_28, %c160] : memref<64x384xf32, #tpu.memory_space<vmem>>, vector<64x16xf32>
    %c0_29 = arith.constant 0 : index
    %c288 = arith.constant 288 : index
    %42 = vector.load %arg15[%c0_29, %c288] : memref<64x384xf32, #tpu.memory_space<vmem>>, vector<64x16xf32>
    "tpu.trace_start"() <{level = 10 : i32, message = "qd,kd->qk"}> : () -> ()
    %cst_30 = arith.constant dense<0.000000e+00> : vector<64x64xf32>
    %43 = tpu.matmul %40, %41, %cst_30 {dimension_numbers = #tpu.dot_dimension_numbers<[1], [1], [0], [0], [0, 0, 1, 0], [], []>} : vector<64x16xf32>, vector<64x16xf32>, vector<64x64xf32> -> vector<64x64xf32>
    "tpu.trace_stop"() : () -> ()
    %cst_31 = arith.constant dense<0xFF800000> : vector<64xf32>
    %44 = vector.multi_reduction <maximumf>, %43, %cst_31 [1] : vector<64x64xf32> to vector<64xf32>
    %45 = vector.shape_cast %44 : vector<64xf32> to vector<64x1xf32>
    %46 = vector.broadcast %45 : vector<64x1xf32> to vector<64x64xf32>
    %47 = arith.subf %43, %46 : vector<64x64xf32>
    %48 = math.exp %47 : vector<64x64xf32>
    %cst_32 = arith.constant dense<0.000000e+00> : vector<64xf32>
    %49 = vector.multi_reduction <add>, %48, %cst_32 [1] : vector<64x64xf32> to vector<64xf32>
    %50 = vector.shape_cast %49 : vector<64xf32> to vector<64x1xf32>
    %51 = tpu.reciprocal %50 {approx = true} : vector<64x1xf32> -> vector<64x1xf32>
    %52 = vector.broadcast %51 : vector<64x1xf32> to vector<64x64xf32>
    %53 = arith.mulf %48, %52 : vector<64x64xf32>
    %cst_33 = arith.constant dense<0.000000e+00> : vector<64x16xf32>
    %54 = tpu.matmul %53, %42, %cst_33 {dimension_numbers = #tpu.dot_dimension_numbers<[1], [0], [0], [1], [0, 0, 1, 1], [], []>} : vector<64x64xf32>, vector<64x16xf32>, vector<64x16xf32> -> vector<64x16xf32>
    %c0_34 = arith.constant 0 : index
    %c32_35 = arith.constant 32 : index
    %55 = vector.load %arg16[%c0_34, %c32_35] : memref<64x128xf32, #tpu.memory_space<vmem>>, vector<64x16xf32>
    tpu.vector_store %arg16[%c0_34, %c32_35], %54 {strides = array<i32>} : memref<64x128xf32, #tpu.memory_space<vmem>>, vector<64x16xf32>,
    %c0_36 = arith.constant 0 : index
    %c48 = arith.constant 48 : index
    %56 = vector.load %arg15[%c0_36, %c48] : memref<64x384xf32, #tpu.memory_space<vmem>>, vector<64x16xf32>
    %c0_37 = arith.constant 0 : index
    %c176 = arith.constant 176 : index
    %57 = vector.load %arg15[%c0_37, %c176] : memref<64x384xf32, #tpu.memory_space<vmem>>, vector<64x16xf32>
    %c0_38 = arith.constant 0 : index
    %c304 = arith.constant 304 : index
    %58 = vector.load %arg15[%c0_38, %c304] : memref<64x384xf32, #tpu.memory_space<vmem>>, vector<64x16xf32>
    "tpu.trace_start"() <{level = 10 : i32, message = "qd,kd->qk"}> : () -> ()
    %cst_39 = arith.constant dense<0.000000e+00> : vector<64x64xf32>
    %59 = tpu.matmul %56, %57, %cst_39 {dimension_numbers = #tpu.dot_dimension_numbers<[1], [1], [0], [0], [0, 0, 1, 0], [], []>} : vector<64x16xf32>, vector<64x16xf32>, vector<64x64xf32> -> vector<64x64xf32>
    "tpu.trace_stop"() : () -> ()
    %cst_40 = arith.constant dense<0xFF800000> : vector<64xf32>
    %60 = vector.multi_reduction <maximumf>, %59, %cst_40 [1] : vector<64x64xf32> to vector<64xf32>
    %61 = vector.shape_cast %60 : vector<64xf32> to vector<64x1xf32>
    %62 = vector.broadcast %61 : vector<64x1xf32> to vector<64x64xf32>
    %63 = arith.subf %59, %62 : vector<64x64xf32>
    %64 = math.exp %63 : vector<64x64xf32>
    %cst_41 = arith.constant dense<0.000000e+00> : vector<64xf32>
    %65 = vector.multi_reduction <add>, %64, %cst_41 [1] : vector<64x64xf32> to vector<64xf32>
    %66 = vector.shape_cast %65 : vector<64xf32> to vector<64x1xf32>
    %67 = tpu.reciprocal %66 {approx = true} : vector<64x1xf32> -> vector<64x1xf32>
    %68 = vector.broadcast %67 : vector<64x1xf32> to vector<64x64xf32>
    %69 = arith.mulf %64, %68 : vector<64x64xf32>
    %cst_42 = arith.constant dense<0.000000e+00> : vector<64x16xf32>
    %70 = tpu.matmul %69, %58, %cst_42 {dimension_numbers = #tpu.dot_dimension_numbers<[1], [0], [0], [1], [0, 0, 1, 1], [], []>} : vector<64x64xf32>, vector<64x16xf32>, vector<64x16xf32> -> vector<64x16xf32>
    %c0_43 = arith.constant 0 : index
    %c48_44 = arith.constant 48 : index
    %71 = vector.load %arg16[%c0_43, %c48_44] : memref<64x128xf32, #tpu.memory_space<vmem>>, vector<64x16xf32>
    tpu.vector_store %arg16[%c0_43, %c48_44], %70 {strides = array<i32>} : memref<64x128xf32, #tpu.memory_space<vmem>>, vector<64x16xf32>,
    %c0_45 = arith.constant 0 : index
    %c64 = arith.constant 64 : index
    %72 = vector.load %arg15[%c0_45, %c64] : memref<64x384xf32, #tpu.memory_space<vmem>>, vector<64x16xf32>
    %c0_46 = arith.constant 0 : index
    %c192 = arith.constant 192 : index
    %73 = vector.load %arg15[%c0_46, %c192] : memref<64x384xf32, #tpu.memory_space<vmem>>, vector<64x16xf32>
    %c0_47 = arith.constant 0 : index
    %c320 = arith.constant 320 : index
    %74 = vector.load %arg15[%c0_47, %c320] : memref<64x384xf32, #tpu.memory_space<vmem>>, vector<64x16xf32>
    "tpu.trace_start"() <{level = 10 : i32, message = "qd,kd->qk"}> : () -> ()
    %cst_48 = arith.constant dense<0.000000e+00> : vector<64x64xf32>
    %75 = tpu.matmul %72, %73, %cst_48 {dimension_numbers = #tpu.dot_dimension_numbers<[1], [1], [0], [0], [0, 0, 1, 0], [], []>} : vector<64x16xf32>, vector<64x16xf32>, vector<64x64xf32> -> vector<64x64xf32>
    "tpu.trace_stop"() : () -> ()
    %cst_49 = arith.constant dense<0xFF800000> : vector<64xf32>
    %76 = vector.multi_reduction <maximumf>, %75, %cst_49 [1] : vector<64x64xf32> to vector<64xf32>
    %77 = vector.shape_cast %76 : vector<64xf32> to vector<64x1xf32>
    %78 = vector.broadcast %77 : vector<64x1xf32> to vector<64x64xf32>
    %79 = arith.subf %75, %78 : vector<64x64xf32>
    %80 = math.exp %79 : vector<64x64xf32>
    %cst_50 = arith.constant dense<0.000000e+00> : vector<64xf32>
    %81 = vector.multi_reduction <add>, %80, %cst_50 [1] : vector<64x64xf32> to vector<64xf32>
    %82 = vector.shape_cast %81 : vector<64xf32> to vector<64x1xf32>
    %83 = tpu.reciprocal %82 {approx = true} : vector<64x1xf32> -> vector<64x1xf32>
    %84 = vector.broadcast %83 : vector<64x1xf32> to vector<64x64xf32>
    %85 = arith.mulf %80, %84 : vector<64x64xf32>
    %cst_51 = arith.constant dense<0.000000e+00> : vector<64x16xf32>
    %86 = tpu.matmul %85, %74, %cst_51 {dimension_numbers = #tpu.dot_dimension_numbers<[1], [0], [0], [1], [0, 0, 1, 1], [], []>} : vector<64x64xf32>, vector<64x16xf32>, vector<64x16xf32> -> vector<64x16xf32>
    %c0_52 = arith.constant 0 : index
    %c64_53 = arith.constant 64 : index
    %87 = vector.load %arg16[%c0_52, %c64_53] : memref<64x128xf32, #tpu.memory_space<vmem>>, vector<64x16xf32>
    tpu.vector_store %arg16[%c0_52, %c64_53], %86 {strides = array<i32>} : memref<64x128xf32, #tpu.memory_space<vmem>>, vector<64x16xf32>,
    %c0_54 = arith.constant 0 : index
    %c80 = arith.constant 80 : index
    %88 = vector.load %arg15[%c0_54, %c80] : memref<64x384xf32, #tpu.memory_space<vmem>>, vector<64x16xf32>
    %c0_55 = arith.constant 0 : index
    %c208 = arith.constant 208 : index
    %89 = vector.load %arg15[%c0_55, %c208] : memref<64x384xf32, #tpu.memory_space<vmem>>, vector<64x16xf32>
    %c0_56 = arith.constant 0 : index
    %c336 = arith.constant 336 : index
    %90 = vector.load %arg15[%c0_56, %c336] : memref<64x384xf32, #tpu.memory_space<vmem>>, vector<64x16xf32>
    "tpu.trace_start"() <{level = 10 : i32, message = "qd,kd->qk"}> : () -> ()
    %cst_57 = arith.constant dense<0.000000e+00> : vector<64x64xf32>
    %91 = tpu.matmul %88, %89, %cst_57 {dimension_numbers = #tpu.dot_dimension_numbers<[1], [1], [0], [0], [0, 0, 1, 0], [], []>} : vector<64x16xf32>, vector<64x16xf32>, vector<64x64xf32> -> vector<64x64xf32>
    "tpu.trace_stop"() : () -> ()
    %cst_58 = arith.constant dense<0xFF800000> : vector<64xf32>
    %92 = vector.multi_reduction <maximumf>, %91, %cst_58 [1] : vector<64x64xf32> to vector<64xf32>
    %93 = vector.shape_cast %92 : vector<64xf32> to vector<64x1xf32>
    %94 = vector.broadcast %93 : vector<64x1xf32> to vector<64x64xf32>
    %95 = arith.subf %91, %94 : vector<64x64xf32>
    %96 = math.exp %95 : vector<64x64xf32>
    %cst_59 = arith.constant dense<0.000000e+00> : vector<64xf32>
    %97 = vector.multi_reduction <add>, %96, %cst_59 [1] : vector<64x64xf32> to vector<64xf32>
    %98 = vector.shape_cast %97 : vector<64xf32> to vector<64x1xf32>
    %99 = tpu.reciprocal %98 {approx = true} : vector<64x1xf32> -> vector<64x1xf32>
    %100 = vector.broadcast %99 : vector<64x1xf32> to vector<64x64xf32>
    %101 = arith.mulf %96, %100 : vector<64x64xf32>
    %cst_60 = arith.constant dense<0.000000e+00> : vector<64x16xf32>
    %102 = tpu.matmul %101, %90, %cst_60 {dimension_numbers = #tpu.dot_dimension_numbers<[1], [0], [0], [1], [0, 0, 1, 1], [], []>} : vector<64x64xf32>, vector<64x16xf32>, vector<64x16xf32> -> vector<64x16xf32>
    %c0_61 = arith.constant 0 : index
    %c80_62 = arith.constant 80 : index
    %103 = vector.load %arg16[%c0_61, %c80_62] : memref<64x128xf32, #tpu.memory_space<vmem>>, vector<64x16xf32>
    tpu.vector_store %arg16[%c0_61, %c80_62], %102 {strides = array<i32>} : memref<64x128xf32, #tpu.memory_space<vmem>>, vector<64x16xf32>,
    %c0_63 = arith.constant 0 : index
    %c96 = arith.constant 96 : index
    %104 = vector.load %arg15[%c0_63, %c96] : memref<64x384xf32, #tpu.memory_space<vmem>>, vector<64x16xf32>
    %c0_64 = arith.constant 0 : index
    %c224 = arith.constant 224 : index
    %105 = vector.load %arg15[%c0_64, %c224] : memref<64x384xf32, #tpu.memory_space<vmem>>, vector<64x16xf32>
    %c0_65 = arith.constant 0 : index
    %c352 = arith.constant 352 : index
    %106 = vector.load %arg15[%c0_65, %c352] : memref<64x384xf32, #tpu.memory_space<vmem>>, vector<64x16xf32>
    "tpu.trace_start"() <{level = 10 : i32, message = "qd,kd->qk"}> : () -> ()
    %cst_66 = arith.constant dense<0.000000e+00> : vector<64x64xf32>
    %107 = tpu.matmul %104, %105, %cst_66 {dimension_numbers = #tpu.dot_dimension_numbers<[1], [1], [0], [0], [0, 0, 1, 0], [], []>} : vector<64x16xf32>, vector<64x16xf32>, vector<64x64xf32> -> vector<64x64xf32>
    "tpu.trace_stop"() : () -> ()
    %cst_67 = arith.constant dense<0xFF800000> : vector<64xf32>
    %108 = vector.multi_reduction <maximumf>, %107, %cst_67 [1] : vector<64x64xf32> to vector<64xf32>
    %109 = vector.shape_cast %108 : vector<64xf32> to vector<64x1xf32>
    %110 = vector.broadcast %109 : vector<64x1xf32> to vector<64x64xf32>
    %111 = arith.subf %107, %110 : vector<64x64xf32>
    %112 = math.exp %111 : vector<64x64xf32>
    %cst_68 = arith.constant dense<0.000000e+00> : vector<64xf32>
    %113 = vector.multi_reduction <add>, %112, %cst_68 [1] : vector<64x64xf32> to vector<64xf32>
    %114 = vector.shape_cast %113 : vector<64xf32> to vector<64x1xf32>
    %115 = tpu.reciprocal %114 {approx = true} : vector<64x1xf32> -> vector<64x1xf32>
    %116 = vector.broadcast %115 : vector<64x1xf32> to vector<64x64xf32>
    %117 = arith.mulf %112, %116 : vector<64x64xf32>
    %cst_69 = arith.constant dense<0.000000e+00> : vector<64x16xf32>
    %118 = tpu.matmul %117, %106, %cst_69 {dimension_numbers = #tpu.dot_dimension_numbers<[1], [0], [0], [1], [0, 0, 1, 1], [], []>} : vector<64x64xf32>, vector<64x16xf32>, vector<64x16xf32> -> vector<64x16xf32>
    %c0_70 = arith.constant 0 : index
    %c96_71 = arith.constant 96 : index
    %119 = vector.load %arg16[%c0_70, %c96_71] : memref<64x128xf32, #tpu.memory_space<vmem>>, vector<64x16xf32>
    tpu.vector_store %arg16[%c0_70, %c96_71], %118 {strides = array<i32>} : memref<64x128xf32, #tpu.memory_space<vmem>>, vector<64x16xf32>,
    %c0_72 = arith.constant 0 : index
    %c112 = arith.constant 112 : index
    %120 = vector.load %arg15[%c0_72, %c112] : memref<64x384xf32, #tpu.memory_space<vmem>>, vector<64x16xf32>
    %c0_73 = arith.constant 0 : index
    %c240 = arith.constant 240 : index
    %121 = vector.load %arg15[%c0_73, %c240] : memref<64x384xf32, #tpu.memory_space<vmem>>, vector<64x16xf32>
    %c0_74 = arith.constant 0 : index
    %c368 = arith.constant 368 : index
    %122 = vector.load %arg15[%c0_74, %c368] : memref<64x384xf32, #tpu.memory_space<vmem>>, vector<64x16xf32>
    "tpu.trace_start"() <{level = 10 : i32, message = "qd,kd->qk"}> : () -> ()
    %cst_75 = arith.constant dense<0.000000e+00> : vector<64x64xf32>
    %123 = tpu.matmul %120, %121, %cst_75 {dimension_numbers = #tpu.dot_dimension_numbers<[1], [1], [0], [0], [0, 0, 1, 0], [], []>} : vector<64x16xf32>, vector<64x16xf32>, vector<64x64xf32> -> vector<64x64xf32>
    "tpu.trace_stop"() : () -> ()
    %cst_76 = arith.constant dense<0xFF800000> : vector<64xf32>
    %124 = vector.multi_reduction <maximumf>, %123, %cst_76 [1] : vector<64x64xf32> to vector<64xf32>
    %125 = vector.shape_cast %124 : vector<64xf32> to vector<64x1xf32>
    %126 = vector.broadcast %125 : vector<64x1xf32> to vector<64x64xf32>
    %127 = arith.subf %123, %126 : vector<64x64xf32>
    %128 = math.exp %127 : vector<64x64xf32>
    %cst_77 = arith.constant dense<0.000000e+00> : vector<64xf32>
    %129 = vector.multi_reduction <add>, %128, %cst_77 [1] : vector<64x64xf32> to vector<64xf32>
    %130 = vector.shape_cast %129 : vector<64xf32> to vector<64x1xf32>
    %131 = tpu.reciprocal %130 {approx = true} : vector<64x1xf32> -> vector<64x1xf32>
    %132 = vector.broadcast %131 : vector<64x1xf32> to vector<64x64xf32>
    %133 = arith.mulf %128, %132 : vector<64x64xf32>
    %cst_78 = arith.constant dense<0.000000e+00> : vector<64x16xf32>
    %134 = tpu.matmul %133, %122, %cst_78 {dimension_numbers = #tpu.dot_dimension_numbers<[1], [0], [0], [1], [0, 0, 1, 1], [], []>} : vector<64x64xf32>, vector<64x16xf32>, vector<64x16xf32> -> vector<64x16xf32>
    %c0_79 = arith.constant 0 : index
    %c112_80 = arith.constant 112 : index
    %135 = vector.load %arg16[%c0_79, %c112_80] : memref<64x128xf32, #tpu.memory_space<vmem>>, vector<64x16xf32>
    tpu.vector_store %arg16[%c0_79, %c112_80], %134 {strides = array<i32>} : memref<64x128xf32, #tpu.memory_space<vmem>>, vector<64x16xf32>,
    %c0_81 = arith.constant 0 : index
    %c0_82 = arith.constant 0 : index
    %136 = vector.load %arg16[%c0_81, %c0_82] : memref<64x128xf32, #tpu.memory_space<vmem>>, vector<64x128xf32>
    %c0_83 = arith.constant 0 : index
    %c0_84 = arith.constant 0 : index
    %137 = vector.load %arg4[%c0_83, %c0_84] : memref<128x128xf32, #tpu.memory_space<vmem>>, vector<128x128xf32>
    %cst_85 = arith.constant dense<0.000000e+00> : vector<64x128xf32>
    %138 = tpu.matmul %136, %137, %cst_85 {dimension_numbers = #tpu.dot_dimension_numbers<[1], [0], [0], [1], [0, 0, 1, 1], [], []>} : vector<64x128xf32>, vector<128x128xf32>, vector<64x128xf32> -> vector<64x128xf32>
    %c0_86 = arith.constant 0 : index
    %c0_87 = arith.constant 0 : index
    %139 = vector.load %arg5[%c0_86, %c0_87] : memref<1x128xf32, #tpu.memory_space<vmem>>, vector<1x128xf32>
    %140 = vector.broadcast %139 : vector<1x128xf32> to vector<64x128xf32>
    %141 = arith.addf %138, %140 : vector<64x128xf32>
    %142 = arith.addf %2, %141 : vector<64x128xf32>
    %c0_88 = arith.constant 0 : index
    %c0_89 = arith.constant 0 : index
    %143 = vector.load %arg6[%c0_88, %c0_89] : memref<1x128xf32, #tpu.memory_space<vmem>>, vector<1x128xf32>
    %c0_90 = arith.constant 0 : index
    %c0_91 = arith.constant 0 : index
    %144 = vector.load %arg7[%c0_90, %c0_91] : memref<1x128xf32, #tpu.memory_space<vmem>>, vector<1x128xf32>
    %cst_92 = arith.constant dense<0.000000e+00> : vector<64xf32>
    %145 = vector.multi_reduction <add>, %142, %cst_92 [1] : vector<64x128xf32> to vector<64xf32>
    %146 = vector.shape_cast %145 : vector<64xf32> to vector<64x1xf32>
    %cst_93 = arith.constant 1.280000e+02 : f32
    %147 = vector.broadcast %cst_93 : f32 to vector<64x1xf32>
    %148 = arith.divf %146, %147 : vector<64x1xf32>
    %149 = vector.broadcast %148 : vector<64x1xf32> to vector<64x128xf32>
    %150 = arith.subf %142, %149 : vector<64x128xf32>
    %151 = arith.mulf %150, %150 : vector<64x128xf32>
    %cst_94 = arith.constant dense<0.000000e+00> : vector<64xf32>
    %152 = vector.multi_reduction <add>, %151, %cst_94 [1] : vector<64x128xf32> to vector<64xf32>
    %153 = vector.shape_cast %152 : vector<64xf32> to vector<64x1xf32>
    %cst_95 = arith.constant 1.280000e+02 : f32
    %154 = vector.broadcast %cst_95 : f32 to vector<64x1xf32>
    %155 = arith.divf %153, %154 : vector<64x1xf32>
    %cst_96 = arith.constant 9.99999974E-6 : f32
    %156 = vector.broadcast %cst_96 : f32 to vector<64x1xf32>
    %157 = arith.addf %155, %156 : vector<64x1xf32>
    %158 = math.rsqrt %157 : vector<64x1xf32>
    %159 = vector.broadcast %158 : vector<64x1xf32> to vector<64x128xf32>
    %160 = arith.mulf %150, %159 : vector<64x128xf32>
    %161 = vector.broadcast %143 : vector<1x128xf32> to vector<64x128xf32>
    %162 = arith.mulf %160, %161 : vector<64x128xf32>
    %163 = vector.broadcast %144 : vector<1x128xf32> to vector<64x128xf32>
    %164 = arith.addf %162, %163 : vector<64x128xf32>
    %c0_97 = arith.constant 0 : index
    %c0_98 = arith.constant 0 : index
    %165 = vector.load %arg8[%c0_97, %c0_98] : memref<128x256xf32, #tpu.memory_space<vmem>>, vector<128x256xf32>
    %cst_99 = arith.constant dense<0.000000e+00> : vector<64x256xf32>
    %166 = tpu.matmul %164, %165, %cst_99 {dimension_numbers = #tpu.dot_dimension_numbers<[1], [0], [0], [1], [0, 0, 1, 1], [], []>} : vector<64x128xf32>, vector<128x256xf32>, vector<64x256xf32> -> vector<64x256xf32>
    %c0_100 = arith.constant 0 : index
    %c0_101 = arith.constant 0 : index
    %167 = vector.load %arg9[%c0_100, %c0_101] : memref<1x256xf32, #tpu.memory_space<vmem>>, vector<1x256xf32>
    %168 = vector.broadcast %167 : vector<1x256xf32> to vector<64x256xf32>
    %169 = arith.addf %166, %168 : vector<64x256xf32>
    %cst_102 = arith.constant 5.000000e-01 : f32
    %170 = vector.broadcast %cst_102 : f32 to vector<64x256xf32>
    %171 = arith.mulf %170, %169 : vector<64x256xf32>
    %cst_103 = arith.constant 4.471500e-02 : f32
    %172 = vector.broadcast %cst_103 : f32 to vector<64x256xf32>
    %173 = arith.mulf %172, %169 : vector<64x256xf32>
    %174 = arith.mulf %173, %169 : vector<64x256xf32>
    %175 = arith.mulf %174, %169 : vector<64x256xf32>
    %176 = arith.addf %169, %175 : vector<64x256xf32>
    %cst_104 = arith.constant 0.797884583 : f32
    %177 = vector.broadcast %cst_104 : f32 to vector<64x256xf32>
    %178 = arith.mulf %177, %176 : vector<64x256xf32>
    %179 = math.tanh %178 : vector<64x256xf32>
    %cst_105 = arith.constant 1.000000e+00 : f32
    %180 = vector.broadcast %cst_105 : f32 to vector<64x256xf32>
    %181 = arith.addf %180, %179 : vector<64x256xf32>
    %182 = arith.mulf %171, %181 : vector<64x256xf32>
    %c0_106 = arith.constant 0 : index
    %c0_107 = arith.constant 0 : index
    %183 = vector.load %arg10[%c0_106, %c0_107] : memref<256x128xf32, #tpu.memory_space<vmem>>, vector<256x128xf32>
    %cst_108 = arith.constant dense<0.000000e+00> : vector<64x128xf32>
    %184 = tpu.matmul %182, %183, %cst_108 {dimension_numbers = #tpu.dot_dimension_numbers<[1], [0], [0], [1], [0, 0, 1, 1], [], []>} : vector<64x256xf32>, vector<256x128xf32>, vector<64x128xf32> -> vector<64x128xf32>
    %c0_109 = arith.constant 0 : index
    %c0_110 = arith.constant 0 : index
    %185 = vector.load %arg11[%c0_109, %c0_110] : memref<1x128xf32, #tpu.memory_space<vmem>>, vector<1x128xf32>
    %186 = vector.broadcast %185 : vector<1x128xf32> to vector<64x128xf32>
    %187 = arith.addf %184, %186 : vector<64x128xf32>
    %188 = arith.addf %164, %187 : vector<64x128xf32>
    %c0_111 = arith.constant 0 : index
    %c0_112 = arith.constant 0 : index
    %189 = vector.load %arg12[%c0_111, %c0_112] : memref<1x128xf32, #tpu.memory_space<vmem>>, vector<1x128xf32>
    %c0_113 = arith.constant 0 : index
    %c0_114 = arith.constant 0 : index
    %190 = vector.load %arg13[%c0_113, %c0_114] : memref<1x128xf32, #tpu.memory_space<vmem>>, vector<1x128xf32>
    %cst_115 = arith.constant dense<0.000000e+00> : vector<64xf32>
    %191 = vector.multi_reduction <add>, %188, %cst_115 [1] : vector<64x128xf32> to vector<64xf32>
    %192 = vector.shape_cast %191 : vector<64xf32> to vector<64x1xf32>
    %cst_116 = arith.constant 1.280000e+02 : f32
    %193 = vector.broadcast %cst_116 : f32 to vector<64x1xf32>
    %194 = arith.divf %192, %193 : vector<64x1xf32>
    %195 = vector.broadcast %194 : vector<64x1xf32> to vector<64x128xf32>
    %196 = arith.subf %188, %195 : vector<64x128xf32>
    %197 = arith.mulf %196, %196 : vector<64x128xf32>
    %cst_117 = arith.constant dense<0.000000e+00> : vector<64xf32>
    %198 = vector.multi_reduction <add>, %197, %cst_117 [1] : vector<64x128xf32> to vector<64xf32>
    %199 = vector.shape_cast %198 : vector<64xf32> to vector<64x1xf32>
    %cst_118 = arith.constant 1.280000e+02 : f32
    %200 = vector.broadcast %cst_118 : f32 to vector<64x1xf32>
    %201 = arith.divf %199, %200 : vector<64x1xf32>
    %cst_119 = arith.constant 9.99999974E-6 : f32
    %202 = vector.broadcast %cst_119 : f32 to vector<64x1xf32>
    %203 = arith.addf %201, %202 : vector<64x1xf32>
    %204 = math.rsqrt %203 : vector<64x1xf32>
    %205 = vector.broadcast %204 : vector<64x1xf32> to vector<64x128xf32>
    %206 = arith.mulf %196, %205 : vector<64x128xf32>
    %207 = vector.broadcast %189 : vector<1x128xf32> to vector<64x128xf32>
    %208 = arith.mulf %206, %207 : vector<64x128xf32>
    %209 = vector.broadcast %190 : vector<1x128xf32> to vector<64x128xf32>
    %210 = arith.addf %208, %209 : vector<64x128xf32>
    %c0_120 = arith.constant 0 : index
    %c0_121 = arith.constant 0 : index
    %c0_122 = arith.constant 0 : index
    %211 = vector.load %arg14[%c0_120, %c0_121, %c0_122] : memref<1x64x128xf32, #tpu.memory_space<vmem>>, vector<1x64x128xf32>
    %212 = vector.shape_cast %211 : vector<1x64x128xf32> to vector<64x128xf32>
    %213 = vector.shape_cast %210 : vector<64x128xf32> to vector<1x64x128xf32>
    tpu.vector_store %arg14[%c0_120, %c0_121, %c0_122], %213 {strides = array<i32>} : memref<1x64x128xf32, #tpu.memory_space<vmem>>, vector<1x64x128xf32>,
    return
  }
  func.func @transform_0(%arg0: i32) -> (i32, i32, i32) {
    %c0_i32 = arith.constant 0 : i32
    %c0_i32_0 = arith.constant 0 : i32
    %c0_i32_1 = arith.constant 0 : i32
    return %arg0, %c0_i32, %c0_i32_0 : i32, i32, i32
  }
  func.func @transform_1(%arg0: i32) -> (i32, i32) {
    %c0_i32 = arith.constant 0 : i32
    %c0_i32_0 = arith.constant 0 : i32
    %c0_i32_1 = arith.constant 0 : i32
    return %c0_i32, %c0_i32_0 : i32, i32
  }
  func.func @transform_2(%arg0: i32) -> (i32, i32) {
    %c0_i32 = arith.constant 0 : i32
    %c0_i32_0 = arith.constant 0 : i32
    %c0_i32_1 = arith.constant 0 : i32
    return %c0_i32, %c0_i32_0 : i32, i32
  }
  func.func @transform_3(%arg0: i32) -> (i32, i32) {
    %c0_i32 = arith.constant 0 : i32
    %c0_i32_0 = arith.constant 0 : i32
    %c0_i32_1 = arith.constant 0 : i32
    return %c0_i32, %c0_i32_0 : i32, i32
  }
  func.func @transform_4(%arg0: i32) -> (i32, i32) {
    %c0_i32 = arith.constant 0 : i32
    %c0_i32_0 = arith.constant 0 : i32
    %c0_i32_1 = arith.constant 0 : i32
    return %c0_i32, %c0_i32_0 : i32, i32
  }
  func.func @transform_5(%arg0: i32) -> (i32, i32) {
    %c0_i32 = arith.constant 0 : i32
    %c0_i32_0 = arith.constant 0 : i32
    %c0_i32_1 = arith.constant 0 : i32
    return %c0_i32, %c0_i32_0 : i32, i32
  }
  func.func @transform_6(%arg0: i32) -> (i32, i32) {
    %c0_i32 = arith.constant 0 : i32
    %c0_i32_0 = arith.constant 0 : i32
    %c0_i32_1 = arith.constant 0 : i32
    return %c0_i32, %c0_i32_0 : i32, i32
  }
  func.func @transform_7(%arg0: i32) -> (i32, i32) {
    %c0_i32 = arith.constant 0 : i32
    %c0_i32_0 = arith.constant 0 : i32
    %c0_i32_1 = arith.constant 0 : i32
    return %c0_i32, %c0_i32_0 : i32, i32
  }
  func.func @transform_8(%arg0: i32) -> (i32, i32) {
    %c0_i32 = arith.constant 0 : i32
    %c0_i32_0 = arith.constant 0 : i32
    %c0_i32_1 = arith.constant 0 : i32
    return %c0_i32, %c0_i32_0 : i32, i32
  }
  func.func @transform_9(%arg0: i32) -> (i32, i32) {
    %c0_i32 = arith.constant 0 : i32
    %c0_i32_0 = arith.constant 0 : i32
    %c0_i32_1 = arith.constant 0 : i32
    return %c0_i32, %c0_i32_0 : i32, i32
  }
  func.func @transform_10(%arg0: i32) -> (i32, i32) {
    %c0_i32 = arith.constant 0 : i32
    %c0_i32_0 = arith.constant 0 : i32
    %c0_i32_1 = arith.constant 0 : i32
    return %c0_i32, %c0_i32_0 : i32, i32
  }
  func.func @transform_11(%arg0: i32) -> (i32, i32) {
    %c0_i32 = arith.constant 0 : i32
    %c0_i32_0 = arith.constant 0 : i32
    %c0_i32_1 = arith.constant 0 : i32
    return %c0_i32, %c0_i32_0 : i32, i32
  }
  func.func @transform_12(%arg0: i32) -> (i32, i32) {
    %c0_i32 = arith.constant 0 : i32
    %c0_i32_0 = arith.constant 0 : i32
    %c0_i32_1 = arith.constant 0 : i32
    return %c0_i32, %c0_i32_0 : i32, i32
  }
  func.func @transform_13(%arg0: i32) -> (i32, i32, i32) {
    %c0_i32 = arith.constant 0 : i32
    %c0_i32_0 = arith.constant 0 : i32
    %c0_i32_1 = arith.constant 0 : i32
    return %arg0, %c0_i32, %c0_i32_0 : i32, i32, i32
  }
}

</mosaic_0001>

<bundles_post_ra>
// kernel: tpu_custom_call.1
= control target key start
LH: loop header
LB: loop body
LE: loop exit
PB: predicated region body
PF: predicated region fallthrough
CT: control target
= control target key end

     0   :  { %18 = vsyncpa [#allocation5], 0  ;;  %s9747_s0 = inlined_call_operand.vmem [shape: f32[2,128,64], index: 0, kind: input, shape index: {}]   ;;  %s9748_s1 = inlined_call_operand.vmem [shape: f32[128,384], index: 1, kind: input, shape index: {}]   ;;  %s9749_s2 = inlined_call_operand.hbm [shape: f32[64,384], index: 2, kind: input, shape index: {}]   ;;  %s9750_s3 = inlined_call_operand.hbm [shape: f32[128,128], index: 3, kind: input, shape index: {}]   ;;  %s9751_s4 = inlined_call_operand.vmem [shape: f32[1,128], index: 4, kind: input, shape index: {}]   ;;  %s9752_s5 = inlined_call_operand.vmem [shape: f32[1,128], index: 5, kind: input, shape index: {}]   ;;  %s9753_s6 = inlined_call_operand.vmem [shape: f32[1,128], index: 6, kind: input, shape index: {}]   ;;  %s9754_s7 = inlined_call_operand.hbm [shape: f32[128,256], index: 7, kind: input, shape index: {}]   ;;  %s9755_s8 = inlined_call_operand.vmem [shape: f32[1,256], index: 8, kind: input, shape index: {}]   ;;  %s9756_s9 = inlined_call_operand.hbm [shape: f32[256,128], index: 9, kind: input, shape index: {}]   ;;  %s9757_s10 = inlined_call_operand.vmem [shape: f32[1,128], index: 10, kind: input, shape index: {}]   ;;  %s9758_s11 = inlined_call_operand.vmem [shape: f32[1,128], index: 11, kind: input, shape index: {}]   ;;  %s9759_s12 = inlined_call_operand.vmem [shape: f32[1,128], index: 12, kind: input, shape index: {}]   ;;  %s9760_s13 = inlined_call_operand.hbm [shape: f32[2,64,128], index: 13, kind: output, shape index: {}]  }
   0x1   :  { %19 = vsyncpa [#allocation8], 0 }
   0x2   :  { %20 = vsyncpa [#allocation11], 0 }
   0x3   :  { %21 = vsyncpa [#allocation6], 0 }
   0x4   :  { %23 = vsyncpa [#allocation6 + $0x1], 0  ;;  %s7517_s25 = smov 0   ;;  %s7519_s26 = smov 0  }
   0x5   :  { %s7521_s27 = smov 0   ;;  %s7523_s28 = smov 0  }
   0x6 LB: > { %9781 = sst [smem:[#allocation17_spill]] %s7412_s25  ;;  %s7538_s29 = sadd.s32 4294967295, %s7424_s28   ;;  %s7424_s28 = sphi %s7523_s28, %s9858_s28   ;;  %s7420_s27 = sphi %s7521_s27, %s9860_s27   ;;  %s7416_s26 = sphi %s7519_s26, %s9862_s26   ;;  %s7412_s25 = sphi %s7517_s25, %s9861_s25  }
   0x7   : > { %9782 = sst [smem:[#allocation18_spill]] %s7420_s27  ;;  %s5716_s30 = sadd.s32 4294967294, %s7424_s28  }
   0x8   : > { %s7542_s14 = sadd.s32 1, %s7424_s28   ;;  %s314_s15 = sadd.s32 1, %s7420_s27 }
   0x9   : > { %9783 = sst [smem:[#allocation19_spill]] %s7542_s14  ;;  %s311_s16 = ssub.s32 %s7424_s28, %s7542_s14 }
   0xa   : > { %p324_p0 = scmp.ne.s32.totalorder %s7420_s27, %s7416_s26  ;;  %p312_p1 = scmp.eq.s32.totalorder %s311_s16, 0 }
   0xb   : > { %p325_p2 = scmp.eq.s32.totalorder %s7538_s29, 1  ;;  %p330_p3 = scmp.ne.s32.totalorder %s7416_s26, %s7412_s25 }
   0xc   : > { %p331_p4 = scmp.eq.s32.totalorder %s5716_s30, 1  ;;  %p5717_p7 = scmp.ge.s32.totalorder %s7424_s28, 1 }
   0xd   : > { %s7553_s17 = scalar_select %p312_p1, %s7420_s27, %s314_s15  }
   0xe   : > { %p7555_p5 = por %p325_p2, %p324_p0  ;;  %p7559_p6 = por %p331_p4, %p330_p3 }
   0xf   : > { %9784 = sst [smem:[#allocation20_spill]] %s7553_s17  ;;  %p338_p8 = scmp.lt.s32.totalorder %s7424_s28, 3 }
  0x10   : > { %s9786_s19 = scalar_select %p7559_p6, 1, 0 }
  0x11   : > { %p6867_p9 = scmp.eq.s32.totalorder %s7538_s29, 0  ;;  %p7566_p10 = pnand %p5717_p7, %p338_p8 }
  0x12   : > { %9787 = sst [smem:[#allocation21_spill]] %s9786_s19  ;;  %s7426_s21 = smov [#allocation7]  }
  0x13   : > { %s366_s22 = sshll.u32 %s7426_s21, 4  ;;  %p6850_p11 = pneg %p7566_p10  ;;  %s367_s22 = int_to_ptr.vmem [resolvable:$true] %s366_s22 }
  0x14   : > { %s7427_s24 = smov [#allocation4]   ;;  %s7259_s15 = scalar_lea.vmem %s367_s22, 2048 }
  0x15   : > { %p7574_p12 = pnand %p6867_p9, %p6850_p11  ;;  %s353_s30 = sshll.u32 %s7427_s24, 4  ;;  %s354_s30 = int_to_ptr.vmem [resolvable:$true] %s353_s30 }
  0x16   : > { %p7260_p0 = scmp.ne.s32.totalorder %s367_s22, %s7259_s15  ;;  %p7267_p3 = scmp.lt.s32.totalorder %s367_s22, %s367_s22 }
  0x17   : > { %p7250_p13 = pneg %p7574_p12  ;;  %p7268_p4 = scmp.lt.s32.totalorder %s7259_s15, %s7259_s15 }
  0x19   : > { %p7262_p1 = pnand %p7260_p0, %p7250_p13  ;;  %p7269_p7 = por %p7268_p4, %p7267_p3 }
  0x1b   : > { %p7263_p2 = pneg %p7262_p1 }
  0x1d   : > { %p7270_p8 = pnand %p7269_p7, %p7263_p2 }
  0x1f   : > { %7273 = shalt.err (!%p7270_p8)
}
  0x20   : > { %s9766_s16 = smov 128   ;;  %s7429_s21 = smov 8  }
  0x21   : > { %6856 = dma.hbm_to_vmem [thread:$0]  (!%p7574_p12), %s9750_s3, 2048, %s367_s22, [#allocation8], %s9766_s16, %s9766_s16, %s7429_s21  }
  0x22   : > { %s7285_s27 = scalar_lea.vmem %s354_s30, 3072  ;;  %p7293_p2 = scmp.lt.s32.totalorder %s354_s30, %s354_s30 }
  0x23   : > { %p7286_p11 = scmp.ne.s32.totalorder %s354_s30, %s7285_s27  ;;  %p7294_p3 = scmp.lt.s32.totalorder %s7285_s27, %s7285_s27 }
  0x25   : > { %p7288_p0 = pnand %p7286_p11, %p7250_p13  ;;  %p7295_p4 = por %p7294_p3, %p7293_p2 }
  0x27   : > { %p7289_p1 = pneg %p7288_p0 }
  0x29   : > { %p7296_p7 = pnand %p7295_p4, %p7289_p1 }
  0x2b   : > { %7299 = shalt.err (!%p7296_p7)
}
  0x2c   : > { %s7430_s15 = smov 384   ;;  %s7431_s14 = smov 24  }
  0x2d   : > { %6853 = dma.hbm_to_vmem [thread:$0]  (!%p7574_p12), %s9749_s2, 3072, %s354_s30, [#allocation5], %s7430_s15, %s7430_s15, %s7431_s14  }
  0x2e   : > { %s7432_s17 = smov [#allocation9]  }
  0x2f   : > { %s388_s22 = sshll.u32 %s7432_s17, 4  ;;  %s389_s22 = int_to_ptr.vmem [resolvable:$true] %s388_s22 }
  0x30   : > { %s7311_s24 = scalar_lea.vmem %s389_s22, 4096  ;;  %p7319_p1 = scmp.lt.s32.totalorder %s389_s22, %s389_s22 }
  0x31   : > { %p7312_p8 = scmp.ne.s32.totalorder %s389_s22, %s7311_s24  ;;  %p7320_p2 = scmp.lt.s32.totalorder %s7311_s24, %s7311_s24 }
  0x33   : > { %p7314_p11 = pnand %p7312_p8, %p7250_p13  ;;  %p7321_p3 = por %p7320_p2, %p7319_p1 }
  0x35   : > { %p7315_p0 = pneg %p7314_p11 }
  0x37   : > { %p7322_p4 = pnand %p7321_p3, %p7315_p0 }
  0x39   : > { %7325 = shalt.err (!%p7322_p4)
}
  0x3a   : > { %s7433_s27 = smov 256   ;;  %s7434_s16 = smov 16  }
  0x3b   : > { %6859 = dma.hbm_to_vmem [thread:$0]  (!%p7574_p12), %s9754_s7, 4096, %s389_s22, [#allocation8], %s7433_s27, %s7433_s27, %s7434_s16  }
  0x3c   : > { %s7435_s19 = smov [#allocation10]  }
  0x3d   : > { %s404_s30 = sshll.u32 %s7435_s19, 4  ;;  %s405_s30 = int_to_ptr.vmem [resolvable:$true] %s404_s30 }
  0x3e   : > { %s7337_s15 = scalar_lea.vmem %s405_s30, 4096  ;;  %p7345_p0 = scmp.lt.s32.totalorder %s405_s30, %s405_s30 }
  0x3f   : > { %p7338_p7 = scmp.ne.s32.totalorder %s405_s30, %s7337_s15  ;;  %p7346_p1 = scmp.lt.s32.totalorder %s7337_s15, %s7337_s15 }
  0x41   : > { %p7340_p8 = pnand %p7338_p7, %p7250_p13  ;;  %p7347_p2 = por %p7346_p1, %p7345_p0 }
  0x43   : > { %p7341_p11 = pneg %p7340_p8 }
  0x45   : > { %p7348_p3 = pnand %p7347_p2, %p7341_p11 }
  0x47   : > { %7351 = shalt.err (!%p7348_p3)
}
  0x48   : > { %s9790_s17 = smov 128   ;;  %437 = sbr.rel (%p7566_p10) target bundleno = 6235 (0x185b), region = 72 }
  0x49   : > { %6862 = dma.hbm_to_vmem [thread:$0]  (!%p7574_p12), %s9756_s9, 4096, %s405_s30, [#allocation11], %s9790_s17, %s9790_s17, %s7429_s21  }
  0x4d   : > { %7395 = dma.done.wait (%p6867_p9), [#allocation5], 3072  }
  0x4e   : > { %7397 = vsyncadd (%p6867_p9), [#allocation5], 4294964224 }
  0x4f   : > { %7399 = dma.done.wait (%p6867_p9), [#allocation8], 6144  }
  0x50   : > { %7401 = vsyncadd (%p6867_p9), [#allocation8], 4294961152 }
  0x51   : > { %7403 = dma.done.wait (%p6867_p9), [#allocation11], 4096  }
  0x52   : > { %7405 = vsyncadd (%p6867_p9), [#allocation11], 4294963200  ;;  %p493_p10 = scmp.lt.s32.totalorder %s7538_s29, 1  ;;  %v9767_v0 = vmov 0.0   ;;  %v592_v3 = vld [vmem:[%s9748_s1 + $0x170] sm:$0xff]  ;;  %v591_v4 = vld [vmem:[%s9748_s1 + $0x168] sm:$0xff] }
  0x53   : > { %682 = vmatprep.mubr.f32.mxu0 %v9767_v0  ;;  %618 = vmatprep.subr.mxu0 %v592_v3  ;;  %v589_v6 = vld [vmem:[%s9748_s1 + $0x158] sm:$0xff]  ;;  %v588_v7 = vld [vmem:[%s9748_s1 + $0x150] sm:$0xff]  ;;  %v586_v8 = vld [vmem:[%s9748_s1 + $0x140] sm:$0xff]  ;;  %vm884_vm0 = vcmask 130048   ;;  %s7438_s25 = smov 96   ;;  %vm1038_vm1 = vcmask 523264  }
  0x54   : > { %s494_s20 = scalar_select %p493_p10, %s7538_s29, 1  ;;  %619 = vmatpush1.msra.mxu0 %v591_v4  ;;  %v593_v9 = vld [vmem:[%s9748_s1 + $0x178] sm:$0xff]  ;;  %v590_v11 = vld [vmem:[%s9748_s1 + $0x160] sm:$0xff]  ;;  %v583_v12 = vld [vmem:[%s9748_s1 + $0x128] sm:$0xff]  ;;  %vm1754_vm2 = vcmask 261248   ;;  %vm2253_vm3 = vcmask 392448  }
  0x55   : > { %620 = vmatprep.subr.mxu0 %v589_v6  ;;  %6296 = vmatprep.subr.mxu1 %v593_v9  ;;  %v585_v10 = vld [vmem:[%s9748_s1 + $0x138] sm:$0xff]  ;;  %v582_v14 = vld [vmem:[%s9748_s1 + $0x120] sm:$0xff]  ;;  %v580_v15 = vld [vmem:[%s9748_s1 + $0x110] sm:$0xff]  ;;  %s7439_s14 = smov 80   ;;  %s7440_s19 = smov 64   ;;  %vm2752_vm4 = vcmask 523648  }
  0x56   : > { %s5934_s23 = sshll.u32 %s494_s20, 7  ;;  %621 = vmatpush1.msra.mxu0 %v588_v7  ;;  %6297 = vmatpush3.msra.mxu1 %v593_v9  ;;  %v587_v16 = vld [vmem:[%s9748_s1 + $0x148] sm:$0xff]  ;;  %v577_v18 = vld [vmem:[%s9748_s1 + $0xf8] sm:$0xff]  ;;  %v584_v19 = vld [vmem:[%s9748_s1 + $0x130] sm:$0xff]  ;;  %s7441_s30 = smov 48   ;;  %vm3251_vm5 = vcmask 654848  }
  0x57   : > { %s7638_s27 = scalar_lea.vmem %s9747_s0, %s5934_s23  ;;  %622 = vmatprep.subr.mxu0 %v586_v8  ;;  %6298 = vmatprep.subr.mxu1 %v590_v11  ;;  %v579_v17 = vld [vmem:[%s9748_s1 + $0x108] sm:$0xff]  ;;  %v576_v21 = vld [vmem:[%s9748_s1 + $0xf0] sm:$0xff]  ;;  %v574_v22 = vld [vmem:[%s9748_s1 + $0xe0] sm:$0xff]  ;;  %s7442_s15 = smov 32   ;;  %vm3750_vm6 = vcmask 786048   ;;  %vm4249_vm7 = vcmask 917248  }
  0x58   : > { %v498_v1 = vld [vmem:[%s7638_s27] sm:$0xff]  ;;  %v499_v2 = vld [vmem:[%s7638_s27 + $0x8] sm:$0xff]  ;;  %v500_v5 = vld [vmem:[%s7638_s27 + $0x10] sm:$0xff]  ;;  %623 = vmatpush1.msra.mxu0 %v585_v10  ;;  %6299 = vmatpush3.msra.mxu1 %v590_v11  ;;  %s7443_s17 = smov 16   ;;  %vm4748_vm8 = vcmask 1048448   ;;  %s5935_s21 = sshll.u32 %s7538_s29, 10 }
  0x59   : > { %514 = vxpose.xlu0.b32.start [1/16] (narrow) %v498_v1, 64  ;;  %v501_v13 = vld [vmem:[%s7638_s27 + $0x18] sm:$0xff]  ;;  %624 = vmatprep.subr.mxu0 %v583_v12  ;;  %v502_v20 = vld [vmem:[%s7638_s27 + $0x20] sm:$0xff]  ;;  %v571_v25 = vld [vmem:[%s9748_s1 + $0xc8] sm:$0xff]  ;;  %s7444_s29 = smov [#allocation12]  }
  0x5a   : > { %625 = vmatpush1.msra.mxu0 %v582_v14  ;;  %6300 = vmatprep.subr.mxu1 %v587_v16  ;;  %v581_v23 = vld [vmem:[%s9748_s1 + $0x118] sm:$0xff]  ;;  %v503_v26 = vld [vmem:[%s7638_s27 + $0x28] sm:$0xff]  ;;  %v578_v27 = vld [vmem:[%s9748_s1 + $0x100] sm:$0xff] }
  0x5b   : > { %626 = vmatprep.subr.mxu0 %v580_v15  ;;  %6301 = vmatpush3.msra.mxu1 %v587_v16  ;;  %v573_v24 = vld [vmem:[%s9748_s1 + $0xd8] sm:$0xff]  ;;  %v570_v28 = vld [vmem:[%s9748_s1 + $0xc0] sm:$0xff]  ;;  %v568_v29 = vld [vmem:[%s9748_s1 + $0xb0] sm:$0xff] }
  0x5c   : > { %627 = vmatpush1.msra.mxu0 %v579_v17  ;;  %6302 = vmatprep.subr.mxu1 %v584_v19  ;;  %v575_v30 = vld [vmem:[%s9748_s1 + $0xe8] sm:$0xff]  ;;  %v504_v32 = vld [vmem:[%s7638_s27 + $0x30] sm:$0xff]  ;;  %v565_v33 = vld [vmem:[%s9748_s1 + $0x98] sm:$0xff] }
  0x5d   : > { %515 = vxpose.xlu0.b32.cont [2/16] (narrow) %v499_v2, 64  ;;  %628 = vmatprep.subr.mxu0 %v577_v18  ;;  %v567_v31 = vld [vmem:[%s9748_s1 + $0xa8] sm:$0xff]  ;;  %v572_v34 = vld [vmem:[%s9748_s1 + $0xd0] sm:$0xff]  ;;  %v562_v36 = vld [vmem:[%s9748_s1 + $0x80] sm:$0xff] }
  0x5e   : > { %629 = vmatpush1.msra.mxu0 %v576_v21  ;;  %6303 = vmatpush3.msra.mxu1 %v584_v19  ;;  %v564_v35 = vld [vmem:[%s9748_s1 + $0x90] sm:$0xff]  ;;  %v569_v37 = vld [vmem:[%s9748_s1 + $0xb8] sm:$0xff]  ;;  %v559_v40 = vld [vmem:[%s9748_s1 + $0x68] sm:$0xff] }
  0x5f   : > { %630 = vmatprep.subr.mxu0 %v574_v22  ;;  %6304 = vmatprep.subr.mxu1 %v581_v23  ;;  %v561_v38 = vld [vmem:[%s9748_s1 + $0x78] sm:$0xff]  ;;  %v566_v41 = vld [vmem:[%s9748_s1 + $0xa0] sm:$0xff]  ;;  %v556_v43 = vld [vmem:[%s9748_s1 + $0x50] sm:$0xff] }
  0x60   : > { %631 = vmatpush1.msra.mxu0 %v573_v24  ;;  %6305 = vmatpush3.msra.mxu1 %v581_v23  ;;  %v505_v39 = vld [vmem:[%s7638_s27 + $0x38] sm:$0xff]  ;;  %v558_v42 = vld [vmem:[%s9748_s1 + $0x60] sm:$0xff]  ;;  %v563_v44 = vld [vmem:[%s9748_s1 + $0x88] sm:$0xff] }
  0x61   : > { %516 = vxpose.xlu0.b32.cont [3/16] (narrow) %v500_v5, 64  ;;  %632 = vmatprep.subr.mxu0 %v571_v25  ;;  %v506_v45 = vld [vmem:[%s7638_s27 + $0x40] sm:$0xff]  ;;  %v555_v46 = vld [vmem:[%s9748_s1 + $0x48] sm:$0xff]  ;;  %v553_v47 = vld [vmem:[%s9748_s1 + $0x38] sm:$0xff] }
  0x62   : > { %6306 = vmatprep.subr.mxu1 %v578_v27  ;;  %633 = vmatpush1.msra.mxu0 %v570_v28  ;;  %v560_v48 = vld [vmem:[%s9748_s1 + $0x70] sm:$0xff]  ;;  %v550_v50 = vld [vmem:[%s9748_s1 + $0x20] sm:$0xff]  ;;  %v507_v51 = vld [vmem:[%s7638_s27 + $0x48] sm:$0xff] }
  0x63   : > { %6307 = vmatpush3.msra.mxu1 %v578_v27  ;;  %634 = vmatprep.subr.mxu0 %v568_v29  ;;  %v552_v49 = vld [vmem:[%s9748_s1 + $0x30] sm:$0xff]  ;;  %v557_v52 = vld [vmem:[%s9748_s1 + $0x58] sm:$0xff]  ;;  %v547_v54 = vld [vmem:[%s9748_s1 + $0x8] sm:$0xff] }
  0x64   : > { %6308 = vmatprep.subr.mxu1 %v575_v30  ;;  %635 = vmatpush1.msra.mxu0 %v567_v31  ;;  %v549_v53 = vld [vmem:[%s9748_s1 + $0x18] sm:$0xff]  ;;  %v554_v55 = vld [vmem:[%s9748_s1 + $0x40] sm:$0xff]  ;;  %v508_v57 = vld [vmem:[%s7638_s27 + $0x50] sm:$0xff] }
  0x65   : > { %517 = vxpose.xlu0.b32.cont [4/16] (narrow) %v501_v13, 64  ;;  %6309 = vmatpush3.msra.mxu1 %v575_v30  ;;  %v546_v56 = vld [vmem:[%s9748_s1] sm:$0xff]  ;;  %v551_v58 = vld [vmem:[%s9748_s1 + $0x28] sm:$0xff]  ;;  %v548_v59 = vld [vmem:[%s9748_s1 + $0x10] sm:$0xff] }
  0x66   : > { %636 = vmatprep.subr.mxu0 %v565_v33  ;;  %6310 = vmatprep.subr.mxu1 %v572_v34  ;;  %v509_v60 = vld [vmem:[%s7638_s27 + $0x58] sm:$0xff]  ;;  %v510_v61 = vld [vmem:[%s7638_s27 + $0x60] sm:$0xff]  ;;  %v511_v62 = vld [vmem:[%s7638_s27 + $0x68] sm:$0xff] }
  0x67   : > { %637 = vmatpush1.msra.mxu0 %v564_v35  ;;  %6311 = vmatpush3.msra.mxu1 %v572_v34  ;;  %v512_v63 = vld [vmem:[%s7638_s27 + $0x70] sm:$0xff]  ;;  %v513_v1 = vld [vmem:[%s7638_s27 + $0x78] sm:$0xff]  ;;  %v594_v10 = vld [vmem:[#allocation4] sm:$0xff]  ;;  %s7437_s27 = smov 112  }
  0x68   : > { %638 = vmatprep.subr.mxu0 %v562_v36  ;;  %6312 = vmatprep.subr.mxu1 %v569_v37  ;;  %v613_v30 = vld [vmem:[#allocation4 + $0x98] sm:$0xff]  ;;  %v610_v35 = vld [vmem:[#allocation4 + $0x80] sm:$0xff] }
  0x69   : > { %518 = vxpose.xlu0.b32.cont [5/16] (narrow) %v502_v20, 64  ;;  %639 = vmatpush1.msra.mxu0 %v561_v38  ;;  %v617_v33 = vld [vmem:[#allocation4 + $0xb8] sm:$0xff]  ;;  %v616_v38 = vld [vmem:[#allocation4 + $0xb0] sm:$0xff] }
  0x6a   : > { %6313 = vmatpush3.msra.mxu1 %v569_v37  ;;  %640 = vmatprep.subr.mxu0 %v559_v40 }
  0x6b   : > { %6314 = vmatprep.subr.mxu1 %v566_v41  ;;  %641 = vmatpush1.msra.mxu0 %v558_v42 }
  0x6c   : > { %6315 = vmatpush3.msra.mxu1 %v566_v41  ;;  %642 = vmatprep.subr.mxu0 %v556_v43  ;;  %v611_v43 = vld [vmem:[#allocation4 + $0x88] sm:$0xff] }
  0x6d   : > { %519 = vxpose.xlu0.b32.cont [6/16] (narrow) %v503_v26, 64  ;;  %6316 = vmatprep.subr.mxu1 %v563_v44 }
  0x6e   : > { %643 = vmatpush1.msra.mxu0 %v555_v46  ;;  %6317 = vmatpush3.msra.mxu1 %v563_v44 }
  0x6f   : > { %644 = vmatprep.subr.mxu0 %v553_v47  ;;  %6318 = vmatprep.subr.mxu1 %v560_v48  ;;  %v607_v47 = vld [vmem:[#allocation4 + $0x68] sm:$0xff] }
  0x70   : > { %645 = vmatpush1.msra.mxu0 %v552_v49  ;;  %6319 = vmatpush3.msra.mxu1 %v560_v48  ;;  %v598_v48 = vld [vmem:[#allocation4 + $0x20] sm:$0xff]  ;;  %v608_v49 = vld [vmem:[#allocation4 + $0x70] sm:$0xff] }
  0x71   : > { %520 = vxpose.xlu0.b32.cont [7/16] (narrow) %v504_v32, 64  ;;  %646 = vmatprep.subr.mxu0 %v550_v50 }
  0x72   : > { %6320 = vmatprep.subr.mxu1 %v557_v52  ;;  %647 = vmatpush1.msra.mxu0 %v549_v53 }
  0x73   : > { %6321 = vmatpush3.msra.mxu1 %v557_v52  ;;  %648 = vmatprep.subr.mxu0 %v547_v54  ;;  %v604_v54 = vld [vmem:[#allocation4 + $0x50] sm:$0xff] }
  0x74   : > { %6322 = vmatprep.subr.mxu1 %v554_v55  ;;  %649 = vmatpush1.msra.mxu0 %v546_v56  ;;  %v595_v56 = vld [vmem:[#allocation4 + $0x8] sm:$0xff] }
  0x75   : > { %521 = vxpose.xlu0.b32.cont [8/16] (narrow) %v505_v39, 64  ;;  %6323 = vmatpush3.msra.mxu1 %v554_v55  ;;  %v614_v39 = vld [vmem:[#allocation4 + $0xa0] sm:$0xff] }
  0x76   : > { %6324 = vmatprep.subr.mxu1 %v551_v58 }
  0x77   : > { %6325 = vmatpush3.msra.mxu1 %v551_v58 }
  0x78   : > { %6326 = vmatprep.subr.mxu1 %v548_v59 }
  0x79   : > { %522 = vxpose.xlu0.b32.cont [9/16] (narrow) %v506_v45, 64  ;;  %6327 = vmatpush3.msra.mxu1 %v548_v59  ;;  %v599_v59 = vld [vmem:[#allocation4 + $0x28] sm:$0xff] }
  0x7d   : > { %523 = vxpose.xlu0.b32.cont [10/16] (narrow) %v507_v51, 64  ;;  %v605_v51 = vld [vmem:[#allocation4 + $0x58] sm:$0xff] }
  0x81   : > { %524 = vxpose.xlu0.b32.cont [11/16] (narrow) %v508_v57, 64  ;;  %v602_v57 = vld [vmem:[#allocation4 + $0x40] sm:$0xff] }
  0x85   : > { %525 = vxpose.xlu0.b32.cont [12/16] (narrow) %v509_v60, 64 }
  0x89   : > { %526 = vxpose.xlu0.b32.cont [13/16] (narrow) %v510_v61, 64 }
  0x8d   : > { %527 = vxpose.xlu0.b32.cont [14/16] (narrow) %v511_v62, 64  ;;  %v601_v62 = vld [vmem:[#allocation4 + $0x38] sm:$0xff] }
  0x91   : > { %528 = vxpose.xlu0.b32.cont [15/16] (narrow) %v512_v63, 64 }
  0x95   : > { %529 = vxpose.xlu0.b32.end [16/16] (narrow) %v513_v1, 64  ;;  %v596_v1 = vld [vmem:[#allocation4 + $0x10] sm:$0xff] }
  0xd5   : > { %v7800_v2 = vpop.trf.xlu0 }
  0xd6   : > { %9791 = vst [vmem:[#allocation22_spill] sm:$0xff] %v7800_v2  ;;  %683 = vmatmul.mubr.f32.vlgmr.msra.gmra.mxu0 %v7800_v2  ;;  %6328 = vmatprep.mubr.f32.mxu1 %v7800_v2 }
  0xd7   : > { %688 = vmatprep.mubr.f32.mxu0 %v9767_v0 }
  0xd9   : > { %v7805_v3 = vpop.trf.xlu0 }
  0xda   : > { %9792 = vst [vmem:[#allocation23_spill] sm:$0xff] %v7805_v3  ;;  %689 = vmatmul.mubr.f32.gmra.mxu0 %v7805_v3  ;;  %6329 = vmatmul.mubr.f32.vlgmr.msra.gmra.mxu1 %v7805_v3 }
  0xdb   : > { %694 = vmatprep.mubr.f32.mxu0 %v9767_v0 }
  0xdd   : > { %v7810_v4 = vpop.trf.xlu0 }
  0xde   : > { %9793 = vst [vmem:[#allocation24_spill] sm:$0xff] %v7810_v4  ;;  %695 = vmatmul.mubr.f32.gmra.mxu0 %v7810_v4  ;;  %6331 = vmatprep.mubr.f32.mxu1 %v7810_v4 }
  0xdf   : > { %700 = vmatprep.mubr.f32.mxu0 %v9767_v0 }
  0xe1   : > { %v7815_v5 = vpop.trf.xlu0 }
  0xe2   : > { %9794 = vst [vmem:[#allocation25_spill] sm:$0xff] %v7815_v5  ;;  %701 = vmatmul.mubr.f32.gmra.mxu0 %v7815_v5  ;;  %6332 = vmatmul.mubr.f32.gmra.mxu1 %v7815_v5 }
  0xe3   : > { %706 = vmatprep.mubr.f32.mxu0 %v9767_v0 }
  0xe5   : > { %v7820_v6 = vpop.trf.xlu0 }
  0xe6   : > { %9795 = vst [vmem:[#allocation26_spill] sm:$0xff] %v7820_v6  ;;  %707 = vmatmul.mubr.f32.gmra.mxu0 %v7820_v6  ;;  %6334 = vmatprep.mubr.f32.mxu1 %v7820_v6 }
  0xe7   : > { %712 = vmatprep.mubr.f32.mxu0 %v9767_v0 }
  0xe9   : > { %v7825_v7 = vpop.trf.xlu0 }
  0xea   : > { %9796 = vst [vmem:[#allocation27_spill] sm:$0xff] %v7825_v7  ;;  %713 = vmatmul.mubr.f32.gmra.mxu0 %v7825_v7  ;;  %6335 = vmatmul.mubr.f32.gmra.mxu1 %v7825_v7 }
  0xeb   : > { %718 = vmatprep.mubr.f32.mxu0 %v9767_v0 }
  0xed   : > { %v7830_v8 = vpop.trf.xlu0 }
  0xee   : > { %9797 = vst [vmem:[#allocation28_spill] sm:$0xff] %v7830_v8  ;;  %719 = vmatmul.mubr.f32.gmra.mxu0 %v7830_v8  ;;  %6337 = vmatprep.mubr.f32.mxu1 %v7830_v8 }
  0xef   : > { %724 = vmatprep.mubr.f32.mxu0 %v9767_v0 }
  0xf1   : > { %v7835_v9 = vpop.trf.xlu0 }
  0xf2   : > { %9798 = vst [vmem:[#allocation29_spill] sm:$0xff] %v7835_v9  ;;  %725 = vmatmul.mubr.f32.gmra.mxu0 %v7835_v9  ;;  %6338 = vmatmul.mubr.f32.gmra.mxu1 %v7835_v9 }
 0x196   : > { %v684_v11 = vpop.f32.mrf.mxu0 }
 0x197   : > { %v7839_v12 = vadd.f32 %v684_v11, %v594_v10 }
 0x198   : > { %v7841_v13 = vpop.f32.mrf.mxu0 }
 0x199   : > { %6356 = vmatprep.mubr.msk.f32.mxu0 %vm884_vm0, %v7839_v12  ;;  %v7914_v61 = vadd.f32 %v7841_v13, %v595_v56 }
 0x19a   : > { %v7845_v14 = vpop.f32.mrf.mxu0  ;;  %v7849_v17 = vpop.f32.mrf.mxu1 }
 0x19b   : > { %v7925_v10 = vadd.f32 %v7849_v17, %v599_v59 }
 0x19c   : > { %v692_v15 = vpop.f32.mrf.mxu0  ;;  %v7855_v20 = vpop.f32.mrf.mxu1 }
 0x19d   : > { %v7893_v53 = vadd.f32 %v692_v15, %v598_v48  ;;  %v7937_v13 = vadd.f32 %v7855_v20, %v596_v1  ;;  %v603_v15 = vld [vmem:[#allocation4 + $0x48] sm:$0xff] }
 0x19e   : > { %v7847_v16 = vpop.f32.mrf.mxu0 }
 0x19f   : > { %9800 = vst [vmem:[#allocation31_spill] sm:$0xff] %v7937_v13 }
 0x1a0   : > { %v7851_v18 = vpop.f32.mrf.mxu0 }
 0x1a1   : > { %v7931_v11 = vadd.f32 %v7851_v18, %v601_v62  ;;  %v606_v18 = vld [vmem:[#allocation4 + $0x60] sm:$0xff] }
 0x1a2   : > { %v7853_v19 = vpop.f32.mrf.mxu0  ;;  %v6333_v22 = vpop.f32.mrf.mxu1 }
 0x1a3   : > { %v7903_v58 = vadd.f32 %v6333_v22, %v605_v51  ;;  %v7960_v17 = vadd.f32 %v7853_v19, %v603_v15  ;;  %v597_v19 = vld [vmem:[#allocation4 + $0x18] sm:$0xff]  ;;  %v600_v22 = vld [vmem:[#allocation4 + $0x30] sm:$0xff] }
 0x1a4   : > { %v704_v21 = vpop.f32.mrf.mxu0  ;;  %v807_v25 = vpop.f32.mrf.mxu1 }
 0x1a5   : > { %v7908_v60 = vadd.f32 %v704_v21, %v604_v54  ;;  %v7916_v63 = vadd.f32 %v807_v25, %v602_v57  ;;  %v615_v21 = vld [vmem:[#allocation4 + $0xa8] sm:$0xff]  ;;  %v7994_v25 = vadd.f32 %v7847_v16, %v600_v22 }
 0x1a6   : > { %v7857_v23 = vpop.f32.mrf.mxu0 }
 0x1a7   : > { %v7971_v20 = vadd.f32 %v7857_v23, %v606_v18  ;;  %v7988_v23 = vadd.f32 %v7845_v14, %v597_v19 }
 0x1a8   : > { %v710_v24 = vpop.f32.mrf.mxu0 }
 0x1a9   : > { %v7888_v52 = vadd.f32 %v710_v24, %v607_v47 }
 0x1aa   : > { %v7859_v26 = vpop.f32.mrf.mxu0  ;;  %v6336_v27 = vpop.f32.mrf.mxu1 }
 0x1ab   : > { %v7882_v50 = vadd.f32 %v6336_v27, %v611_v43  ;;  %v609_v27 = vld [vmem:[#allocation4 + $0x78] sm:$0xff] }
 0x1ac   : > { %v716_v28 = vpop.f32.mrf.mxu0  ;;  %v817_v31 = vpop.f32.mrf.mxu1  ;;  %v8009_v14 = vadd.f32 %v7859_v26, %v609_v27 }
 0x1ad   : > { %v7871_v44 = vadd.f32 %v716_v28, %v610_v35  ;;  %v7895_v55 = vadd.f32 %v817_v31, %v608_v49  ;;  %v612_v28 = vld [vmem:[#allocation4 + $0x90] sm:$0xff] }
 0x1ae   : > { %v7861_v29 = vpop.f32.mrf.mxu0 }
 0x1af   : > { %v8012_v16 = vadd.f32 %v7861_v29, %v612_v28 }
 0x1b0   : > { %v722_v32 = vpop.f32.mrf.mxu0 }
 0x1b1   : > { %v7863_v34 = vadd.f32 %v722_v32, %v613_v30 }
 0x1b2   : > { %v7865_v36 = vpop.f32.mrf.mxu0  ;;  %v6339_v37 = vpop.f32.mrf.mxu1 }
 0x1b3   : > { %9799 = vst [vmem:[#allocation30_spill] sm:$0xff] %v7863_v34  ;;  %v7867_v40 = vadd.f32 %v6339_v37, %v617_v33  ;;  %1332 = vrot.lane.b32.xlu1 %v7863_v34, %s7437_s27  ;;  %v7991_v24 = vadd.f32 %v7865_v36, %v615_v21 }
 0x1b4   : > { %v728_v41 = vpop.f32.mrf.mxu0  ;;  %v827_v42 = vpop.f32.mrf.mxu1 }
 0x1b5   : > { %v7873_v45 = vadd.f32 %v728_v41, %v616_v38  ;;  %v7875_v46 = vadd.f32 %v827_v42, %v614_v39  ;;  %6368 = vmatprep.subr.mxu1 %v7867_v40 }
 0x1b6   : > { %6369 = vmatpush3.msra.mxu1 %v7867_v40 }
 0x1b7   : > { %1330 = vrot.lane.b32.xlu1 %v7871_v44, %s7437_s27  ;;  %6370 = vmatprep.subr.mxu1 %v7875_v46 }
 0x1b8   : > { %1334 = vrot.lane.b32.xlu0 %v7873_v45, %s7437_s27  ;;  %6340 = vmatprep.subr.msk.mxu0 %vm884_vm0, %v7873_v45 }
 0x1b9   : > { %6341 = vmatpush3.xpose.msk.msra.mxu0 %vm884_vm0, %v7873_v45  ;;  %6371 = vmatpush3.msra.mxu1 %v7875_v46 }
 0x1ba   : > { %6342 = vmatprep.subr.msk.mxu0 %vm884_vm0, %v7863_v34  ;;  %6372 = vmatprep.subr.mxu1 %v7882_v50 }
 0x1bb   : > { %6373 = vmatpush3.msra.mxu1 %v7882_v50  ;;  %1328 = vrot.lane.b32.xlu1 %v7888_v52, %s7437_s27 }
 0x1bc   : > { %6374 = vmatprep.subr.mxu1 %v7895_v55  ;;  %1322 = vrot.lane.b32.xlu0 %v7893_v53, %s7437_s27 }
 0x1bd   : > { %6343 = vmatpush3.xpose.msk.msra.mxu0 %vm884_vm0, %v7863_v34  ;;  %6375 = vmatpush3.msra.mxu1 %v7895_v55 }
 0x1be   : > { %6344 = vmatprep.subr.msk.mxu0 %vm884_vm0, %v7871_v44  ;;  %6376 = vmatprep.subr.mxu1 %v7903_v58 }
 0x1bf   : > { %6377 = vmatpush3.msra.mxu1 %v7903_v58  ;;  %1326 = vrot.lane.b32.xlu1 %v7908_v60, %s7437_s27 }
 0x1c0   : > { %6378 = vmatprep.subr.mxu1 %v7916_v63  ;;  %1320 = vrot.lane.b32.xlu0 %v7914_v61, %s7437_s27 }
 0x1c1   : > { %6345 = vmatpush3.xpose.msk.msra.mxu0 %vm884_vm0, %v7871_v44  ;;  %6379 = vmatpush3.msra.mxu1 %v7916_v63 }
 0x1c2   : > { %6346 = vmatprep.subr.msk.mxu0 %vm884_vm0, %v7888_v52  ;;  %6380 = vmatprep.subr.mxu1 %v7925_v10 }
 0x1c3   : > { %6381 = vmatpush3.msra.mxu1 %v7925_v10  ;;  %1324 = vrot.lane.b32.xlu1 %v7931_v11, %s7437_s27 }
 0x1c4   : > { %6382 = vmatprep.subr.mxu1 %v7937_v13  ;;  %1296 = vrot.lane.b32.xlu0 %v7839_v12, %s7437_s27 }
 0x1c5   : > { %6347 = vmatpush3.xpose.msk.msra.mxu0 %vm884_vm0, %v7888_v52  ;;  %6383 = vmatpush3.msra.mxu1 %v7937_v13 }
 0x1c6   : > { %6348 = vmatprep.subr.msk.mxu0 %vm884_vm0, %v7908_v60 }
 0x1c7   : > { %1831 = vrot.lane.b32.xlu1 %v7863_v34, %s7438_s25 }
 0x1c8   : > { %1825 = vrot.lane.b32.xlu0 %v7908_v60, %s7438_s25 }
 0x1c9   : > { %6349 = vmatpush3.xpose.msk.msra.mxu0 %vm884_vm0, %v7908_v60 }
 0x1ca   : > { %6350 = vmatprep.subr.msk.mxu0 %vm884_vm0, %v7931_v11 }
 0x1cb   : > { %1829 = vrot.lane.b32.xlu1 %v7871_v44, %s7438_s25 }
 0x1cc   : > { %1302 = vrot.lane.b32.xlu0 %v7960_v17, %s7437_s27 }
 0x1cd   : > { %6351 = vmatpush3.xpose.msk.msra.mxu0 %vm884_vm0, %v7931_v11 }
 0x1ce   : > { %6352 = vmatprep.subr.msk.mxu0 %vm884_vm0, %v7893_v53 }
 0x1cf   : > { %1833 = vrot.lane.b32.xlu1 %v7873_v45, %s7438_s25 }
 0x1d0   : > { %1304 = vrot.lane.b32.xlu0 %v7971_v20, %s7437_s27 }
 0x1d1   : > { %6353 = vmatpush3.xpose.msk.msra.mxu0 %vm884_vm0, %v7893_v53 }
 0x1d2   : > { %6354 = vmatprep.subr.msk.mxu0 %vm884_vm0, %v7914_v61 }
 0x1d4   : > { %1821 = vrot.lane.b32.xlu0 %v7893_v53, %s7438_s25 }
 0x1d5   : > { %6355 = vmatpush3.xpose.msk.msra.mxu0 %vm884_vm0, %v7914_v61 }
 0x1d8   : > { %6357 = vmatmul.mubr.msk.f32.vlgmr.msra.gmra.mxu0 %vm884_vm0, %v7988_v23  ;;  %1310 = vrot.lane.b32.xlu0 %v7991_v24, %s7437_s27 }
 0x1d9   : > { %6359 = vmatprep.mubr.msk.f32.mxu0 %vm884_vm0, %v7994_v25 }
 0x1dc   : > { %6360 = vmatmul.mubr.msk.f32.gmra.mxu0 %vm884_vm0, %v7960_v17  ;;  %1795 = vrot.lane.b32.xlu0 %v7839_v12, %s7438_s25 }
 0x1dd   : > { %6362 = vmatprep.mubr.msk.f32.mxu0 %vm884_vm0, %v7971_v20 }
 0x1e0   : > { %6363 = vmatmul.mubr.msk.f32.gmra.mxu0 %vm884_vm0, %v8009_v14  ;;  %1799 = vrot.lane.b32.xlu0 %v7994_v25, %s7438_s25 }
 0x1e1   : > { %6365 = vmatprep.mubr.msk.f32.mxu0 %vm884_vm0, %v8012_v16 }
 0x1e4   : > { %1803 = vrot.lane.b32.xlu0 %v7971_v20, %s7438_s25  ;;  %6366 = vmatmul.mubr.msk.f32.gmra.mxu0 %vm884_vm0, %v7991_v24 }
 0x1e8   : > { %1807 = vrot.lane.b32.xlu0 %v8012_v16, %s7438_s25 }
 0x225   : > { %v8026_v26 = vpop.permute.xlu1 %1332 }
 0x229   : > { %v8028_v29 = vpop.permute.xlu1 %1330 }
 0x22a   : > { %v8030_v30 = vpop.permute.xlu0 %1334 }
 0x22b   : > { %6396 = vmatprep.subr.msk.mxu1 %vm884_vm0, %v8030_v30 }
 0x22d   : > { %v8034_v31 = vpop.permute.xlu1 %1328 }
 0x22e   : > { %v8036_v32 = vpop.permute.xlu0 %1322 }
 0x231   : > { %v8038_v33 = vpop.permute.xlu1 %1326 }
 0x232   : > { %v8040_v35 = vpop.permute.xlu0 %1320 }
 0x235   : > { %v8042_v36 = vpop.permute.xlu1 %1324 }
 0x236   : > { %v8044_v37 = vpop.permute.xlu0 %1296 }
 0x239   : > { %v1832_v38 = vpop.permute.xlu1 %1831 }
 0x23a   : > { %v8046_v39 = vpop.permute.xlu0 %1825 }
 0x23d   : > { %v1830_v41 = vpop.permute.xlu1 %1829 }
 0x23e   : > { %v8048_v42 = vpop.permute.xlu0 %1302 }
 0x241   : > { %v1834_v43 = vpop.permute.xlu1 %1833 }
 0x242   : > { %v8050_v47 = vpop.permute.xlu0 %1304  ;;  %6452 = vmatprep.subr.msk.mxu0 %vm884_vm0, %v1834_v43 }
 0x243   : > { %6453 = vmatpush3.xpose.msk.msra.mxu0 %vm884_vm0, %v1834_v43 }
 0x244   : > { %6454 = vmatprep.subr.msk.mxu0 %vm884_vm0, %v1832_v38 }
 0x246   : > { %v8055_v48 = vpop.permute.xlu0 %1821 }
 0x247   : > { %6455 = vmatpush3.xpose.msk.msra.mxu0 %vm884_vm0, %v1832_v38 }
 0x248   : > { %6456 = vmatprep.subr.msk.mxu0 %vm884_vm0, %v1830_v41 }
 0x24a   : > { %v8059_v49 = vpop.permute.xlu0 %1310 }
 0x24b   : > { %6457 = vmatpush3.xpose.msk.msra.mxu0 %vm884_vm0, %v1830_v41 }
 0x24e   : > { %v1796_v51 = vpop.permute.xlu0 %1795 }
 0x24f   : > { %6468 = vmatprep.mubr.msk.f32.mxu0 %vm884_vm0, %v1796_v51 }
 0x298   : > { %v6358_v54 = vpop.f32.mrf.mxu0 }
 0x299   : > { %v1042_v56 = vsel %vm1038_vm1, %v6358_v54, -inf }
 0x29a   : > { %1043 = vmax.xlane.f32.xlu1 %v1042_v56  ;;  %v999_v57 = vpop.f32.mrf.mxu0 }
 0x29b   : > { %v1039_v59 = vsel %vm1038_vm1, %v999_v57, -inf }
 0x29c   : > { %v6361_v62 = vpop.f32.mrf.mxu0 }
 0x29d   : > { %v1048_v1 = vsel %vm1038_vm1, %v6361_v62, -inf }
 0x29e   : > { %1040 = vmax.xlane.f32.xlu1 %v1039_v59  ;;  %v1009_v15 = vpop.f32.mrf.mxu0 }
 0x29f   : > { %v1045_v18 = vsel %vm1038_vm1, %v1009_v15, -inf }
 0x2a0   : > { %v6364_v19 = vpop.f32.mrf.mxu0 }
 0x2a1   : > { %v1054_v21 = vsel %vm1038_vm1, %v6364_v19, -inf }
 0x2a2   : > { %1049 = vmax.xlane.f32.xlu1 %v1048_v1  ;;  %v1019_v22 = vpop.f32.mrf.mxu0 }
 0x2a3   : > { %v1051_v27 = vsel %vm1038_vm1, %v1019_v22, -inf }
 0x2a4   : > { %v6367_v28 = vpop.f32.mrf.mxu0 }
 0x2a5   : > { %v1060_v38 = vsel %vm1038_vm1, %v6367_v28, -inf }
 0x2a6   : > { %1046 = vmax.xlane.f32.xlu1 %v1045_v18  ;;  %v1029_v41 = vpop.f32.mrf.mxu0 }
 0x2a7   : > { %v1057_v43 = vsel %vm1038_vm1, %v1029_v41, -inf }
 0x2aa   : > { %1055 = vmax.xlane.f32.xlu1 %v1054_v21 }
 0x2ae   : > { %1052 = vmax.xlane.f32.xlu1 %v1051_v27 }
 0x2b2   : > { %1061 = vmax.xlane.f32.xlu1 %v1060_v38 }
 0x2b6   : > { %1058 = vmax.xlane.f32.xlu1 %v1057_v43 }
 0x2c7   : > { %1827 = vrot.lane.b32.xlu1 %v7888_v52, %s7438_s25 }
 0x2cb   : > { %1298 = vrot.lane.b32.xlu1 %v7988_v23, %s7437_s27 }
 0x2cf   : > { %1300 = vrot.lane.b32.xlu1 %v7994_v25, %s7437_s27 }
 0x323   : > { %v1044_v51 = vpop.xlane.xlu1 %1043 }
 0x324   : > { %v1064_v56 = vsub.f32 %v6358_v54, %v1044_v51 }
 0x326   : > { %v1073_v59 = vmul.f32 1.442695, %v1064_v56 }
 0x327   : > { %v1041_v1 = vpop.xlane.xlu1 %1040 }
 0x328   : > { %6928 = vpow2.f32 %v1073_v59  ;;  %v1063_v18 = vsub.f32 %v999_v57, %v1041_v1 }
 0x32a   : > { %v1071_v21 = vmul.f32 1.442695, %v1063_v18 }
 0x32b   : > { %v1050_v27 = vpop.xlane.xlu1 %1049 }
 0x32c   : > { %6930 = vpow2.f32 %v1071_v21  ;;  %v1066_v38 = vsub.f32 %v6361_v62, %v1050_v27 }
 0x32e   : > { %v1077_v43 = vmul.f32 1.442695, %v1066_v38 }
 0x32f   : > { %v1047_v0 = vpop.xlane.xlu1 %1046 }
 0x330   : > { %6932 = vpow2.f32 %v1077_v43  ;;  %v1065_v8 = vsub.f32 %v1009_v15, %v1047_v0 }
 0x332   : > { %v1075_v9 = vmul.f32 1.442695, %v1065_v8 }
 0x333   : > { %v1056_v6 = vpop.xlane.xlu1 %1055 }
 0x334   : > { %6934 = vpow2.f32 %v1075_v9  ;;  %v1068_v7 = vsub.f32 %v6364_v19, %v1056_v6 }
 0x335   : > { %v8077_v5 = vpop.eup %6928 }
 0x336   : > { %v1081_v4 = vmul.f32 1.442695, %v1068_v7  ;;  %v1090_v54 = vsel %vm1038_vm1, %v8077_v5, 0.0 }
 0x337   : > { %v1053_v51 = vpop.xlane.xlu1 %1052  ;;  %1091 = vadd.xlane.f32.xlu1 %v1090_v54 }
 0x338   : > { %6936 = vpow2.f32 %v1081_v4  ;;  %v1067_v57 = vsub.f32 %v1019_v22, %v1053_v51 }
 0x339   : > { %v6931_v56 = vpop.eup %6930 }
 0x33a   : > { %v1079_v62 = vmul.f32 1.442695, %v1067_v57  ;;  %v1087_v59 = vsel %vm1038_vm1, %v6931_v56, 0.0 }
 0x33b   : > { %v1062_v1 = vpop.xlane.xlu1 %1061  ;;  %1088 = vadd.xlane.f32.xlu1 %v1087_v59 }
 0x33c   : > { %6938 = vpow2.f32 %v1079_v62  ;;  %v1070_v0 = vsub.f32 %v6367_v28, %v1062_v1 }
 0x33d   : > { %v8082_v8 = vpop.eup %6932 }
 0x33e   : > { %v1085_v6 = vmul.f32 1.442695, %v1070_v0  ;;  %v1096_v7 = vsel %vm1038_vm1, %v8082_v8, 0.0 }
 0x33f   : > { %1097 = vadd.xlane.f32.xlu1 %v1096_v7  ;;  %v1059_v9 = vpop.xlane.xlu1 %1058 }
 0x340   : > { %6940 = vpow2.f32 %v1085_v6  ;;  %v1069_v15 = vsub.f32 %v1029_v41, %v1059_v9 }
 0x341   : > { %v6935_v4 = vpop.eup %6934 }
 0x342   : > { %v1083_v19 = vmul.f32 1.442695, %v1069_v15  ;;  %v1093_v22 = vsel %vm1038_vm1, %v6935_v4, 0.0 }
 0x343   : > { %1094 = vadd.xlane.f32.xlu1 %v1093_v22  ;;  %v1828_v18 = vpop.permute.xlu1 %1827 }
 0x344   : > { %6942 = vpow2.f32 %v1083_v19  ;;  %6458 = vmatprep.subr.msk.mxu0 %vm884_vm0, %v1828_v18 }
 0x345   : > { %v8088_v28 = vpop.eup %6936  ;;  %6459 = vmatpush3.xpose.msk.msra.mxu0 %vm884_vm0, %v1828_v18 }
 0x346   : > { %6460 = vmatprep.subr.msk.mxu0 %vm884_vm0, %v8046_v39  ;;  %v1102_v21 = vsel %vm1038_vm1, %v8088_v28, 0.0 }
 0x347   : > { %1103 = vadd.xlane.f32.xlu1 %v1102_v21 }
 0x349   : > { %v6939_v41 = vpop.eup %6938  ;;  %6461 = vmatpush3.xpose.msk.msra.mxu0 %vm884_vm0, %v8046_v39  ;;  %v8122_v39 = vpop.permute.xlu1 %1298 }
 0x34a   : > { %v1099_v27 = vsel %vm1038_vm1, %v6939_v41, 0.0 }
 0x34b   : > { %1100 = vadd.xlane.f32.xlu1 %v1099_v27 }
 0x34d   : > { %v8098_v38 = vpop.eup %6940  ;;  %v8124_v57 = vpop.permute.xlu1 %1300 }
 0x34e   : > { %v1108_v43 = vsel %vm1038_vm1, %v8098_v38, 0.0 }
 0x34f   : > { %1109 = vadd.xlane.f32.xlu1 %v1108_v43 }
 0x351   : > { %v8102_v54 = vpop.eup %6942 }
 0x352   : > { %v1105_v51 = vsel %vm1038_vm1, %v8102_v54, 0.0 }
 0x353   : > { %1106 = vadd.xlane.f32.xlu1 %v1105_v51 }
 0x364   : > { %1823 = vrot.lane.b32.xlu1 %v7931_v11, %s7438_s25 }
 0x368   : > { %1306 = vrot.lane.b32.xlu1 %v8009_v14, %s7437_s27 }
 0x36c   : > { %1308 = vrot.lane.b32.xlu1 %v8012_v16, %s7437_s27 }
 0x370   : > { %1819 = vrot.lane.b32.xlu1 %v7914_v61, %s7438_s25 }
 0x374   : > { %1797 = vrot.lane.b32.xlu1 %v7988_v23, %s7438_s25 }
 0x378   : > { %1801 = vrot.lane.b32.xlu1 %v7960_v17, %s7438_s25 }
 0x37c   : > { %1805 = vrot.lane.b32.xlu1 %v8009_v14, %s7438_s25 }
 0x380   : > { %1809 = vrot.lane.b32.xlu1 %v7991_v24, %s7438_s25 }
 0x3c0   : > { %v1092_v62 = vpop.xlane.xlu1 %1091 }
 0x3c1   : > { %6944 = vrcp.f32 %v1092_v62 }
 0x3c4   : > { %v1089_v59 = vpop.xlane.xlu1 %1088 }
 0x3c5   : > { %6946 = vrcp.f32 %v1089_v59 }
 0x3c8   : > { %v1098_v1 = vpop.xlane.xlu1 %1097 }
 0x3c9   : > { %6948 = vrcp.f32 %v1098_v1  ;;  %v1800_v1 = vpop.permute.xlu0 %1799 }
 0x3cc   : > { %v1095_v0 = vpop.xlane.xlu1 %1094 }
 0x3cd   : > { %6950 = vrcp.f32 %v1095_v0 }
 0x3ce   : > { %v6945_v7 = vpop.eup %6944 }
 0x3cf   : > { %v1120_v19 = vmul.f32 %v6945_v7, %v8077_v5 }
 0x3d0   : > { %v1104_v6 = vpop.xlane.xlu1 %1103 }
 0x3d1   : > { %6952 = vrcp.f32 %v1104_v6 }
 0x3d2   : > { %v6947_v9 = vpop.eup %6946 }
 0x3d3   : > { %v1119_v15 = vmul.f32 %v6947_v9, %v6931_v56 }
 0x3d4   : > { %v1101_v22 = vpop.xlane.xlu1 %1100 }
 0x3d5   : > { %6954 = vrcp.f32 %v1101_v22  ;;  %6384 = vmatprep.mubr.msk.f32.mxu1 %vm1038_vm1, %v1119_v15 }
 0x3d6   : > { %6385 = vmatmul.mubr.msk.f32.vlgmr.msra.gmra.mxu1 %vm1038_vm1, %v1120_v19  ;;  %v6949_v21 = vpop.eup %6948 }
 0x3d7   : > { %6397 = vmatpush3.xpose.msk.msra.mxu1 %vm884_vm0, %v8030_v30  ;;  %v1122_v43 = vmul.f32 %v6949_v21, %v8082_v8 }
 0x3d8   : > { %6398 = vmatprep.subr.msk.mxu1 %vm884_vm0, %v8026_v26  ;;  %v1110_v18 = vpop.xlane.xlu1 %1109 }
 0x3d9   : > { %6956 = vrcp.f32 %v1110_v18 }
 0x3da   : > { %v6951_v27 = vpop.eup %6950 }
 0x3db   : > { %6399 = vmatpush3.xpose.msk.msra.mxu1 %vm884_vm0, %v8026_v26  ;;  %v1121_v5 = vmul.f32 %v6951_v27, %v6935_v4 }
 0x3dc   : > { %6400 = vmatprep.subr.msk.mxu1 %vm884_vm0, %v8028_v29  ;;  %v1107_v56 = vpop.xlane.xlu1 %1106 }
 0x3dd   : > { %6958 = vrcp.f32 %v1107_v56  ;;  %6387 = vmatprep.mubr.msk.f32.mxu1 %vm1038_vm1, %v1121_v5 }
 0x3de   : > { %6388 = vmatmul.mubr.msk.f32.gmra.mxu1 %vm1038_vm1, %v1122_v43  ;;  %v6953_v30 = vpop.eup %6952 }
 0x3df   : > { %6401 = vmatpush3.xpose.msk.msra.mxu1 %vm884_vm0, %v8028_v29  ;;  %v1124_v51 = vmul.f32 %v6953_v30, %v8088_v28 }
 0x3e0   : > { %6402 = vmatprep.subr.msk.mxu1 %vm884_vm0, %v8034_v31  ;;  %v1824_v26 = vpop.permute.xlu1 %1823 }
 0x3e1   : > { %6462 = vmatprep.subr.msk.mxu0 %vm884_vm0, %v1824_v26 }
 0x3e2   : > { %v6955_v4 = vpop.eup %6954  ;;  %6463 = vmatpush3.xpose.msk.msra.mxu0 %vm884_vm0, %v1824_v26 }
 0x3e3   : > { %6403 = vmatpush3.xpose.msk.msra.mxu1 %vm884_vm0, %v8034_v31  ;;  %6464 = vmatprep.subr.msk.mxu0 %vm884_vm0, %v8055_v48  ;;  %v1123_v8 = vmul.f32 %v6955_v4, %v6939_v41 }
 0x3e4   : > { %6404 = vmatprep.subr.msk.mxu1 %vm884_vm0, %v8038_v33  ;;  %v1307_v29 = vpop.permute.xlu1 %1306 }
 0x3e5   : > { %6390 = vmatprep.mubr.msk.f32.mxu1 %vm1038_vm1, %v1123_v8 }
 0x3e6   : > { %6391 = vmatmul.mubr.msk.f32.gmra.mxu1 %vm1038_vm1, %v1124_v51  ;;  %6465 = vmatpush3.xpose.msk.msra.mxu0 %vm884_vm0, %v8055_v48  ;;  %v6957_v41 = vpop.eup %6956 }
 0x3e7   : > { %6405 = vmatpush3.xpose.msk.msra.mxu1 %vm884_vm0, %v8038_v33  ;;  %v1126_v48 = vmul.f32 %v6957_v41, %v8098_v38 }
 0x3e8   : > { %6406 = vmatprep.subr.msk.mxu1 %vm884_vm0, %v8042_v36  ;;  %v1309_v31 = vpop.permute.xlu1 %1308 }
 0x3ea   : > { %v6959_v62 = vpop.eup %6958 }
 0x3eb   : > { %6407 = vmatpush3.xpose.msk.msra.mxu1 %vm884_vm0, %v8042_v36  ;;  %v1125_v28 = vmul.f32 %v6959_v62, %v8102_v54  ;;  %v1804_v36 = vpop.permute.xlu0 %1803 }
 0x3ec   : > { %6408 = vmatprep.subr.msk.mxu1 %vm884_vm0, %v8036_v32  ;;  %v1820_v59 = vpop.permute.xlu1 %1819 }
 0x3ed   : > { %6393 = vmatprep.mubr.msk.f32.mxu1 %vm1038_vm1, %v1125_v28  ;;  %6466 = vmatprep.subr.msk.mxu0 %vm884_vm0, %v1820_v59 }
 0x3ee   : > { %6394 = vmatmul.mubr.msk.f32.gmra.mxu1 %vm1038_vm1, %v1126_v48  ;;  %6467 = vmatpush3.xpose.msk.msra.mxu0 %vm884_vm0, %v1820_v59 }
 0x3ef   : > { %6409 = vmatpush3.xpose.msk.msra.mxu1 %vm884_vm0, %v8036_v32  ;;  %6412 = vmatprep.mubr.msk.f32.mxu1 %vm884_vm0, %v8044_v37  ;;  %v1808_v37 = vpop.permute.xlu0 %1807 }
 0x3f0   : > { %6410 = vmatprep.subr.msk.mxu1 %vm884_vm0, %v8040_v35  ;;  %v1798_v33 = vpop.permute.xlu1 %1797 }
 0x3f1   : > { %6469 = vmatmul.mubr.msk.f32.vlgmr.msra.gmra.mxu0 %vm884_vm0, %v1798_v33 }
 0x3f2   : > { %6471 = vmatprep.mubr.msk.f32.mxu0 %vm884_vm0, %v1800_v1 }
 0x3f3   : > { %6411 = vmatpush3.xpose.msk.msra.mxu1 %vm884_vm0, %v8040_v35 }
 0x3f4   : > { %v1802_v38 = vpop.permute.xlu1 %1801 }
 0x3f5   : > { %6472 = vmatmul.mubr.msk.f32.gmra.mxu0 %vm884_vm0, %v1802_v38 }
 0x3f6   : > { %6413 = vmatmul.mubr.msk.f32.vlgmr.msra.gmra.mxu1 %vm884_vm0, %v8122_v39  ;;  %6474 = vmatprep.mubr.msk.f32.mxu0 %vm884_vm0, %v1804_v36 }
 0x3f7   : > { %6415 = vmatprep.mubr.msk.f32.mxu1 %vm884_vm0, %v8124_v57 }
 0x3f8   : > { %v1806_v32 = vpop.permute.xlu1 %1805 }
 0x3f9   : > { %6475 = vmatmul.mubr.msk.f32.gmra.mxu0 %vm884_vm0, %v1806_v32 }
 0x3fa   : > { %6416 = vmatmul.mubr.msk.f32.gmra.mxu1 %vm884_vm0, %v8048_v42  ;;  %6477 = vmatprep.mubr.msk.f32.mxu0 %vm884_vm0, %v1808_v37 }
 0x3fb   : > { %6418 = vmatprep.mubr.msk.f32.mxu1 %vm884_vm0, %v8050_v47 }
 0x3fc   : > { %v1810_v35 = vpop.permute.xlu1 %1809 }
 0x3fd   : > { %6478 = vmatmul.mubr.msk.f32.gmra.mxu0 %vm884_vm0, %v1810_v35 }
 0x3fe   : > { %6419 = vmatmul.mubr.msk.f32.gmra.mxu1 %vm884_vm0, %v1307_v29 }
 0x3ff   : > { %6421 = vmatprep.mubr.msk.f32.mxu1 %vm884_vm0, %v1309_v31 }
 0x402   : > { %6422 = vmatmul.mubr.msk.f32.gmra.mxu1 %vm884_vm0, %v8059_v49 }
 0x496   : > { %v6386_v54 = vpop.f32.mrf.mxu1 }
 0x497   : > { %1257 = vst.msk [vmem:[#allocation3 + $0x8] sm:$0xff] %vm884_vm0, %v6386_v54 }
 0x498   : > { %v1217_v39 = vpop.f32.mrf.mxu1 }
 0x499   : > { %1256 = vst.msk [vmem:[#allocation3] sm:$0xff] %vm884_vm0, %v1217_v39 }
 0x49e   : > { %v6389_v42 = vpop.f32.mrf.mxu1 }
 0x49f   : > { %1259 = vst.msk [vmem:[#allocation3 + $0x18] sm:$0xff] %vm884_vm0, %v6389_v42 }
 0x4a0   : > { %v1227_v47 = vpop.f32.mrf.mxu1 }
 0x4a1   : > { %1258 = vst.msk [vmem:[#allocation3 + $0x10] sm:$0xff] %vm884_vm0, %v1227_v47 }
 0x4a6   : > { %v6392_v57 = vpop.f32.mrf.mxu1 }
 0x4a7   : > { %1261 = vst.msk [vmem:[#allocation3 + $0x28] sm:$0xff] %vm884_vm0, %v6392_v57 }
 0x4a8   : > { %v1237_v0 = vpop.f32.mrf.mxu1 }
 0x4a9   : > { %1260 = vst.msk [vmem:[#allocation3 + $0x20] sm:$0xff] %vm884_vm0, %v1237_v0 }
 0x4ae   : > { %v6395_v6 = vpop.f32.mrf.mxu1 }
 0x4af   : > { %1263 = vst.msk [vmem:[#allocation3 + $0x38] sm:$0xff] %vm884_vm0, %v6395_v6 }
 0x4b0   : > { %v1247_v49 = vpop.f32.mrf.mxu1 }
 0x4b1   : > { %1262 = vst.msk [vmem:[#allocation3 + $0x30] sm:$0xff] %vm884_vm0, %v1247_v49  ;;  %v6470_v7 = vpop.f32.mrf.mxu0 }
 0x4b2   : > { %v1975_v9 = vsel %vm1038_vm1, %v6470_v7, -inf }
 0x4b3   : > { %1976 = vmax.xlane.f32.xlu0 %v1975_v9  ;;  %v1933_v15 = vpop.f32.mrf.mxu0 }
 0x4b4   : > { %v1972_v19 = vsel %vm1038_vm1, %v1933_v15, -inf }
 0x4b5   : > { %1973 = vmax.xlane.f32.xlu1 %v1972_v19  ;;  %v6473_v22 = vpop.f32.mrf.mxu0 }
 0x4b6   : > { %v1981_v18 = vsel %vm1038_vm1, %v6473_v22, -inf  ;;  %v8250_v33 = vpop.f32.mrf.mxu1 }
 0x4b7   : > { %1982 = vmax.xlane.f32.xlu0 %v1981_v18  ;;  %v1943_v21 = vpop.f32.mrf.mxu0 }
 0x4b8   : > { %v1978_v27 = vsel %vm1038_vm1, %v1943_v21, -inf  ;;  %v8254_v54 = vpop.f32.mrf.mxu1 }
 0x4b9   : > { %1979 = vmax.xlane.f32.xlu1 %v1978_v27  ;;  %v8210_v5 = vpop.f32.mrf.mxu0 }
 0x4ba   : > { %v1987_v56 = vsel %vm1038_vm1, %v8210_v5, -inf  ;;  %v8260_v47 = vpop.f32.mrf.mxu1 }
 0x4bb   : > { %1988 = vmax.xlane.f32.xlu0 %v1987_v56  ;;  %v8214_v43 = vpop.f32.mrf.mxu0 }
 0x4bc   : > { %v1984_v26 = vsel %vm1038_vm1, %v8214_v43, -inf  ;;  %v8266_v49 = vpop.f32.mrf.mxu1 }
 0x4bd   : > { %1985 = vmax.xlane.f32.xlu1 %v1984_v26  ;;  %v8218_v30 = vpop.f32.mrf.mxu0 }
 0x4be   : > { %v1993_v4 = vsel %vm1038_vm1, %v8218_v30, -inf }
 0x4bf   : > { %1994 = vmax.xlane.f32.xlu0 %v1993_v4  ;;  %v8222_v8 = vpop.f32.mrf.mxu0 }
 0x4c0   : > { %v1990_v29 = vsel %vm1038_vm1, %v8222_v8, -inf }
 0x4c1   : > { %1991 = vmax.xlane.f32.xlu1 %v1990_v29 }
 0x4d2   : > { %1581 = vrot.lane.b32.xlu1 %v7875_v46, %s7437_s27 }
 0x4d5   : > { %1583 = vrot.lane.b32.xlu0 %v7867_v40, %s7437_s27 }
 0x4d6   : > { %1575 = vrot.lane.b32.xlu1 %v7903_v58, %s7437_s27 }
 0x4d9   : > { %1579 = vrot.lane.b32.xlu0 %v7882_v50, %s7437_s27 }
 0x4da   : > { %1573 = vrot.lane.b32.xlu1 %v7916_v63, %s7437_s27 }
 0x4dd   : > { %1577 = vrot.lane.b32.xlu0 %v7895_v55, %s7437_s27 }
 0x4de   : > { %1569 = vrot.lane.b32.xlu1 %v7937_v13, %s7437_s27 }
 0x4e1   : > { %1571 = vrot.lane.b32.xlu0 %v7925_v10, %s7437_s27 }
 0x4e2   : > { %2080 = vrot.lane.b32.xlu1 %v7875_v46, %s7438_s25 }
 0x4e5   : > { %2082 = vrot.lane.b32.xlu0 %v7867_v40, %s7438_s25 }
 0x4e6   : > { %2076 = vrot.lane.b32.xlu1 %v7895_v55, %s7438_s25 }
 0x4e9   : > { %2078 = vrot.lane.b32.xlu0 %v7882_v50, %s7438_s25 }
 0x53c   : > { %v1977_v51 = vpop.xlane.xlu0 %1976 }
 0x53d   : > { %v1997_v31 = vsub.f32 %v6470_v7, %v1977_v51 }
 0x53e   : > { %v1974_v41 = vpop.xlane.xlu1 %1973 }
 0x53f   : > { %v2006_v62 = vmul.f32 1.442695, %v1997_v31  ;;  %v1996_v28 = vsub.f32 %v1933_v15, %v1974_v41 }
 0x540   : > { %v1983_v59 = vpop.xlane.xlu0 %1982 }
 0x541   : > { %6960 = vpow2.f32 %v2006_v62  ;;  %v2004_v48 = vmul.f32 1.442695, %v1996_v28  ;;  %v1999_v1 = vsub.f32 %v6473_v22, %v1983_v59  ;;  %v1476_v62 = vsel %vm1038_vm1, %v8250_v33, -inf }
 0x542   : > { %v1980_v36 = vpop.xlane.xlu1 %1979  ;;  %v1473_v59 = vsel %vm1038_vm1, %v8254_v54, -inf }
 0x543   : > { %6962 = vpow2.f32 %v2004_v48  ;;  %v2010_v38 = vmul.f32 1.442695, %v1999_v1  ;;  %v1998_v32 = vsub.f32 %v1943_v21, %v1980_v36  ;;  %v8276_v21 = vpop.f32.mrf.mxu1 }
 0x544   : > { %v8252_v37 = vpop.xlane.xlu0 %1988 }
 0x545   : > { %6964 = vpow2.f32 %v2010_v38  ;;  %v2008_v35 = vmul.f32 1.442695, %v1998_v32  ;;  %v8284_v51 = vpop.f32.mrf.mxu1  ;;  %v1482_v38 = vsel %vm1038_vm1, %v8260_v47, -inf }
 0x546   : > { %v8256_v39 = vpop.xlane.xlu1 %1985  ;;  %v1485_v1 = vsel %vm1038_vm1, %v8284_v51, -inf }
 0x547   : > { %6966 = vpow2.f32 %v2008_v35  ;;  %v8288_v28 = vpop.f32.mrf.mxu1 }
 0x548   : > { %v8258_v42 = vpop.xlane.xlu0 %1994 }
 0x549   : > { %v8294_v36 = vpop.f32.mrf.mxu1 }
 0x54a   : > { %v8262_v57 = vpop.xlane.xlu1 %1991  ;;  %v1491_v35 = vsel %vm1038_vm1, %v8294_v36, -inf }
 0x54c   : > { %v1584_v0 = vpop.permute.xlu0 %1583 }
 0x54d   : > { %6424 = vmatprep.subr.mxu1 %v1584_v0 }
 0x54e   : > { %v8264_v6 = vpop.eup %6960  ;;  %6425 = vmatpush3.msra.mxu1 %v1584_v0  ;;  %v1582_v7 = vpop.permute.xlu1 %1581  ;;  %v1479_v0 = vsel %vm1038_vm1, %v8266_v49, -inf }
 0x54f   : > { %6426 = vmatprep.subr.mxu1 %v1582_v7  ;;  %v2023_v9 = vsel %vm1038_vm1, %v8264_v6, 0.0 }
 0x550   : > { %v8270_v15 = vpop.eup %6962  ;;  %2024 = vadd.xlane.f32.xlu0 %v2023_v9  ;;  %v1580_v19 = vpop.permute.xlu0 %1579  ;;  %6427 = vmatpush3.msra.mxu1 %v1582_v7  ;;  %v1488_v7 = vsel %vm1038_vm1, %v8276_v21, -inf  ;;  %v1494_v9 = vsel %vm1038_vm1, %v8288_v28, -inf }
 0x551   : > { %6428 = vmatprep.subr.mxu1 %v1580_v19  ;;  %v2020_v22 = vsel %vm1038_vm1, %v8270_v15, 0.0 }
 0x552   : > { %v8274_v18 = vpop.eup %6964  ;;  %2021 = vadd.xlane.f32.xlu1 %v2020_v22  ;;  %6429 = vmatpush3.msra.mxu1 %v1580_v19  ;;  %v1576_v27 = vpop.permute.xlu1 %1575  ;;  %v2001_v19 = vsub.f32 %v8210_v5, %v8252_v37 }
 0x553   : > { %v2029_v4 = vsel %vm1038_vm1, %v8274_v18, 0.0 }
 0x554   : > { %v8278_v56 = vpop.eup %6966  ;;  %v1578_v26 = vpop.permute.xlu0 %1577  ;;  %v2014_v22 = vmul.f32 1.442695, %v2001_v19 }
 0x555   : > { %6430 = vmatprep.subr.mxu1 %v1578_v26  ;;  %v2026_v29 = vsel %vm1038_vm1, %v8278_v56, 0.0 }
 0x556   : > { %2030 = vadd.xlane.f32.xlu1 %v2029_v4  ;;  %2027 = vadd.xlane.f32.xlu0 %v2026_v29  ;;  %v1574_v31 = vpop.permute.xlu1 %1573  ;;  %6968 = vpow2.f32 %v2014_v22 }
 0x557   : > { %6431 = vmatpush3.msra.mxu1 %v1578_v26 }
 0x558   : > { %6432 = vmatprep.subr.mxu1 %v1576_v27  ;;  %v1572_v41 = vpop.permute.xlu0 %1571 }
 0x559   : > { %6433 = vmatpush3.msra.mxu1 %v1576_v27  ;;  %v2000_v27 = vsub.f32 %v8214_v43, %v8256_v39 }
 0x55a   : > { %6434 = vmatprep.subr.mxu1 %v1574_v31  ;;  %1477 = vmax.xlane.f32.xlu1 %v1476_v62  ;;  %v1570_v48 = vpop.permute.xlu1 %1569 }
 0x55b   : > { %1474 = vmax.xlane.f32.xlu0 %v1473_v59  ;;  %6435 = vmatpush3.msra.mxu1 %v1574_v31  ;;  %v2012_v26 = vmul.f32 1.442695, %v2000_v27  ;;  %v2003_v27 = vsub.f32 %v8218_v30, %v8258_v42 }
 0x55c   : > { %6436 = vmatprep.subr.mxu1 %v1572_v41  ;;  %v8298_v32 = vpop.permute.xlu0 %2082 }
 0x55d   : > { %6437 = vmatpush3.msra.mxu1 %v1572_v41  ;;  %6970 = vpow2.f32 %v2012_v26 }
 0x55e   : > { %6438 = vmatprep.subr.mxu1 %v1570_v48  ;;  %1486 = vmax.xlane.f32.xlu1 %v1485_v1  ;;  %v8329_v43 = vpop.permute.xlu1 %2080 }
 0x55f   : > { %1483 = vmax.xlane.f32.xlu0 %v1482_v38  ;;  %6439 = vmatpush3.msra.mxu1 %v1570_v48 }
 0x560   : > { %6480 = vmatprep.subr.mxu1 %v8298_v32  ;;  %v8331_v37 = vpop.permute.xlu0 %2078 }
 0x562   : > { %1492 = vmax.xlane.f32.xlu1 %v1491_v35  ;;  %v8333_v39 = vpop.permute.xlu1 %2076 }
 0x563   : > { %1480 = vmax.xlane.f32.xlu0 %v1479_v0  ;;  %v8317_v4 = vpop.eup %6968 }
 0x564   : > { %v2035_v29 = vsel %vm1038_vm1, %v8317_v4, 0.0 }
 0x567   : > { %1489 = vmax.xlane.f32.xlu0 %v1488_v7 }
 0x56a   : > { %v8321_v31 = vpop.eup %6970 }
 0x56b   : > { %1495 = vmax.xlane.f32.xlu0 %v1494_v9  ;;  %v2032_v5 = vsel %vm1038_vm1, %v8321_v31, 0.0 }
 0x573   : > { %2072 = vrot.lane.b32.xlu1 %v7916_v63, %s7438_s25 }
 0x581   : > { %2074 = vrot.lane.b32.xlu0 %v7903_v58, %s7438_s25 }
 0x597   : > { %2036 = vadd.xlane.f32.xlu1 %v2035_v29 }
 0x5a0   : > { %2033 = vadd.xlane.f32.xlu0 %v2032_v5 }
 0x5a8   : > { %2068 = vrot.lane.b32.xlu1 %v7937_v13, %s7438_s25 }
 0x5b6   : > { %2070 = vrot.lane.b32.xlu0 %v7925_v10, %s7438_s25 }
 0x5d9   : > { %v8335_v41 = vpop.xlane.xlu0 %2024 }
 0x5db   : > { %v8337_v62 = vpop.xlane.xlu1 %2021 }
 0x5df   : > { %v8339_v59 = vpop.xlane.xlu0 %2027  ;;  %v8341_v48 = vpop.xlane.xlu1 %2030 }
 0x5e3   : > { %v1478_v1 = vpop.xlane.xlu1 %1477 }
 0x5e4   : > { %v1475_v38 = vpop.xlane.xlu0 %1474  ;;  %v1498_v35 = vsub.f32 %v8250_v33, %v1478_v1  ;;  %v2002_v33 = vsub.f32 %v8222_v8, %v8262_v57 }
 0x5e5   : > { %v1497_v0 = vsub.f32 %v8254_v54, %v1475_v38  ;;  %v2018_v54 = vmul.f32 1.442695, %v2003_v27 }
 0x5e6   : > { %v1507_v7 = vmul.f32 1.442695, %v1498_v35 }
 0x5e7   : > { %v1505_v9 = vmul.f32 1.442695, %v1497_v0  ;;  %v1487_v29 = vpop.xlane.xlu1 %1486  ;;  %v2016_v0 = vmul.f32 1.442695, %v2002_v33 }
 0x5e8   : > { %6972 = vpow2.f32 %v1507_v7  ;;  %v1484_v19 = vpop.xlane.xlu0 %1483  ;;  %v1501_v1 = vsub.f32 %v8284_v51, %v1487_v29 }
 0x5e9   : > { %6974 = vpow2.f32 %v1505_v9  ;;  %v1500_v22 = vsub.f32 %v8260_v47, %v1484_v19 }
 0x5ea   : > { %v1513_v30 = vmul.f32 1.442695, %v1501_v1 }
 0x5eb   : > { %v1511_v26 = vmul.f32 1.442695, %v1500_v22  ;;  %v1493_v7 = vpop.xlane.xlu1 %1492 }
 0x5ec   : > { %v1481_v5 = vpop.xlane.xlu0 %1480  ;;  %v1503_v57 = vsub.f32 %v8294_v36, %v1493_v7 }
 0x5ed   : > { %6976 = vpow2.f32 %v1511_v26  ;;  %v1499_v2 = vsub.f32 %v8266_v49, %v1481_v5 }
 0x5ee   : > { %v1517_v27 = vmul.f32 1.442695, %v1503_v57 }
 0x5ef   : > { %v1509_v38 = vmul.f32 1.442695, %v1499_v2 }
 0x5f0   : > { %v1490_v35 = vpop.xlane.xlu0 %1489 }
 0x5f1   : > { %6978 = vpow2.f32 %v1509_v38  ;;  %v1502_v47 = vsub.f32 %v8276_v21, %v1490_v35 }
 0x5f2   : > { %6980 = vpow2.f32 %v2018_v54 }
 0x5f3   : > { %v1515_v42 = vmul.f32 1.442695, %v1502_v47 }
 0x5f4   : > { %v1496_v9 = vpop.xlane.xlu0 %1495 }
 0x5f5   : > { %v8353_v19 = vpop.eup %6972  ;;  %6982 = vpow2.f32 %v1515_v42  ;;  %v1504_v49 = vsub.f32 %v8288_v28, %v1496_v9 }
 0x5f6   : > { %v8356_v8 = vpop.eup %6974  ;;  %6984 = vpow2.f32 %v2016_v0  ;;  %v1524_v2 = vsel %vm1038_vm1, %v8353_v19, 0.0 }
 0x5f7   : > { %6986 = vpow2.f32 %v1513_v30  ;;  %v1519_v21 = vmul.f32 1.442695, %v1504_v49  ;;  %v1521_v51 = vsel %vm1038_vm1, %v8356_v8, 0.0  ;;  %1525 = vadd.xlane.f32.xlu0 %v1524_v2  ;;  %v2073_v49 = vpop.permute.xlu1 %2072 }
 0x5f8   : > { %1522 = vadd.xlane.f32.xlu1 %v1521_v51  ;;  %v2075_v9 = vpop.permute.xlu0 %2074 }
 0x5f9   : > { %6988 = vpow2.f32 %v1519_v21 }
 0x5fa   : > { %v8363_v22 = vpop.eup %6976  ;;  %6990 = vpow2.f32 %v1517_v27 }
 0x5fb   : > { %v1530_v28 = vsel %vm1038_vm1, %v8363_v22, 0.0 }
 0x5fc   : > { %1531 = vadd.xlane.f32.xlu0 %v1530_v28 }
 0x5fe   : > { %v8367_v26 = vpop.eup %6978 }
 0x5ff   : > { %v1527_v36 = vsel %vm1038_vm1, %v8367_v26, 0.0  ;;  %v8371_v29 = vpop.eup %6980 }
 0x600   : > { %1528 = vadd.xlane.f32.xlu1 %v1527_v36  ;;  %v2041_v54 = vsel %vm1038_vm1, %v8371_v29, 0.0 }
 0x602   : > { %v8373_v5 = vpop.eup %6982 }
 0x603   : > { %v8375_v33 = vpop.eup %6984  ;;  %v1536_v1 = vsel %vm1038_vm1, %v8373_v5, 0.0 }
 0x604   : > { %v8381_v38 = vpop.eup %6986  ;;  %2042 = vadd.xlane.f32.xlu1 %v2041_v54  ;;  %1537 = vadd.xlane.f32.xlu0 %v1536_v1  ;;  %v2038_v35 = vsel %vm1038_vm1, %v8375_v33, 0.0 }
 0x605   : > { %v1533_v47 = vsel %vm1038_vm1, %v8381_v38, 0.0 }
 0x606   : > { %v8387_v0 = vpop.eup %6988 }
 0x607   : > { %v1542_v30 = vsel %vm1038_vm1, %v8387_v0, 0.0  ;;  %v8391_v42 = vpop.eup %6990 }
 0x608   : > { %2039 = vadd.xlane.f32.xlu0 %v2038_v35  ;;  %1534 = vadd.xlane.f32.xlu1 %v1533_v47  ;;  %v1539_v7 = vsel %vm1038_vm1, %v8391_v42, 0.0 }
 0x60c   : > { %1543 = vadd.xlane.f32.xlu1 %v1542_v30 }
 0x610   : > { %1540 = vadd.xlane.f32.xlu1 %v1539_v7 }
 0x61e   : > { %2332 = vrot.lane.b32.xlu0 %v7873_v45, %s7439_s14 }
 0x620   : > { %v8447_v57 = vpop.xlane.xlu1 %2036 }
 0x621   : > { %2330 = vrot.lane.b32.xlu1 %v7863_v34, %s7439_s14 }
 0x622   : > { %2328 = vrot.lane.b32.xlu0 %v7871_v44, %s7439_s14 }
 0x624   : > { %v2069_v51 = vpop.permute.xlu1 %2068 }
 0x625   : > { %2326 = vrot.lane.b32.xlu1 %v7888_v52, %s7439_s14 }
 0x626   : > { %2324 = vrot.lane.b32.xlu0 %v7908_v60, %s7439_s14 }
 0x629   : > { %2322 = vrot.lane.b32.xlu1 %v7931_v11, %s7439_s14  ;;  %v2034_v2 = vpop.xlane.xlu0 %2033 }
 0x62a   : > { %2320 = vrot.lane.b32.xlu0 %v7893_v53, %s7439_s14 }
 0x62d   : > { %2318 = vrot.lane.b32.xlu1 %v7914_v61, %s7439_s14  ;;  %v2071_v21 = vpop.permute.xlu0 %2070 }
 0x62e   : > { %2294 = vrot.lane.b32.xlu0 %v7839_v12, %s7439_s14 }
 0x631   : > { %2296 = vrot.lane.b32.xlu1 %v7988_v23, %s7439_s14 }
 0x632   : > { %2298 = vrot.lane.b32.xlu0 %v7994_v25, %s7439_s14 }
 0x635   : > { %2300 = vrot.lane.b32.xlu1 %v7960_v17, %s7439_s14 }
 0x636   : > { %2302 = vrot.lane.b32.xlu0 %v7971_v20, %s7439_s14 }
 0x639   : > { %2304 = vrot.lane.b32.xlu1 %v8009_v14, %s7439_s14 }
 0x63a   : > { %2306 = vrot.lane.b32.xlu0 %v8012_v16, %s7439_s14 }
 0x63d   : > { %2308 = vrot.lane.b32.xlu1 %v7991_v24, %s7439_s14 }
 0x63e   : > { %2579 = vrot.lane.b32.xlu0 %v7875_v46, %s7439_s14 }
 0x641   : > { %2581 = vrot.lane.b32.xlu1 %v7867_v40, %s7439_s14 }
 0x642   : > { %2573 = vrot.lane.b32.xlu0 %v7903_v58, %s7439_s14 }
 0x645   : > { %2577 = vrot.lane.b32.xlu1 %v7882_v50, %s7439_s14 }
 0x646   : > { %2569 = vrot.lane.b32.xlu0 %v7925_v10, %s7439_s14 }
 0x649   : > { %2575 = vrot.lane.b32.xlu1 %v7895_v55, %s7439_s14 }
 0x64a   : > { %2831 = vrot.lane.b32.xlu0 %v7873_v45, %s7440_s19 }
 0x64d   : > { %2571 = vrot.lane.b32.xlu1 %v7916_v63, %s7439_s14 }
 0x651   : > { %2567 = vrot.lane.b32.xlu1 %v7937_v13, %s7439_s14 }
 0x655   : > { %2829 = vrot.lane.b32.xlu1 %v7863_v34, %s7440_s19 }
 0x680   : > { %v1526_v27 = vpop.xlane.xlu0 %1525 }
 0x681   : > { %6992 = vrcp.f32 %v1526_v27  ;;  %v1523_v28 = vpop.xlane.xlu1 %1522 }
 0x682   : > { %6994 = vrcp.f32 %v1523_v28 }
 0x685   : > { %v1532_v36 = vpop.xlane.xlu0 %1531 }
 0x686   : > { %6996 = vrcp.f32 %v1532_v36 }
 0x689   : > { %v1529_v54 = vpop.xlane.xlu1 %1528 }
 0x68a   : > { %6998 = vrcp.f32 %v1529_v54 }
 0x68d   : > { %v1538_v1 = vpop.xlane.xlu0 %1537  ;;  %v2043_v35 = vpop.xlane.xlu1 %2042 }
 0x68e   : > { %v6993_v47 = vpop.eup %6992  ;;  %7000 = vrcp.f32 %v1538_v1 }
 0x68f   : > { %v6995_v30 = vpop.eup %6994  ;;  %v1554_v7 = vmul.f32 %v6993_v47, %v8353_v19 }
 0x690   : > { %v1553_v3 = vmul.f32 %v6995_v30, %v8356_v8 }
 0x691   : > { %v2040_v34 = vpop.xlane.xlu0 %2039  ;;  %v1535_v13 = vpop.xlane.xlu1 %1534 }
 0x692   : > { %6440 = vmatprep.mubr.msk.f32.mxu1 %vm1038_vm1, %v1553_v3  ;;  %7002 = vrcp.f32 %v1535_v13 }
 0x693   : > { %6441 = vmatmul.mubr.msk.f32.vlgmr.msra.gmra.mxu1 %vm1038_vm1, %v1554_v7  ;;  %v6997_v36 = vpop.eup %6996  ;;  %7004 = vrcp.f32 %v8337_v62 }
 0x694   : > { %6481 = vmatpush3.msra.mxu1 %v8298_v32  ;;  %v1556_v8 = vmul.f32 %v6997_v36, %v8363_v22 }
 0x695   : > { %6482 = vmatprep.subr.mxu1 %v8329_v43  ;;  %v8455_v27 = vpop.permute.xlu0 %2332  ;;  %v1544_v28 = vpop.xlane.xlu1 %1543 }
 0x696   : > { %6483 = vmatpush3.msra.mxu1 %v8329_v43  ;;  %7006 = vrcp.f32 %v1544_v28 }
 0x697   : > { %v6999_v19 = vpop.eup %6998  ;;  %6484 = vmatprep.subr.mxu1 %v8331_v37 }
 0x698   : > { %6485 = vmatpush3.msra.mxu1 %v8331_v37  ;;  %v1555_v3 = vmul.f32 %v6999_v19, %v8367_v26 }
 0x699   : > { %6486 = vmatprep.subr.mxu1 %v8333_v39  ;;  %v8463_v13 = vpop.permute.xlu0 %2328  ;;  %v1541_v32 = vpop.xlane.xlu1 %1540 }
 0x69a   : > { %6487 = vmatpush3.msra.mxu1 %v8333_v39  ;;  %7008 = vrcp.f32 %v1541_v32  ;;  %6443 = vmatprep.mubr.msk.f32.mxu1 %vm1038_vm1, %v1555_v3 }
 0x69b   : > { %6488 = vmatprep.subr.mxu1 %v2075_v9  ;;  %6444 = vmatmul.mubr.msk.f32.gmra.mxu1 %vm1038_vm1, %v1556_v8  ;;  %7010 = vrcp.f32 %v8335_v41  ;;  %v7001_v62 = vpop.eup %7000 }
 0x69c   : > { %6489 = vmatpush3.msra.mxu1 %v2075_v9  ;;  %7012 = vrcp.f32 %v8339_v59  ;;  %v1558_v41 = vmul.f32 %v7001_v62, %v8373_v5 }
 0x69d   : > { %6490 = vmatprep.subr.mxu1 %v2073_v49  ;;  %v8470_v43 = vpop.permute.xlu0 %2324  ;;  %v2331_v37 = vpop.permute.xlu1 %2330  ;;  %7014 = vrcp.f32 %v8341_v48 }
 0x69e   : > { %6491 = vmatpush3.msra.mxu1 %v2073_v49  ;;  %7016 = vrcp.f32 %v2034_v2 }
 0x69f   : > { %6492 = vmatprep.subr.mxu1 %v2071_v21  ;;  %v7003_v22 = vpop.eup %7002  ;;  %7018 = vrcp.f32 %v8447_v57 }
 0x6a0   : > { %6493 = vmatpush3.msra.mxu1 %v2071_v21  ;;  %v1557_v9 = vmul.f32 %v7003_v22, %v8381_v38  ;;  %v7005_v59 = vpop.eup %7004  ;;  %7020 = vrcp.f32 %v2040_v34 }
 0x6a1   : > { %6494 = vmatprep.subr.mxu1 %v2069_v51  ;;  %v8474_v39 = vpop.permute.xlu0 %2320  ;;  %v2327_v26 = vpop.permute.xlu1 %2326  ;;  %7022 = vrcp.f32 %v2043_v35  ;;  %v2052_v1 = vmul.f32 %v7005_v59, %v8270_v15 }
 0x6a2   : > { %6495 = vmatpush3.msra.mxu1 %v2069_v51  ;;  %6446 = vmatprep.mubr.msk.f32.mxu1 %vm1038_vm1, %v1557_v9 }
 0x6a3   : > { %6508 = vmatprep.subr.msk.mxu1 %vm884_vm0, %v8455_v27  ;;  %6447 = vmatmul.mubr.msk.f32.gmra.mxu1 %vm1038_vm1, %v1558_v41  ;;  %v7007_v21 = vpop.eup %7006 }
 0x6a4   : > { %v1560_v5 = vmul.f32 %v7007_v21, %v8387_v0 }
 0x6a5   : > { %v2295_v48 = vpop.permute.xlu0 %2294  ;;  %v2323_v49 = vpop.permute.xlu1 %2322 }
 0x6a7   : > { %v7009_v54 = vpop.eup %7008 }
 0x6a8   : > { %v1559_v38 = vmul.f32 %v7009_v54, %v8391_v42  ;;  %v7011_v51 = vpop.eup %7010 }
 0x6a9   : > { %v8484_v2 = vpop.permute.xlu1 %2318  ;;  %v7013_v47 = vpop.eup %7012  ;;  %v2053_v34 = vmul.f32 %v7011_v51, %v8264_v6 }
 0x6aa   : > { %6449 = vmatprep.mubr.msk.f32.mxu1 %vm1038_vm1, %v1559_v38  ;;  %v8489_v30 = vpop.permute.xlu0 %2298  ;;  %v7015_v57 = vpop.eup %7014  ;;  %v2054_v35 = vmul.f32 %v7013_v47, %v8278_v56 }
 0x6ab   : > { %6450 = vmatmul.mubr.msk.f32.gmra.mxu1 %vm1038_vm1, %v1560_v5  ;;  %v7017_v0 = vpop.eup %7016  ;;  %v2055_v28 = vmul.f32 %v7015_v57, %v8274_v18 }
 0x6ac   : > { %6496 = vmatprep.mubr.msk.f32.mxu1 %vm1038_vm1, %v2052_v1  ;;  %v7019_v6 = vpop.eup %7018  ;;  %v2056_v36 = vmul.f32 %v7017_v0, %v8321_v31 }
 0x6ad   : > { %v8494_v42 = vpop.permute.xlu1 %2296  ;;  %v7021_v19 = vpop.eup %7020 }
 0x6ae   : > { %v2303_v15 = vpop.permute.xlu0 %2302  ;;  %v7023_v3 = vpop.eup %7022  ;;  %v2058_v32 = vmul.f32 %v7021_v19, %v8375_v33 }
 0x6af   : > { %6497 = vmatmul.mubr.msk.f32.vlgmr.msra.gmra.mxu1 %vm1038_vm1, %v2053_v34  ;;  %v2059_v8 = vmul.f32 %v7023_v3, %v8371_v29 }
 0x6b0   : > { %6509 = vmatpush3.xpose.msk.msra.mxu1 %vm884_vm0, %v8455_v27  ;;  %6499 = vmatprep.mubr.msk.f32.mxu1 %vm1038_vm1, %v2054_v35  ;;  %v2057_v27 = vmul.f32 %v7019_v6, %v8317_v4 }
 0x6b1   : > { %6510 = vmatprep.subr.msk.mxu1 %vm884_vm0, %v2331_v37  ;;  %v2301_v7 = vpop.permute.xlu1 %2300 }
 0x6b2   : > { %v2307_v18 = vpop.permute.xlu0 %2306 }
 0x6b3   : > { %6500 = vmatmul.mubr.msk.f32.gmra.mxu1 %vm1038_vm1, %v2055_v28 }
 0x6b4   : > { %6511 = vmatpush3.xpose.msk.msra.mxu1 %vm884_vm0, %v2331_v37  ;;  %6502 = vmatprep.mubr.msk.f32.mxu1 %vm1038_vm1, %v2056_v36 }
 0x6b5   : > { %6512 = vmatprep.subr.msk.mxu1 %vm884_vm0, %v8463_v13  ;;  %v2305_v56 = vpop.permute.xlu1 %2304 }
 0x6b6   : > { %v2580_v4 = vpop.permute.xlu0 %2579 }
 0x6b7   : > { %6503 = vmatmul.mubr.msk.f32.gmra.mxu1 %vm1038_vm1, %v2057_v27 }
 0x6b8   : > { %6513 = vmatpush3.xpose.msk.msra.mxu1 %vm884_vm0, %v8463_v13  ;;  %6505 = vmatprep.mubr.msk.f32.mxu1 %vm1038_vm1, %v2058_v32 }
 0x6b9   : > { %6514 = vmatprep.subr.msk.mxu1 %vm884_vm0, %v2327_v26  ;;  %v2309_v31 = vpop.permute.xlu1 %2308 }
 0x6ba   : > { %v2574_v13 = vpop.permute.xlu0 %2573 }
 0x6bb   : > { %6506 = vmatmul.mubr.msk.f32.gmra.mxu1 %vm1038_vm1, %v2059_v8 }
 0x6bc   : > { %6515 = vmatpush3.xpose.msk.msra.mxu1 %vm884_vm0, %v2327_v26  ;;  %6524 = vmatprep.mubr.msk.f32.mxu1 %vm884_vm0, %v2295_v48 }
 0x6bd   : > { %6516 = vmatprep.subr.msk.mxu1 %vm884_vm0, %v8470_v43  ;;  %v2582_v33 = vpop.permute.xlu1 %2581 }
 0x6be   : > { %6536 = vmatprep.subr.mxu0 %v2582_v33 }
 0x6bf   : > { %6537 = vmatpush3.msra.mxu0 %v2582_v33 }
 0x6c0   : > { %6517 = vmatpush3.xpose.msk.msra.mxu1 %vm884_vm0, %v8470_v43  ;;  %6538 = vmatprep.subr.mxu0 %v2580_v4  ;;  %v2570_v43 = vpop.permute.xlu0 %2569 }
 0x6c1   : > { %6518 = vmatprep.subr.msk.mxu1 %vm884_vm0, %v2323_v49  ;;  %6539 = vmatpush3.msra.mxu0 %v2580_v4  ;;  %v2578_v29 = vpop.permute.xlu1 %2577 }
 0x6c2   : > { %6540 = vmatprep.subr.mxu0 %v2578_v29 }
 0x6c3   : > { %6541 = vmatpush3.msra.mxu0 %v2578_v29 }
 0x6c4   : > { %6519 = vmatpush3.xpose.msk.msra.mxu1 %vm884_vm0, %v2323_v49  ;;  %v8534_v26 = vpop.permute.xlu0 %2831 }
 0x6c5   : > { %6520 = vmatprep.subr.msk.mxu1 %vm884_vm0, %v8474_v39  ;;  %v2576_v37 = vpop.permute.xlu1 %2575 }
 0x6c6   : > { %6542 = vmatprep.subr.mxu0 %v2576_v37 }
 0x6c7   : > { %6543 = vmatpush3.msra.mxu0 %v2576_v37 }
 0x6c8   : > { %6521 = vmatpush3.xpose.msk.msra.mxu1 %vm884_vm0, %v8474_v39  ;;  %6544 = vmatprep.subr.mxu0 %v2574_v13 }
 0x6c9   : > { %6522 = vmatprep.subr.msk.mxu1 %vm884_vm0, %v8484_v2  ;;  %6545 = vmatpush3.msra.mxu0 %v2574_v13  ;;  %v2572_v62 = vpop.permute.xlu1 %2571 }
 0x6ca   : > { %6546 = vmatprep.subr.mxu0 %v2572_v62 }
 0x6cb   : > { %6547 = vmatpush3.msra.mxu0 %v2572_v62 }
 0x6cc   : > { %6523 = vmatpush3.xpose.msk.msra.mxu1 %vm884_vm0, %v8484_v2  ;;  %6548 = vmatprep.subr.mxu0 %v2570_v43 }
 0x6cd   : > { %6549 = vmatpush3.msra.mxu0 %v2570_v43  ;;  %v2568_v22 = vpop.permute.xlu1 %2567 }
 0x6ce   : > { %6550 = vmatprep.subr.mxu0 %v2568_v22 }
 0x6cf   : > { %6525 = vmatmul.mubr.msk.f32.vlgmr.msra.gmra.mxu1 %vm884_vm0, %v8494_v42  ;;  %6551 = vmatpush3.msra.mxu0 %v2568_v22 }
 0x6d0   : > { %6527 = vmatprep.mubr.msk.f32.mxu1 %vm884_vm0, %v8489_v30  ;;  %6564 = vmatprep.subr.msk.mxu0 %vm884_vm0, %v8534_v26 }
 0x6d1   : > { %v8591_v8 = vpop.permute.xlu1 %2829 }
 0x6d3   : > { %6528 = vmatmul.mubr.msk.f32.gmra.mxu1 %vm884_vm0, %v2301_v7 }
 0x6d4   : > { %6530 = vmatprep.mubr.msk.f32.mxu1 %vm884_vm0, %v2303_v15 }
 0x6d7   : > { %6531 = vmatmul.mubr.msk.f32.gmra.mxu1 %vm884_vm0, %v2305_v56 }
 0x6d8   : > { %6533 = vmatprep.mubr.msk.f32.mxu1 %vm884_vm0, %v2307_v18 }
 0x6db   : > { %6534 = vmatmul.mubr.msk.f32.gmra.mxu1 %vm884_vm0, %v2309_v31 }
 0x753   : > { %v8547_v39 = vpop.f32.mrf.mxu1 }
 0x755   : > { %v8549_v9 = vpop.f32.mrf.mxu1 }
 0x75b   : > { %v8551_v41 = vpop.f32.mrf.mxu1 }
 0x75d   : > { %v8553_v59 = vpop.f32.mrf.mxu1 }
 0x75e   : > { %9801 = vst [vmem:[#allocation32_spill] sm:$0xff] %v8553_v59 }
 0x763   : > { %v8555_v48 = vpop.f32.mrf.mxu1 }
 0x765   : > { %v8557_v49 = vpop.f32.mrf.mxu1 }
 0x766   : > { %9802 = vst [vmem:[#allocation33_spill] sm:$0xff] %v8557_v49 }
 0x76b   : > { %v8559_v21 = vpop.f32.mrf.mxu1 }
 0x76c   : > { %9803 = vst [vmem:[#allocation34_spill] sm:$0xff] %v8559_v21 }
 0x76d   : > { %v8561_v54 = vpop.f32.mrf.mxu1 }
 0x76e   : > { %9804 = vst [vmem:[#allocation35_spill] sm:$0xff] %v8561_v54 }
 0x76f   : > { %v8563_v38 = vpop.f32.mrf.mxu1 }
 0x771   : > { %v8565_v2 = vpop.f32.mrf.mxu1 }
 0x773   : > { %v8567_v5 = vpop.f32.mrf.mxu1 }
 0x775   : > { %v8569_v51 = vpop.f32.mrf.mxu1 }
 0x776   : > { %9805 = vst [vmem:[#allocation36_spill] sm:$0xff] %v8569_v51 }
 0x777   : > { %v8571_v1 = vpop.f32.mrf.mxu1 }
 0x779   : > { %v8573_v47 = vpop.f32.mrf.mxu1 }
 0x77a   : > { %9806 = vst [vmem:[#allocation37_spill] sm:$0xff] %v8573_v47 }
 0x77b   : > { %v8575_v30 = vpop.f32.mrf.mxu1 }
 0x77c   : > { %9807 = vst [vmem:[#allocation38_spill] sm:$0xff] %v8575_v30 }
 0x77d   : > { %v8577_v34 = vpop.f32.mrf.mxu1 }
 0x77e   : > { %9808 = vst [vmem:[#allocation39_spill] sm:$0xff] %v8577_v34 }
 0x78f   : > { %v6526_v42 = vpop.f32.mrf.mxu1 }
 0x790   : > { %v2474_v57 = vsel %vm1038_vm1, %v6526_v42, -inf }
 0x791   : > { %2475 = vmax.xlane.f32.xlu1 %v2474_v57  ;;  %v2432_v35 = vpop.f32.mrf.mxu1 }
 0x792   : > { %v2471_v0 = vsel %vm1038_vm1, %v2432_v35, -inf }
 0x793   : > { %2472 = vmax.xlane.f32.xlu0 %v2471_v0  ;;  %v6529_v15 = vpop.f32.mrf.mxu1 }
 0x794   : > { %v2480_v28 = vsel %vm1038_vm1, %v6529_v15, -inf }
 0x795   : > { %v2442_v7 = vpop.f32.mrf.mxu1 }
 0x796   : > { %v2477_v19 = vsel %vm1038_vm1, %v2442_v7, -inf }
 0x797   : > { %2481 = vmax.xlane.f32.xlu0 %v2480_v28  ;;  %v6532_v6 = vpop.f32.mrf.mxu1 }
 0x798   : > { %v2486_v32 = vsel %vm1038_vm1, %v6532_v6, -inf }
 0x799   : > { %v2452_v36 = vpop.f32.mrf.mxu1 }
 0x79a   : > { %v2483_v56 = vsel %vm1038_vm1, %v2452_v36, -inf }
 0x79b   : > { %2478 = vmax.xlane.f32.xlu0 %v2477_v19  ;;  %2484 = vmax.xlane.f32.xlu1 %v2483_v56  ;;  %v6535_v27 = vpop.f32.mrf.mxu1 }
 0x79c   : > { %v2492_v31 = vsel %vm1038_vm1, %v6535_v27, -inf }
 0x79d   : > { %v2462_v3 = vpop.f32.mrf.mxu1 }
 0x79e   : > { %v2489_v18 = vsel %vm1038_vm1, %v2462_v3, -inf }
 0x79f   : > { %2487 = vmax.xlane.f32.xlu0 %v2486_v32  ;;  %2490 = vmax.xlane.f32.xlu1 %v2489_v18 }
 0x7a3   : > { %2493 = vmax.xlane.f32.xlu0 %v2492_v31 }
 0x7b0   : > { %2825 = vrot.lane.b32.xlu1 %v7888_v52, %s7440_s19 }
 0x7b9   : > { %2827 = vrot.lane.b32.xlu0 %v7871_v44, %s7440_s19 }
 0x81a   : > { %v2476_v4 = vpop.xlane.xlu1 %2475 }
 0x81b   : > { %v2496_v33 = vsub.f32 %v6526_v42, %v2476_v4 }
 0x81c   : > { %v2473_v29 = vpop.xlane.xlu0 %2472 }
 0x81d   : > { %v2505_v13 = vmul.f32 1.442695, %v2496_v33  ;;  %v2495_v37 = vsub.f32 %v2432_v35, %v2473_v29 }
 0x81f   : > { %7024 = vpow2.f32 %v2505_v13  ;;  %v2503_v43 = vmul.f32 1.442695, %v2495_v37 }
 0x820   : > { %v2482_v28 = vpop.xlane.xlu0 %2481 }
 0x821   : > { %7026 = vpow2.f32 %v2503_v43  ;;  %v2498_v32 = vsub.f32 %v6529_v15, %v2482_v28 }
 0x823   : > { %v2509_v33 = vmul.f32 1.442695, %v2498_v32  ;;  %v9810_v32 = vld [vmem:[#allocation30_spill] sm:$0xff] }
 0x824   : > { %v2479_v42 = vpop.xlane.xlu0 %2478  ;;  %v2485_v35 = vpop.xlane.xlu1 %2484 }
 0x825   : > { %v2497_v19 = vsub.f32 %v2442_v7, %v2479_v42  ;;  %v2499_v31 = vsub.f32 %v2452_v36, %v2485_v35 }
 0x827   : > { %v2507_v18 = vmul.f32 1.442695, %v2497_v19  ;;  %v2511_v37 = vmul.f32 1.442695, %v2499_v31 }
 0x828   : > { %v2488_v56 = vpop.xlane.xlu0 %2487  ;;  %v2491_v4 = vpop.xlane.xlu1 %2490 }
 0x829   : > { %v2500_v29 = vsub.f32 %v6532_v6, %v2488_v56  ;;  %7028 = vpow2.f32 %v2507_v18  ;;  %v2501_v43 = vsub.f32 %v2462_v3, %v2491_v4  ;;  %v9809_v56 = vld [vmem:[#allocation31_spill] sm:$0xff] }
 0x82a   : > { %7030 = vpow2.f32 %v2509_v33 }
 0x82b   : > { %7032 = vpow2.f32 %v2511_v37  ;;  %v2515_v34 = vmul.f32 1.442695, %v2501_v43 }
 0x82c   : > { %v8593_v62 = vpop.eup %7024  ;;  %v2494_v13 = vpop.xlane.xlu0 %2493 }
 0x82d   : > { %v2522_v22 = vsel %vm1038_vm1, %v8593_v62, 0.0  ;;  %v2826_v31 = vpop.permute.xlu1 %2825 }
 0x82e   : > { %v8597_v57 = vpop.eup %7026  ;;  %2523 = vadd.xlane.f32.xlu0 %v2522_v22  ;;  %v2513_v22 = vmul.f32 1.442695, %v2500_v29 }
 0x82f   : > { %v2519_v0 = vsel %vm1038_vm1, %v8597_v57, 0.0 }
 0x830   : > { %2520 = vadd.xlane.f32.xlu1 %v2519_v0  ;;  %v2502_v0 = vsub.f32 %v6535_v27, %v2494_v13  ;;  %7034 = vpow2.f32 %v2513_v22  ;;  %v2828_v18 = vpop.permute.xlu0 %2827 }
 0x831   : > { %7036 = vpow2.f32 %v2515_v34 }
 0x832   : > { %v2517_v54 = vmul.f32 1.442695, %v2502_v0 }
 0x834   : > { %7038 = vpow2.f32 %v2517_v54 }
 0x836   : > { %v8605_v7 = vpop.eup %7028 }
 0x837   : > { %v8607_v15 = vpop.eup %7030  ;;  %v2525_v6 = vsel %vm1038_vm1, %v8605_v7, 0.0 }
 0x838   : > { %v8611_v36 = vpop.eup %7032  ;;  %v2528_v3 = vsel %vm1038_vm1, %v8607_v15, 0.0 }
 0x839   : > { %v2531_v34 = vsel %vm1038_vm1, %v8611_v36, 0.0 }
 0x83d   : > { %v8615_v27 = vpop.eup %7034 }
 0x83e   : > { %v8619_v54 = vpop.eup %7036  ;;  %v2534_v28 = vsel %vm1038_vm1, %v8615_v27, 0.0 }
 0x83f   : > { %v2537_v35 = vsel %vm1038_vm1, %v8619_v54, 0.0 }
 0x841   : > { %2821 = vrot.lane.b32.xlu1 %v7931_v11, %s7440_s19  ;;  %v8623_v42 = vpop.eup %7038 }
 0x842   : > { %v2540_v19 = vsel %vm1038_vm1, %v8623_v42, 0.0 }
 0x844   : > { %2823 = vrot.lane.b32.xlu0 %v7908_v60, %s7440_s19 }
 0x863   : > { %2526 = vadd.xlane.f32.xlu0 %v2525_v6 }
 0x865   : > { %2529 = vadd.xlane.f32.xlu1 %v2528_v3 }
 0x867   : > { %2532 = vadd.xlane.f32.xlu0 %v2531_v34 }
 0x869   : > { %2535 = vadd.xlane.f32.xlu1 %v2534_v28 }
 0x86b   : > { %2538 = vadd.xlane.f32.xlu0 %v2537_v35 }
 0x86d   : > { %2541 = vadd.xlane.f32.xlu1 %v2540_v19 }
 0x87e   : > { %2817 = vrot.lane.b32.xlu1 %v7914_v61, %s7440_s19 }
 0x881   : > { %2819 = vrot.lane.b32.xlu0 %v7893_v53, %s7440_s19 }
 0x882   : > { %2795 = vrot.lane.b32.xlu1 %v7988_v23, %s7440_s19 }
 0x885   : > { %2793 = vrot.lane.b32.xlu0 %v7839_v12, %s7440_s19 }
 0x886   : > { %2799 = vrot.lane.b32.xlu1 %v7960_v17, %s7440_s19 }
 0x889   : > { %2797 = vrot.lane.b32.xlu0 %v7994_v25, %s7440_s19 }
 0x88a   : > { %2803 = vrot.lane.b32.xlu1 %v8009_v14, %s7440_s19 }
 0x88d   : > { %2801 = vrot.lane.b32.xlu0 %v7971_v20, %s7440_s19 }
 0x88e   : > { %2807 = vrot.lane.b32.xlu1 %v7991_v24, %s7440_s19 }
 0x891   : > { %2805 = vrot.lane.b32.xlu0 %v8012_v16, %s7440_s19 }
 0x892   : > { %3080 = vrot.lane.b32.xlu1 %v7867_v40, %s7440_s19 }
 0x895   : > { %3078 = vrot.lane.b32.xlu0 %v7875_v46, %s7440_s19 }
 0x896   : > { %3076 = vrot.lane.b32.xlu1 %v7882_v50, %s7440_s19 }
 0x899   : > { %3072 = vrot.lane.b32.xlu0 %v7903_v58, %s7440_s19 }
 0x89a   : > { %3074 = vrot.lane.b32.xlu1 %v7895_v55, %s7440_s19 }
 0x89d   : > { %3068 = vrot.lane.b32.xlu0 %v7925_v10, %s7440_s19 }
 0x89e   : > { %3070 = vrot.lane.b32.xlu1 %v7916_v63, %s7440_s19 }
 0x8a1   : > { %3330 = vrot.lane.b32.xlu0 %v7873_v45, %s7441_s30 }
 0x8a2   : > { %3066 = vrot.lane.b32.xlu1 %v9809_v56, %s7440_s19 }
 0x8a6   : > { %3328 = vrot.lane.b32.xlu1 %v9810_v32, %s7441_s30 }
 0x8b7   : > { %v2524_v4 = vpop.xlane.xlu0 %2523 }
 0x8b8   : > { %7040 = vrcp.f32 %v2524_v4 }
 0x8b9   : > { %v2521_v33 = vpop.xlane.xlu1 %2520 }
 0x8ba   : > { %7042 = vrcp.f32 %v2521_v33 }
 0x8c5   : > { %v7041_v29 = vpop.eup %7040 }
 0x8c6   : > { %v2552_v43 = vmul.f32 %v7041_v29, %v8593_v62  ;;  %v2824_v62 = vpop.permute.xlu0 %2823 }
 0x8c7   : > { %v7043_v13 = vpop.eup %7042 }
 0x8c8   : > { %v2551_v37 = vmul.f32 %v7043_v13, %v8597_v57  ;;  %v2822_v57 = vpop.permute.xlu1 %2821 }
 0x8ca   : > { %6552 = vmatprep.mubr.msk.f32.mxu0 %vm1038_vm1, %v2551_v37 }
 0x8cb   : > { %6553 = vmatmul.mubr.msk.f32.vlgmr.msra.gmra.mxu0 %vm1038_vm1, %v2552_v43 }
 0x8cc   : > { %6565 = vmatpush3.xpose.msk.msra.mxu0 %vm884_vm0, %v8534_v26 }
 0x8cd   : > { %6566 = vmatprep.subr.msk.mxu0 %vm884_vm0, %v8591_v8 }
 0x8d0   : > { %6567 = vmatpush3.xpose.msk.msra.mxu0 %vm884_vm0, %v8591_v8 }
 0x8d1   : > { %6568 = vmatprep.subr.msk.mxu0 %vm884_vm0, %v2828_v18 }
 0x8d4   : > { %6569 = vmatpush3.xpose.msk.msra.mxu0 %vm884_vm0, %v2828_v18 }
 0x8d5   : > { %6570 = vmatprep.subr.msk.mxu0 %vm884_vm0, %v2826_v31 }
 0x8d8   : > { %6571 = vmatpush3.xpose.msk.msra.mxu0 %vm884_vm0, %v2826_v31 }
 0x8d9   : > { %6572 = vmatprep.subr.msk.mxu0 %vm884_vm0, %v2824_v62 }
 0x8dc   : > { %6573 = vmatpush3.xpose.msk.msra.mxu0 %vm884_vm0, %v2824_v62 }
 0x8dd   : > { %6574 = vmatprep.subr.msk.mxu0 %vm884_vm0, %v2822_v57 }
 0x8e0   : > { %6575 = vmatpush3.xpose.msk.msra.mxu0 %vm884_vm0, %v2822_v57 }
 0x8ec   : > { %v2527_v26 = vpop.xlane.xlu0 %2526 }
 0x8ed   : > { %7044 = vrcp.f32 %v2527_v26 }
 0x8ee   : > { %v2530_v8 = vpop.xlane.xlu1 %2529 }
 0x8ef   : > { %7046 = vrcp.f32 %v2530_v8 }
 0x8f0   : > { %v2533_v22 = vpop.xlane.xlu0 %2532 }
 0x8f1   : > { %7048 = vrcp.f32 %v2533_v22 }
 0x8f2   : > { %v2536_v0 = vpop.xlane.xlu1 %2535 }
 0x8f3   : > { %7050 = vrcp.f32 %v2536_v0 }
 0x8f4   : > { %v2539_v6 = vpop.xlane.xlu0 %2538 }
 0x8f5   : > { %7052 = vrcp.f32 %v2539_v6 }
 0x8f6   : > { %v2542_v3 = vpop.xlane.xlu1 %2541 }
 0x8f7   : > { %7054 = vrcp.f32 %v2542_v3 }
 0x8f8   : > { %v2820_v34 = vpop.permute.xlu0 %2819 }
 0x8f9   : > { %6576 = vmatprep.subr.msk.mxu0 %vm884_vm0, %v2820_v34 }
 0x8fa   : > { %v7045_v28 = vpop.eup %7044  ;;  %6577 = vmatpush3.xpose.msk.msra.mxu0 %vm884_vm0, %v2820_v34  ;;  %v2818_v35 = vpop.permute.xlu1 %2817 }
 0x8fb   : > { %6578 = vmatprep.subr.msk.mxu0 %vm884_vm0, %v2818_v35  ;;  %v2553_v19 = vmul.f32 %v7045_v28, %v8605_v7 }
 0x8fc   : > { %v7047_v18 = vpop.eup %7046  ;;  %v2794_v31 = vpop.permute.xlu0 %2793 }
 0x8fd   : > { %6555 = vmatprep.mubr.msk.f32.mxu0 %vm1038_vm1, %v2553_v19  ;;  %v2554_v4 = vmul.f32 %v7047_v18, %v8607_v15 }
 0x8fe   : > { %v7049_v33 = vpop.eup %7048  ;;  %6579 = vmatpush3.xpose.msk.msra.mxu0 %vm884_vm0, %v2818_v35  ;;  %v2796_v29 = vpop.permute.xlu1 %2795 }
 0x8ff   : > { %6556 = vmatmul.mubr.msk.f32.gmra.mxu0 %vm1038_vm1, %v2554_v4  ;;  %v2555_v13 = vmul.f32 %v7049_v33, %v8611_v36 }
 0x900   : > { %v7051_v37 = vpop.eup %7050  ;;  %v2798_v43 = vpop.permute.xlu0 %2797 }
 0x901   : > { %6558 = vmatprep.mubr.msk.f32.mxu0 %vm1038_vm1, %v2555_v13  ;;  %v2556_v7 = vmul.f32 %v7051_v37, %v8615_v27 }
 0x902   : > { %v7053_v62 = vpop.eup %7052  ;;  %v2800_v57 = vpop.permute.xlu1 %2799 }
 0x903   : > { %6559 = vmatmul.mubr.msk.f32.gmra.mxu0 %vm1038_vm1, %v2556_v7  ;;  %v2557_v15 = vmul.f32 %v7053_v62, %v8619_v54 }
 0x904   : > { %v7055_v26 = vpop.eup %7054  ;;  %v2802_v8 = vpop.permute.xlu0 %2801 }
 0x905   : > { %6561 = vmatprep.mubr.msk.f32.mxu0 %vm1038_vm1, %v2557_v15  ;;  %v2558_v22 = vmul.f32 %v7055_v26, %v8623_v42 }
 0x906   : > { %v2804_v0 = vpop.permute.xlu1 %2803 }
 0x907   : > { %6562 = vmatmul.mubr.msk.f32.gmra.mxu0 %vm1038_vm1, %v2558_v22 }
 0x908   : > { %v2806_v36 = vpop.permute.xlu0 %2805  ;;  %6580 = vmatprep.mubr.msk.f32.mxu0 %vm884_vm0, %v2794_v31 }
 0x90a   : > { %v2808_v6 = vpop.permute.xlu1 %2807 }
 0x90b   : > { %6581 = vmatmul.mubr.msk.f32.vlgmr.msra.gmra.mxu0 %vm884_vm0, %v2796_v29 }
 0x90c   : > { %6583 = vmatprep.mubr.msk.f32.mxu0 %vm884_vm0, %v2798_v43  ;;  %v3079_v27 = vpop.permute.xlu0 %3078 }
 0x90e   : > { %v3081_v3 = vpop.permute.xlu1 %3080 }
 0x90f   : > { %6584 = vmatmul.mubr.msk.f32.gmra.mxu0 %vm884_vm0, %v2800_v57  ;;  %6592 = vmatprep.subr.mxu1 %v3081_v3 }
 0x910   : > { %6586 = vmatprep.mubr.msk.f32.mxu0 %vm884_vm0, %v2802_v8  ;;  %6593 = vmatpush3.msra.mxu1 %v3081_v3  ;;  %v3073_v42 = vpop.permute.xlu0 %3072 }
 0x911   : > { %6594 = vmatprep.subr.mxu1 %v3079_v27 }
 0x912   : > { %6595 = vmatpush3.msra.mxu1 %v3079_v27  ;;  %v3077_v54 = vpop.permute.xlu1 %3076 }
 0x913   : > { %6587 = vmatmul.mubr.msk.f32.gmra.mxu0 %vm884_vm0, %v2804_v0  ;;  %6596 = vmatprep.subr.mxu1 %v3077_v54 }
 0x914   : > { %6589 = vmatprep.mubr.msk.f32.mxu0 %vm884_vm0, %v2806_v36  ;;  %6597 = vmatpush3.msra.mxu1 %v3077_v54  ;;  %v3069_v28 = vpop.permute.xlu0 %3068 }
 0x916   : > { %v3075_v34 = vpop.permute.xlu1 %3074 }
 0x917   : > { %6590 = vmatmul.mubr.msk.f32.gmra.mxu0 %vm884_vm0, %v2808_v6  ;;  %6598 = vmatprep.subr.mxu1 %v3075_v34 }
 0x918   : > { %6599 = vmatpush3.msra.mxu1 %v3075_v34  ;;  %v8711_v18 = vpop.permute.xlu0 %3330 }
 0x919   : > { %6600 = vmatprep.subr.mxu1 %v3073_v42 }
 0x91a   : > { %6601 = vmatpush3.msra.mxu1 %v3073_v42  ;;  %v3071_v35 = vpop.permute.xlu1 %3070 }
 0x91b   : > { %6602 = vmatprep.subr.mxu1 %v3071_v35 }
 0x91c   : > { %6603 = vmatpush3.msra.mxu1 %v3071_v35 }
 0x91d   : > { %6604 = vmatprep.subr.mxu1 %v3069_v28 }
 0x91e   : > { %6605 = vmatpush3.msra.mxu1 %v3069_v28  ;;  %v3067_v19 = vpop.permute.xlu1 %3066 }
 0x91f   : > { %6606 = vmatprep.subr.mxu1 %v3067_v19 }
 0x920   : > { %6607 = vmatpush3.msra.mxu1 %v3067_v19 }
 0x921   : > { %6620 = vmatprep.subr.msk.mxu1 %vm884_vm0, %v8711_v18 }
 0x922   : > { %v8743_v19 = vpop.permute.xlu1 %3328 }
 0x98b   : > { %v8715_v31 = vpop.f32.mrf.mxu0 }
 0x98d   : > { %v8717_v4 = vpop.f32.mrf.mxu0 }
 0x98e   : > { %9811 = vst [vmem:[#allocation31_spill] sm:$0xff] %v8717_v4 }
 0x9bf   : > { %v8719_v33 = vpop.f32.mrf.mxu0 }
 0x9c1   : > { %v8721_v29 = vpop.f32.mrf.mxu0 }
 0x9c2   : > { %9812 = vst [vmem:[#allocation30_spill] sm:$0xff] %v8721_v29 }
 0x9c3   : > { %v8723_v13 = vpop.f32.mrf.mxu0 }
 0x9c4   : > { %9813 = vst [vmem:[#allocation40_spill] sm:$0xff] %v8723_v13 }
 0x9c5   : > { %v8725_v37 = vpop.f32.mrf.mxu0 }
 0x9c6   : > { %9814 = vst [vmem:[#allocation41_spill] sm:$0xff] %v8725_v37 }
 0x9c7   : > { %v8727_v43 = vpop.f32.mrf.mxu0 }
 0x9c8   : > { %9815 = vst [vmem:[#allocation42_spill] sm:$0xff] %v8727_v43 }
 0x9c9   : > { %v8729_v7 = vpop.f32.mrf.mxu0 }
 0x9ca   : > { %9816 = vst [vmem:[#allocation43_spill] sm:$0xff] %v8729_v7 }
 0x9cb   : > { %v6582_v62 = vpop.f32.mrf.mxu0 }
 0x9cc   : > { %v2973_v57 = vsel %vm1038_vm1, %v6582_v62, -inf }
 0x9cd   : > { %2974 = vmax.xlane.f32.xlu1 %v2973_v57  ;;  %v2931_v15 = vpop.f32.mrf.mxu0 }
 0x9ce   : > { %v2970_v26 = vsel %vm1038_vm1, %v2931_v15, -inf }
 0x9cf   : > { %2971 = vmax.xlane.f32.xlu0 %v2970_v26  ;;  %v6585_v8 = vpop.f32.mrf.mxu0 }
 0x9d0   : > { %v2979_v0 = vsel %vm1038_vm1, %v6585_v8, -inf }
 0x9d1   : > { %v2941_v22 = vpop.f32.mrf.mxu0 }
 0x9d2   : > { %v2976_v27 = vsel %vm1038_vm1, %v2941_v22, -inf }
 0x9d3   : > { %2980 = vmax.xlane.f32.xlu0 %v2979_v0  ;;  %v6588_v36 = vpop.f32.mrf.mxu0 }
 0x9d4   : > { %v2985_v34 = vsel %vm1038_vm1, %v6588_v36, -inf }
 0x9d5   : > { %v2951_v6 = vpop.f32.mrf.mxu0 }
 0x9d6   : > { %v2982_v3 = vsel %vm1038_vm1, %v2951_v6, -inf }
 0x9d7   : > { %2977 = vmax.xlane.f32.xlu0 %v2976_v27  ;;  %2983 = vmax.xlane.f32.xlu1 %v2982_v3  ;;  %v6591_v54 = vpop.f32.mrf.mxu0 }
 0x9d8   : > { %v2991_v35 = vsel %vm1038_vm1, %v6591_v54, -inf }
 0x9d9   : > { %v2961_v42 = vpop.f32.mrf.mxu0 }
 0x9da   : > { %v2988_v28 = vsel %vm1038_vm1, %v2961_v42, -inf }
 0x9db   : > { %2986 = vmax.xlane.f32.xlu0 %v2985_v34  ;;  %2989 = vmax.xlane.f32.xlu1 %v2988_v28 }
 0x9df   : > { %2992 = vmax.xlane.f32.xlu0 %v2991_v35 }
 0x9ec   : > { %3324 = vrot.lane.b32.xlu1 %v7888_v52, %s7441_s30 }
 0x9f5   : > { %3326 = vrot.lane.b32.xlu0 %v7871_v44, %s7441_s30 }
 0xa56   : > { %v2975_v57 = vpop.xlane.xlu1 %2974 }
 0xa57   : > { %v2995_v26 = vsub.f32 %v6582_v62, %v2975_v57 }
 0xa58   : > { %v2972_v0 = vpop.xlane.xlu0 %2971 }
 0xa59   : > { %v3004_v27 = vmul.f32 1.442695, %v2995_v26  ;;  %v2994_v3 = vsub.f32 %v2931_v15, %v2972_v0 }
 0xa5b   : > { %7056 = vpow2.f32 %v3004_v27  ;;  %v3002_v7 = vmul.f32 1.442695, %v2994_v3 }
 0xa5c   : > { %v2981_v47 = vpop.xlane.xlu0 %2980 }
 0xa5d   : > { %7058 = vpow2.f32 %v3002_v7  ;;  %v2997_v26 = vsub.f32 %v6585_v8, %v2981_v47 }
 0xa60   : > { %v2978_v7 = vpop.xlane.xlu0 %2977  ;;  %v2984_v62 = vpop.xlane.xlu1 %2983 }
 0xa61   : > { %v2996_v15 = vsub.f32 %v2941_v22, %v2978_v7  ;;  %v2998_v27 = vsub.f32 %v2951_v6, %v2984_v62 }
 0xa63   : > { %v3006_v0 = vmul.f32 1.442695, %v2996_v15 }
 0xa64   : > { %v2987_v57 = vpop.xlane.xlu0 %2986  ;;  %v2990_v3 = vpop.xlane.xlu1 %2989 }
 0xa65   : > { %v2999_v49 = vsub.f32 %v6588_v36, %v2987_v57  ;;  %7060 = vpow2.f32 %v3006_v0  ;;  %v3000_v29 = vsub.f32 %v2961_v42, %v2990_v3 }
 0xa67   : > { %v3012_v30 = vmul.f32 1.442695, %v2999_v49  ;;  %v3014_v21 = vmul.f32 1.442695, %v3000_v29 }
 0xa68   : > { %v8745_v34 = vpop.eup %7056  ;;  %v2993_v43 = vpop.xlane.xlu0 %2992 }
 0xa69   : > { %v3021_v28 = vsel %vm1038_vm1, %v8745_v34, 0.0  ;;  %v3001_v51 = vsub.f32 %v6591_v54, %v2993_v43  ;;  %v3325_v42 = vpop.permute.xlu1 %3324 }
 0xa6a   : > { %v8749_v35 = vpop.eup %7058  ;;  %3022 = vadd.xlane.f32.xlu0 %v3021_v28  ;;  %v3008_v28 = vmul.f32 1.442695, %v2997_v26 }
 0xa6b   : > { %v3018_v37 = vsel %vm1038_vm1, %v8749_v35, 0.0  ;;  %v3016_v59 = vmul.f32 1.442695, %v3001_v51 }
 0xa6c   : > { %3019 = vadd.xlane.f32.xlu1 %v3018_v37  ;;  %v3010_v37 = vmul.f32 1.442695, %v2998_v27  ;;  %7062 = vpow2.f32 %v3008_v28  ;;  %v3327_v54 = vpop.permute.xlu0 %3326 }
 0xa6e   : > { %7064 = vpow2.f32 %v3010_v37 }
 0xa6f   : > { %7066 = vpow2.f32 %v3012_v30 }
 0xa70   : > { %7068 = vpow2.f32 %v3014_v21 }
 0xa71   : > { %7070 = vpow2.f32 %v3016_v59 }
 0xa72   : > { %v8757_v22 = vpop.eup %7060 }
 0xa73   : > { %v3024_v8 = vsel %vm1038_vm1, %v8757_v22, 0.0 }
 0xa79   : > { %v8759_v47 = vpop.eup %7062 }
 0xa7a   : > { %v3027_v49 = vsel %vm1038_vm1, %v8759_v47, 0.0 }
 0xa7b   : > { %v8763_v36 = vpop.eup %7064 }
 0xa7c   : > { %v8767_v43 = vpop.eup %7066  ;;  %v3030_v21 = vsel %vm1038_vm1, %v8763_v36, 0.0 }
 0xa7d   : > { %3320 = vrot.lane.b32.xlu1 %v7931_v11, %s7441_s30  ;;  %v8771_v59 = vpop.eup %7068  ;;  %v3033_v51 = vsel %vm1038_vm1, %v8767_v43, 0.0 }
 0xa7e   : > { %v8775_v30 = vpop.eup %7070  ;;  %v3036_v29 = vsel %vm1038_vm1, %v8771_v59, 0.0 }
 0xa7f   : > { %v3039_v6 = vsel %vm1038_vm1, %v8775_v30, 0.0 }
 0xa80   : > { %3322 = vrot.lane.b32.xlu0 %v7908_v60, %s7441_s30 }
 0xa9f   : > { %3025 = vadd.xlane.f32.xlu0 %v3024_v8 }
 0xaa1   : > { %3028 = vadd.xlane.f32.xlu1 %v3027_v49 }
 0xaa3   : > { %3031 = vadd.xlane.f32.xlu0 %v3030_v21 }
 0xaa5   : > { %3034 = vadd.xlane.f32.xlu1 %v3033_v51 }
 0xaa7   : > { %3037 = vadd.xlane.f32.xlu0 %v3036_v29 }
 0xaa9   : > { %3040 = vadd.xlane.f32.xlu1 %v3039_v6 }
 0xaba   : > { %3316 = vrot.lane.b32.xlu1 %v7914_v61, %s7441_s30 }
 0xabd   : > { %3318 = vrot.lane.b32.xlu0 %v7893_v53, %s7441_s30 }
 0xabe   : > { %3294 = vrot.lane.b32.xlu1 %v7988_v23, %s7441_s30 }
 0xac1   : > { %3292 = vrot.lane.b32.xlu0 %v7839_v12, %s7441_s30 }
 0xac2   : > { %3298 = vrot.lane.b32.xlu1 %v7960_v17, %s7441_s30 }
 0xac5   : > { %3296 = vrot.lane.b32.xlu0 %v7994_v25, %s7441_s30 }
 0xac6   : > { %3302 = vrot.lane.b32.xlu1 %v8009_v14, %s7441_s30 }
 0xac9   : > { %3300 = vrot.lane.b32.xlu0 %v7971_v20, %s7441_s30 }
 0xaca   : > { %3306 = vrot.lane.b32.xlu1 %v7991_v24, %s7441_s30 }
 0xacd   : > { %3304 = vrot.lane.b32.xlu0 %v8012_v16, %s7441_s30 }
 0xace   : > { %3579 = vrot.lane.b32.xlu1 %v7867_v40, %s7441_s30 }
 0xad1   : > { %3577 = vrot.lane.b32.xlu0 %v7875_v46, %s7441_s30 }
 0xad2   : > { %3575 = vrot.lane.b32.xlu1 %v7882_v50, %s7441_s30 }
 0xad5   : > { %3571 = vrot.lane.b32.xlu0 %v7903_v58, %s7441_s30 }
 0xad6   : > { %3573 = vrot.lane.b32.xlu1 %v7895_v55, %s7441_s30 }
 0xad9   : > { %3567 = vrot.lane.b32.xlu0 %v7925_v10, %s7441_s30 }
 0xada   : > { %3569 = vrot.lane.b32.xlu1 %v7916_v63, %s7441_s30 }
 0xadd   : > { %3829 = vrot.lane.b32.xlu0 %v7873_v45, %s7442_s15 }
 0xade   : > { %3565 = vrot.lane.b32.xlu1 %v9809_v56, %s7441_s30 }
 0xae2   : > { %3827 = vrot.lane.b32.xlu1 %v9810_v32, %s7442_s15 }
 0xaf3   : > { %v3023_v7 = vpop.xlane.xlu0 %3022 }
 0xaf4   : > { %7072 = vrcp.f32 %v3023_v7 }
 0xaf5   : > { %v3020_v62 = vpop.xlane.xlu1 %3019 }
 0xaf6   : > { %7074 = vrcp.f32 %v3020_v62 }
 0xb01   : > { %v7073_v15 = vpop.eup %7072 }
 0xb02   : > { %v3051_v0 = vmul.f32 %v7073_v15, %v8745_v34  ;;  %v3323_v34 = vpop.permute.xlu0 %3322 }
 0xb03   : > { %v7075_v57 = vpop.eup %7074 }
 0xb04   : > { %v3050_v26 = vmul.f32 %v7075_v57, %v8749_v35  ;;  %v3321_v35 = vpop.permute.xlu1 %3320 }
 0xb06   : > { %6608 = vmatprep.mubr.msk.f32.mxu1 %vm1038_vm1, %v3050_v26 }
 0xb07   : > { %6609 = vmatmul.mubr.msk.f32.vlgmr.msra.gmra.mxu1 %vm1038_vm1, %v3051_v0 }
 0xb08   : > { %6621 = vmatpush3.xpose.msk.msra.mxu1 %vm884_vm0, %v8711_v18 }
 0xb09   : > { %6622 = vmatprep.subr.msk.mxu1 %vm884_vm0, %v8743_v19 }
 0xb0c   : > { %6623 = vmatpush3.xpose.msk.msra.mxu1 %vm884_vm0, %v8743_v19 }
 0xb0d   : > { %6624 = vmatprep.subr.msk.mxu1 %vm884_vm0, %v3327_v54 }
 0xb10   : > { %6625 = vmatpush3.xpose.msk.msra.mxu1 %vm884_vm0, %v3327_v54 }
 0xb11   : > { %6626 = vmatprep.subr.msk.mxu1 %vm884_vm0, %v3325_v42 }
 0xb14   : > { %6627 = vmatpush3.xpose.msk.msra.mxu1 %vm884_vm0, %v3325_v42 }
 0xb15   : > { %6628 = vmatprep.subr.msk.mxu1 %vm884_vm0, %v3323_v34 }
 0xb18   : > { %6629 = vmatpush3.xpose.msk.msra.mxu1 %vm884_vm0, %v3323_v34 }
 0xb19   : > { %6630 = vmatprep.subr.msk.mxu1 %vm884_vm0, %v3321_v35 }
 0xb1c   : > { %6631 = vmatpush3.xpose.msk.msra.mxu1 %vm884_vm0, %v3321_v35 }
 0xb28   : > { %v3026_v18 = vpop.xlane.xlu0 %3025 }
 0xb29   : > { %7076 = vrcp.f32 %v3026_v18 }
 0xb2a   : > { %v3029_v19 = vpop.xlane.xlu1 %3028 }
 0xb2b   : > { %7078 = vrcp.f32 %v3029_v19 }
 0xb2c   : > { %v3032_v27 = vpop.xlane.xlu0 %3031 }
 0xb2d   : > { %7080 = vrcp.f32 %v3032_v27 }
 0xb2e   : > { %v3035_v3 = vpop.xlane.xlu1 %3034 }
 0xb2f   : > { %7082 = vrcp.f32 %v3035_v3 }
 0xb30   : > { %v3038_v28 = vpop.xlane.xlu0 %3037 }
 0xb31   : > { %7084 = vrcp.f32 %v3038_v28 }
 0xb32   : > { %v3041_v37 = vpop.xlane.xlu1 %3040 }
 0xb33   : > { %7086 = vrcp.f32 %v3041_v37 }
 0xb34   : > { %v3319_v8 = vpop.permute.xlu0 %3318 }
 0xb35   : > { %6632 = vmatprep.subr.msk.mxu1 %vm884_vm0, %v3319_v8 }
 0xb36   : > { %v7077_v49 = vpop.eup %7076  ;;  %6633 = vmatpush3.xpose.msk.msra.mxu1 %vm884_vm0, %v3319_v8  ;;  %v3317_v21 = vpop.permute.xlu1 %3316 }
 0xb37   : > { %6634 = vmatprep.subr.msk.mxu1 %vm884_vm0, %v3317_v21  ;;  %v3052_v51 = vmul.f32 %v7077_v49, %v8757_v22 }
 0xb38   : > { %v7079_v29 = vpop.eup %7078  ;;  %v3293_v6 = vpop.permute.xlu0 %3292 }
 0xb39   : > { %6611 = vmatprep.mubr.msk.f32.mxu1 %vm1038_vm1, %v3052_v51  ;;  %v3053_v54 = vmul.f32 %v7079_v29, %v8759_v47 }
 0xb3a   : > { %v7081_v42 = vpop.eup %7080  ;;  %6635 = vmatpush3.xpose.msk.msra.mxu1 %vm884_vm0, %v3317_v21  ;;  %v3295_v7 = vpop.permute.xlu1 %3294 }
 0xb3b   : > { %6612 = vmatmul.mubr.msk.f32.gmra.mxu1 %vm1038_vm1, %v3053_v54  ;;  %v3054_v62 = vmul.f32 %v7081_v42, %v8763_v36 }
 0xb3c   : > { %v7083_v15 = vpop.eup %7082  ;;  %v3297_v57 = vpop.permute.xlu0 %3296 }
 0xb3d   : > { %6614 = vmatprep.mubr.msk.f32.mxu1 %vm1038_vm1, %v3054_v62  ;;  %v3055_v22 = vmul.f32 %v7083_v15, %v8767_v43 }
 0xb3e   : > { %v7085_v26 = vpop.eup %7084  ;;  %v3299_v0 = vpop.permute.xlu1 %3298 }
 0xb3f   : > { %6615 = vmatmul.mubr.msk.f32.gmra.mxu1 %vm1038_vm1, %v3055_v22  ;;  %v3056_v47 = vmul.f32 %v7085_v26, %v8771_v59 }
 0xb40   : > { %v7087_v34 = vpop.eup %7086  ;;  %v3301_v35 = vpop.permute.xlu0 %3300 }
 0xb41   : > { %6617 = vmatprep.mubr.msk.f32.mxu1 %vm1038_vm1, %v3056_v47  ;;  %v3057_v18 = vmul.f32 %v7087_v34, %v8775_v30 }
 0xb42   : > { %v3303_v19 = vpop.permute.xlu1 %3302 }
 0xb43   : > { %6618 = vmatmul.mubr.msk.f32.gmra.mxu1 %vm1038_vm1, %v3057_v18 }
 0xb44   : > { %v3305_v36 = vpop.permute.xlu0 %3304  ;;  %6636 = vmatprep.mubr.msk.f32.mxu1 %vm884_vm0, %v3293_v6 }
 0xb46   : > { %v3307_v27 = vpop.permute.xlu1 %3306 }
 0xb47   : > { %6637 = vmatmul.mubr.msk.f32.vlgmr.msra.gmra.mxu1 %vm884_vm0, %v3295_v7 }
 0xb48   : > { %6639 = vmatprep.mubr.msk.f32.mxu1 %vm884_vm0, %v3297_v57  ;;  %v3578_v43 = vpop.permute.xlu0 %3577 }
 0xb4a   : > { %v3580_v3 = vpop.permute.xlu1 %3579 }
 0xb4b   : > { %6640 = vmatmul.mubr.msk.f32.gmra.mxu1 %vm884_vm0, %v3299_v0  ;;  %6648 = vmatprep.subr.mxu0 %v3580_v3 }
 0xb4c   : > { %6642 = vmatprep.mubr.msk.f32.mxu1 %vm884_vm0, %v3301_v35  ;;  %6649 = vmatpush3.msra.mxu0 %v3580_v3  ;;  %v3572_v30 = vpop.permute.xlu0 %3571 }
 0xb4d   : > { %6650 = vmatprep.subr.mxu0 %v3578_v43 }
 0xb4e   : > { %6651 = vmatpush3.msra.mxu0 %v3578_v43  ;;  %v3576_v59 = vpop.permute.xlu1 %3575 }
 0xb4f   : > { %6643 = vmatmul.mubr.msk.f32.gmra.mxu1 %vm884_vm0, %v3303_v19  ;;  %6652 = vmatprep.subr.mxu0 %v3576_v59 }
 0xb50   : > { %6645 = vmatprep.mubr.msk.f32.mxu1 %vm884_vm0, %v3305_v36  ;;  %6653 = vmatpush3.msra.mxu0 %v3576_v59  ;;  %v3568_v37 = vpop.permute.xlu0 %3567 }
 0xb52   : > { %v3574_v28 = vpop.permute.xlu1 %3573 }
 0xb53   : > { %6646 = vmatmul.mubr.msk.f32.gmra.mxu1 %vm884_vm0, %v3307_v27  ;;  %6654 = vmatprep.subr.mxu0 %v3574_v28 }
 0xb54   : > { %6655 = vmatpush3.msra.mxu0 %v3574_v28  ;;  %v8863_v21 = vpop.permute.xlu0 %3829 }
 0xb55   : > { %6656 = vmatprep.subr.mxu0 %v3572_v30 }
 0xb56   : > { %6657 = vmatpush3.msra.mxu0 %v3572_v30  ;;  %v3570_v8 = vpop.permute.xlu1 %3569 }
 0xb57   : > { %6658 = vmatprep.subr.mxu0 %v3570_v8 }
 0xb58   : > { %6659 = vmatpush3.msra.mxu0 %v3570_v8 }
 0xb59   : > { %6660 = vmatprep.subr.mxu0 %v3568_v37 }
 0xb5a   : > { %6661 = vmatpush3.msra.mxu0 %v3568_v37  ;;  %v3566_v49 = vpop.permute.xlu1 %3565 }
 0xb5b   : > { %6662 = vmatprep.subr.mxu0 %v3566_v49 }
 0xb5c   : > { %6663 = vmatpush3.msra.mxu0 %v3566_v49 }
 0xb5d   : > { %6676 = vmatprep.subr.msk.mxu0 %vm884_vm0, %v8863_v21 }
 0xb5e   : > { %v8895_v37 = vpop.permute.xlu1 %3827 }
 0xbc7   : > { %v8867_v51 = vpop.f32.mrf.mxu1 }
 0xbc9   : > { %v8869_v29 = vpop.f32.mrf.mxu1 }
 0xbca   : > { %9817 = vst [vmem:[#allocation44_spill] sm:$0xff] %v8869_v29 }
 0xbfb   : > { %v8871_v6 = vpop.f32.mrf.mxu1 }
 0xbfd   : > { %v8873_v54 = vpop.f32.mrf.mxu1 }
 0xbfe   : > { %9818 = vst [vmem:[#allocation45_spill] sm:$0xff] %v8873_v54 }
 0xbff   : > { %v8875_v42 = vpop.f32.mrf.mxu1 }
 0xc00   : > { %9819 = vst [vmem:[#allocation46_spill] sm:$0xff] %v8875_v42 }
 0xc01   : > { %v8877_v7 = vpop.f32.mrf.mxu1 }
 0xc02   : > { %9820 = vst [vmem:[#allocation47_spill] sm:$0xff] %v8877_v7 }
 0xc03   : > { %v8879_v62 = vpop.f32.mrf.mxu1 }
 0xc04   : > { %9821 = vst [vmem:[#allocation48_spill] sm:$0xff] %v8879_v62 }
 0xc05   : > { %v8881_v15 = vpop.f32.mrf.mxu1 }
 0xc06   : > { %9822 = vst [vmem:[#allocation49_spill] sm:$0xff] %v8881_v15 }
 0xc07   : > { %v6638_v57 = vpop.f32.mrf.mxu1 }
 0xc08   : > { %v3472_v22 = vsel %vm1038_vm1, %v6638_v57, -inf }
 0xc09   : > { %3473 = vmax.xlane.f32.xlu1 %v3472_v22  ;;  %v3430_v26 = vpop.f32.mrf.mxu1 }
 0xc0a   : > { %v3469_v0 = vsel %vm1038_vm1, %v3430_v26, -inf }
 0xc0b   : > { %3470 = vmax.xlane.f32.xlu0 %v3469_v0  ;;  %v6641_v47 = vpop.f32.mrf.mxu1 }
 0xc0c   : > { %v3478_v35 = vsel %vm1038_vm1, %v6641_v47, -inf }
 0xc0d   : > { %v3440_v34 = vpop.f32.mrf.mxu1 }
 0xc0e   : > { %v3475_v36 = vsel %vm1038_vm1, %v3440_v34, -inf }
 0xc0f   : > { %3479 = vmax.xlane.f32.xlu0 %v3478_v35  ;;  %v6644_v18 = vpop.f32.mrf.mxu1 }
 0xc10   : > { %v3484_v59 = vsel %vm1038_vm1, %v6644_v18, -inf }
 0xc11   : > { %v3450_v19 = vpop.f32.mrf.mxu1 }
 0xc12   : > { %v3481_v27 = vsel %vm1038_vm1, %v3450_v19, -inf }
 0xc13   : > { %3476 = vmax.xlane.f32.xlu0 %v3475_v36  ;;  %3482 = vmax.xlane.f32.xlu1 %v3481_v27  ;;  %v6647_v43 = vpop.f32.mrf.mxu1 }
 0xc14   : > { %v3490_v28 = vsel %vm1038_vm1, %v6647_v43, -inf }
 0xc15   : > { %v3460_v3 = vpop.f32.mrf.mxu1 }
 0xc16   : > { %v3487_v30 = vsel %vm1038_vm1, %v3460_v3, -inf }
 0xc17   : > { %3485 = vmax.xlane.f32.xlu0 %v3484_v59  ;;  %3488 = vmax.xlane.f32.xlu1 %v3487_v30 }
 0xc1b   : > { %3491 = vmax.xlane.f32.xlu0 %v3490_v28 }
 0xc28   : > { %3823 = vrot.lane.b32.xlu1 %v7888_v52, %s7442_s15 }
 0xc31   : > { %3825 = vrot.lane.b32.xlu0 %v7871_v44, %s7442_s15 }
 0xc92   : > { %v3474_v8 = vpop.xlane.xlu1 %3473 }
 0xc93   : > { %v3494_v49 = vsub.f32 %v6638_v57, %v3474_v8 }
 0xc94   : > { %v3471_v22 = vpop.xlane.xlu0 %3470 }
 0xc95   : > { %v3503_v0 = vmul.f32 1.442695, %v3494_v49  ;;  %v3493_v35 = vsub.f32 %v3430_v26, %v3471_v22 }
 0xc97   : > { %7088 = vpow2.f32 %v3503_v0  ;;  %v3501_v36 = vmul.f32 1.442695, %v3493_v35 }
 0xc98   : > { %v3480_v15 = vpop.xlane.xlu0 %3479 }
 0xc99   : > { %7090 = vpow2.f32 %v3501_v36  ;;  %v3496_v22 = vsub.f32 %v6641_v47, %v3480_v15 }
 0xc9c   : > { %v3477_v57 = vpop.xlane.xlu0 %3476  ;;  %v3483_v26 = vpop.xlane.xlu1 %3482 }
 0xc9d   : > { %v3495_v8 = vsub.f32 %v3440_v34, %v3477_v57  ;;  %v3497_v35 = vsub.f32 %v3450_v19, %v3483_v26 }
 0xc9f   : > { %v3505_v0 = vmul.f32 1.442695, %v3495_v8 }
 0xca0   : > { %v3486_v49 = vpop.xlane.xlu0 %3485  ;;  %v3489_v36 = vpop.xlane.xlu1 %3488 }
 0xca1   : > { %v3498_v62 = vsub.f32 %v6644_v18, %v3486_v49  ;;  %7092 = vpow2.f32 %v3505_v0  ;;  %v3499_v54 = vsub.f32 %v3460_v3, %v3489_v36 }
 0xca3   : > { %v3511_v42 = vmul.f32 1.442695, %v3498_v62  ;;  %v3513_v13 = vmul.f32 1.442695, %v3499_v54 }
 0xca4   : > { %v8897_v27 = vpop.eup %7088  ;;  %v3492_v7 = vpop.xlane.xlu0 %3491 }
 0xca5   : > { %v3520_v59 = vsel %vm1038_vm1, %v8897_v27, 0.0  ;;  %v3500_v29 = vsub.f32 %v6647_v43, %v3492_v7  ;;  %v3824_v3 = vpop.permute.xlu1 %3823 }
 0xca6   : > { %v8901_v30 = vpop.eup %7090  ;;  %3521 = vadd.xlane.f32.xlu0 %v3520_v59  ;;  %v3507_v59 = vmul.f32 1.442695, %v3496_v22 }
 0xca7   : > { %v3517_v28 = vsel %vm1038_vm1, %v8901_v30, 0.0  ;;  %v3515_v4 = vmul.f32 1.442695, %v3500_v29 }
 0xca8   : > { %3518 = vadd.xlane.f32.xlu1 %v3517_v28  ;;  %v3509_v28 = vmul.f32 1.442695, %v3497_v35  ;;  %7094 = vpow2.f32 %v3507_v59  ;;  %v3826_v43 = vpop.permute.xlu0 %3825 }
 0xcaa   : > { %7096 = vpow2.f32 %v3509_v28 }
 0xcab   : > { %7098 = vpow2.f32 %v3511_v42 }
 0xcac   : > { %7100 = vpow2.f32 %v3513_v13 }
 0xcad   : > { %7102 = vpow2.f32 %v3515_v4 }
 0xcae   : > { %v8909_v34 = vpop.eup %7092 }
 0xcaf   : > { %v3523_v47 = vsel %vm1038_vm1, %v8909_v34, 0.0 }
 0xcb5   : > { %v8911_v15 = vpop.eup %7094 }
 0xcb6   : > { %v3526_v62 = vsel %vm1038_vm1, %v8911_v15, 0.0 }
 0xcb7   : > { %v8915_v18 = vpop.eup %7096 }
 0xcb8   : > { %v8919_v7 = vpop.eup %7098  ;;  %v3529_v13 = vsel %vm1038_vm1, %v8915_v18, 0.0 }
 0xcb9   : > { %3819 = vrot.lane.b32.xlu1 %v7931_v11, %s7442_s15  ;;  %v8923_v4 = vpop.eup %7100  ;;  %v3532_v29 = vsel %vm1038_vm1, %v8919_v7, 0.0 }
 0xcba   : > { %v8927_v54 = vpop.eup %7102  ;;  %v3535_v42 = vsel %vm1038_vm1, %v8923_v4, 0.0 }
 0xcbb   : > { %v3538_v19 = vsel %vm1038_vm1, %v8927_v54, 0.0 }
 0xcbc   : > { %3821 = vrot.lane.b32.xlu0 %v7908_v60, %s7442_s15 }
 0xcdb   : > { %3524 = vadd.xlane.f32.xlu0 %v3523_v47 }
 0xcdd   : > { %3527 = vadd.xlane.f32.xlu1 %v3526_v62 }
 0xcdf   : > { %3530 = vadd.xlane.f32.xlu0 %v3529_v13 }
 0xce1   : > { %3533 = vadd.xlane.f32.xlu1 %v3532_v29 }
 0xce3   : > { %3536 = vadd.xlane.f32.xlu0 %v3535_v42 }
 0xce5   : > { %3539 = vadd.xlane.f32.xlu1 %v3538_v19 }
 0xcf6   : > { %3815 = vrot.lane.b32.xlu1 %v7914_v61, %s7442_s15 }
 0xcf9   : > { %3817 = vrot.lane.b32.xlu0 %v7893_v53, %s7442_s15 }
 0xcfa   : > { %3793 = vrot.lane.b32.xlu1 %v7988_v23, %s7442_s15 }
 0xcfd   : > { %3791 = vrot.lane.b32.xlu0 %v7839_v12, %s7442_s15 }
 0xcfe   : > { %3797 = vrot.lane.b32.xlu1 %v7960_v17, %s7442_s15 }
 0xd01   : > { %3795 = vrot.lane.b32.xlu0 %v7994_v25, %s7442_s15 }
 0xd02   : > { %3801 = vrot.lane.b32.xlu1 %v8009_v14, %s7442_s15 }
 0xd05   : > { %3799 = vrot.lane.b32.xlu0 %v7971_v20, %s7442_s15 }
 0xd06   : > { %3805 = vrot.lane.b32.xlu1 %v7991_v24, %s7442_s15 }
 0xd09   : > { %3803 = vrot.lane.b32.xlu0 %v8012_v16, %s7442_s15 }
 0xd0a   : > { %4078 = vrot.lane.b32.xlu1 %v7867_v40, %s7442_s15 }
 0xd0d   : > { %4076 = vrot.lane.b32.xlu0 %v7875_v46, %s7442_s15 }
 0xd0e   : > { %4074 = vrot.lane.b32.xlu1 %v7882_v50, %s7442_s15 }
 0xd11   : > { %4070 = vrot.lane.b32.xlu0 %v7903_v58, %s7442_s15 }
 0xd12   : > { %4072 = vrot.lane.b32.xlu1 %v7895_v55, %s7442_s15 }
 0xd15   : > { %4066 = vrot.lane.b32.xlu0 %v7925_v10, %s7442_s15 }
 0xd16   : > { %4068 = vrot.lane.b32.xlu1 %v7916_v63, %s7442_s15 }
 0xd19   : > { %4328 = vrot.lane.b32.xlu0 %v7873_v45, %s7443_s17 }
 0xd1a   : > { %4064 = vrot.lane.b32.xlu1 %v9809_v56, %s7442_s15 }
 0xd1e   : > { %4326 = vrot.lane.b32.xlu1 %v9810_v32, %s7443_s17 }
 0xd2f   : > { %v3522_v57 = vpop.xlane.xlu0 %3521 }
 0xd30   : > { %7104 = vrcp.f32 %v3522_v57 }
 0xd31   : > { %v3519_v26 = vpop.xlane.xlu1 %3518 }
 0xd32   : > { %7106 = vrcp.f32 %v3519_v26 }
 0xd33   : > { %v3822_v45 = vpop.permute.xlu0 %3821 }
 0xd35   : > { %v3820_v32 = vpop.permute.xlu1 %3819 }
 0xd3d   : > { %v7105_v8 = vpop.eup %7104 }
 0xd3e   : > { %v3550_v0 = vmul.f32 %v7105_v8, %v8897_v27 }
 0xd3f   : > { %v7107_v49 = vpop.eup %7106 }
 0xd40   : > { %v3549_v22 = vmul.f32 %v7107_v49, %v8901_v30 }
 0xd42   : > { %6664 = vmatprep.mubr.msk.f32.mxu0 %vm1038_vm1, %v3549_v22 }
 0xd43   : > { %6665 = vmatmul.mubr.msk.f32.vlgmr.msra.gmra.mxu0 %vm1038_vm1, %v3550_v0 }
 0xd44   : > { %6677 = vmatpush3.xpose.msk.msra.mxu0 %vm884_vm0, %v8863_v21 }
 0xd45   : > { %6678 = vmatprep.subr.msk.mxu0 %vm884_vm0, %v8895_v37 }
 0xd48   : > { %6679 = vmatpush3.xpose.msk.msra.mxu0 %vm884_vm0, %v8895_v37 }
 0xd49   : > { %6680 = vmatprep.subr.msk.mxu0 %vm884_vm0, %v3826_v43 }
 0xd4c   : > { %6681 = vmatpush3.xpose.msk.msra.mxu0 %vm884_vm0, %v3826_v43 }
 0xd4d   : > { %6682 = vmatprep.subr.msk.mxu0 %vm884_vm0, %v3824_v3 }
 0xd50   : > { %6683 = vmatpush3.xpose.msk.msra.mxu0 %vm884_vm0, %v3824_v3 }
 0xd51   : > { %6684 = vmatprep.subr.msk.mxu0 %vm884_vm0, %v3822_v45 }
 0xd54   : > { %6685 = vmatpush3.xpose.msk.msra.mxu0 %vm884_vm0, %v3822_v45 }
 0xd55   : > { %6686 = vmatprep.subr.msk.mxu0 %vm884_vm0, %v3820_v32 }
 0xd58   : > { %6687 = vmatpush3.xpose.msk.msra.mxu0 %vm884_vm0, %v3820_v32 }
 0xd64   : > { %v3525_v21 = vpop.xlane.xlu0 %3524 }
 0xd65   : > { %7108 = vrcp.f32 %v3525_v21 }
 0xd66   : > { %v3528_v37 = vpop.xlane.xlu1 %3527 }
 0xd67   : > { %7110 = vrcp.f32 %v3528_v37 }
 0xd68   : > { %v3531_v27 = vpop.xlane.xlu0 %3530 }
 0xd69   : > { %7112 = vrcp.f32 %v3531_v27 }
 0xd6a   : > { %v3534_v30 = vpop.xlane.xlu1 %3533 }
 0xd6b   : > { %7114 = vrcp.f32 %v3534_v30 }
 0xd6c   : > { %v3537_v35 = vpop.xlane.xlu0 %3536 }
 0xd6d   : > { %7116 = vrcp.f32 %v3537_v35 }
 0xd6e   : > { %v3540_v36 = vpop.xlane.xlu1 %3539 }
 0xd6f   : > { %7118 = vrcp.f32 %v3540_v36 }
 0xd70   : > { %v3818_v59 = vpop.permute.xlu0 %3817 }
 0xd71   : > { %6688 = vmatprep.subr.msk.mxu0 %vm884_vm0, %v3818_v59 }
 0xd72   : > { %v7109_v28 = vpop.eup %7108  ;;  %6689 = vmatpush3.xpose.msk.msra.mxu0 %vm884_vm0, %v3818_v59  ;;  %v3816_v47 = vpop.permute.xlu1 %3815 }
 0xd73   : > { %6690 = vmatprep.subr.msk.mxu0 %vm884_vm0, %v3816_v47  ;;  %v3551_v62 = vmul.f32 %v7109_v28, %v8909_v34 }
 0xd74   : > { %v7111_v13 = vpop.eup %7110  ;;  %v3792_v29 = vpop.permute.xlu0 %3791 }
 0xd75   : > { %6667 = vmatprep.mubr.msk.f32.mxu0 %vm1038_vm1, %v3551_v62  ;;  %v3552_v42 = vmul.f32 %v7111_v13, %v8911_v15 }
 0xd76   : > { %v7113_v19 = vpop.eup %7112  ;;  %6691 = vmatpush3.xpose.msk.msra.mxu0 %vm884_vm0, %v3816_v47  ;;  %v3794_v43 = vpop.permute.xlu1 %3793 }
 0xd77   : > { %6668 = vmatmul.mubr.msk.f32.gmra.mxu0 %vm1038_vm1, %v3552_v42  ;;  %v3553_v3 = vmul.f32 %v7113_v19, %v8915_v18 }
 0xd78   : > { %v7115_v57 = vpop.eup %7114  ;;  %v3796_v26 = vpop.permute.xlu0 %3795 }
 0xd79   : > { %6670 = vmatprep.mubr.msk.f32.mxu0 %vm1038_vm1, %v3553_v3  ;;  %v3554_v34 = vmul.f32 %v7115_v57, %v8919_v7 }
 0xd7a   : > { %v7117_v8 = vpop.eup %7116  ;;  %v3798_v49 = vpop.permute.xlu1 %3797 }
 0xd7b   : > { %6671 = vmatmul.mubr.msk.f32.gmra.mxu0 %vm1038_vm1, %v3554_v34  ;;  %v3555_v15 = vmul.f32 %v7117_v8, %v8923_v4 }
 0xd7c   : > { %v7119_v22 = vpop.eup %7118  ;;  %v3800_v0 = vpop.permute.xlu0 %3799 }
 0xd7d   : > { %6673 = vmatprep.mubr.msk.f32.mxu0 %vm1038_vm1, %v3555_v15  ;;  %v3556_v45 = vmul.f32 %v7119_v22, %v8927_v54 }
 0xd7e   : > { %v3802_v32 = vpop.permute.xlu1 %3801 }
 0xd7f   : > { %6674 = vmatmul.mubr.msk.f32.gmra.mxu0 %vm1038_vm1, %v3556_v45 }
 0xd80   : > { %v3804_v18 = vpop.permute.xlu0 %3803  ;;  %6692 = vmatprep.mubr.msk.f32.mxu0 %vm884_vm0, %v3792_v29 }
 0xd82   : > { %v3806_v21 = vpop.permute.xlu1 %3805 }
 0xd83   : > { %6693 = vmatmul.mubr.msk.f32.vlgmr.msra.gmra.mxu0 %vm884_vm0, %v3794_v43 }
 0xd84   : > { %6695 = vmatprep.mubr.msk.f32.mxu0 %vm884_vm0, %v3796_v26  ;;  %v4077_v7 = vpop.permute.xlu0 %4076 }
 0xd86   : > { %v4079_v37 = vpop.permute.xlu1 %4078 }
 0xd87   : > { %6696 = vmatmul.mubr.msk.f32.gmra.mxu0 %vm884_vm0, %v3798_v49  ;;  %6704 = vmatprep.subr.mxu1 %v4079_v37 }
 0xd88   : > { %6698 = vmatprep.mubr.msk.f32.mxu0 %vm884_vm0, %v3800_v0  ;;  %6705 = vmatpush3.msra.mxu1 %v4079_v37  ;;  %v4071_v54 = vpop.permute.xlu0 %4070 }
 0xd89   : > { %6706 = vmatprep.subr.mxu1 %v4077_v7 }
 0xd8a   : > { %6707 = vmatpush3.msra.mxu1 %v4077_v7  ;;  %v4075_v4 = vpop.permute.xlu1 %4074 }
 0xd8b   : > { %6699 = vmatmul.mubr.msk.f32.gmra.mxu0 %vm884_vm0, %v3802_v32  ;;  %6708 = vmatprep.subr.mxu1 %v4075_v4 }
 0xd8c   : > { %6701 = vmatprep.mubr.msk.f32.mxu0 %vm884_vm0, %v3804_v18  ;;  %6709 = vmatpush3.msra.mxu1 %v4075_v4  ;;  %v4067_v30 = vpop.permute.xlu0 %4066 }
 0xd8e   : > { %v4073_v27 = vpop.permute.xlu1 %4072 }
 0xd8f   : > { %6702 = vmatmul.mubr.msk.f32.gmra.mxu0 %vm884_vm0, %v3806_v21  ;;  %6710 = vmatprep.subr.mxu1 %v4073_v27 }
 0xd90   : > { %6711 = vmatpush3.msra.mxu1 %v4073_v27  ;;  %v9015_v59 = vpop.permute.xlu0 %4328 }
 0xd91   : > { %6712 = vmatprep.subr.mxu1 %v4071_v54 }
 0xd92   : > { %6713 = vmatpush3.msra.mxu1 %v4071_v54  ;;  %v4069_v35 = vpop.permute.xlu1 %4068 }
 0xd93   : > { %6714 = vmatprep.subr.mxu1 %v4069_v35 }
 0xd94   : > { %6715 = vmatpush3.msra.mxu1 %v4069_v35 }
 0xd95   : > { %6716 = vmatprep.subr.mxu1 %v4067_v30 }
 0xd96   : > { %6717 = vmatpush3.msra.mxu1 %v4067_v30  ;;  %v4065_v36 = vpop.permute.xlu1 %4064 }
 0xd97   : > { %6718 = vmatprep.subr.mxu1 %v4065_v36 }
 0xd98   : > { %6719 = vmatpush3.msra.mxu1 %v4065_v36 }
 0xd99   : > { %6732 = vmatprep.subr.msk.mxu1 %vm884_vm0, %v9015_v59 }
 0xd9a   : > { %v9047_v54 = vpop.permute.xlu1 %4326 }
 0xe03   : > { %v9019_v28 = vpop.f32.mrf.mxu0 }
 0xe05   : > { %v9021_v47 = vpop.f32.mrf.mxu0 }
 0xe37   : > { %v9023_v62 = vpop.f32.mrf.mxu0 }
 0xe39   : > { %v9025_v13 = vpop.f32.mrf.mxu0 }
 0xe3b   : > { %v9027_v29 = vpop.f32.mrf.mxu0 }
 0xe3d   : > { %v9029_v42 = vpop.f32.mrf.mxu0 }
 0xe3f   : > { %v9031_v19 = vpop.f32.mrf.mxu0 }
 0xe40   : > { %9823 = vst [vmem:[#allocation50_spill] sm:$0xff] %v9031_v19 }
 0xe41   : > { %v9033_v43 = vpop.f32.mrf.mxu0 }
 0xe42   : > { %9824 = vst [vmem:[#allocation51_spill] sm:$0xff] %v9033_v43 }
 0xe43   : > { %v6694_v3 = vpop.f32.mrf.mxu0 }
 0xe44   : > { %v3971_v57 = vsel %vm1038_vm1, %v6694_v3, -inf }
 0xe45   : > { %3972 = vmax.xlane.f32.xlu1 %v3971_v57  ;;  %v3929_v26 = vpop.f32.mrf.mxu0 }
 0xe46   : > { %v3968_v34 = vsel %vm1038_vm1, %v3929_v26, -inf }
 0xe47   : > { %3969 = vmax.xlane.f32.xlu0 %v3968_v34  ;;  %v6697_v8 = vpop.f32.mrf.mxu0 }
 0xe48   : > { %v3977_v15 = vsel %vm1038_vm1, %v6697_v8, -inf }
 0xe49   : > { %v3939_v49 = vpop.f32.mrf.mxu0 }
 0xe4a   : > { %v3974_v45 = vsel %vm1038_vm1, %v3939_v49, -inf }
 0xe4b   : > { %3978 = vmax.xlane.f32.xlu0 %v3977_v15  ;;  %v6700_v22 = vpop.f32.mrf.mxu0 }
 0xe4c   : > { %v3983_v7 = vsel %vm1038_vm1, %v6700_v22, -inf }
 0xe4d   : > { %v3949_v0 = vpop.f32.mrf.mxu0 }
 0xe4e   : > { %v3980_v32 = vsel %vm1038_vm1, %v3949_v0, -inf }
 0xe4f   : > { %3975 = vmax.xlane.f32.xlu0 %v3974_v45  ;;  %3981 = vmax.xlane.f32.xlu1 %v3980_v32  ;;  %v6703_v18 = vpop.f32.mrf.mxu0 }
 0xe50   : > { %v3989_v4 = vsel %vm1038_vm1, %v6703_v18, -inf }
 0xe51   : > { %v3959_v21 = vpop.f32.mrf.mxu0 }
 0xe52   : > { %v3986_v37 = vsel %vm1038_vm1, %v3959_v21, -inf }
 0xe53   : > { %3984 = vmax.xlane.f32.xlu0 %v3983_v7  ;;  %3987 = vmax.xlane.f32.xlu1 %v3986_v37 }
 0xe57   : > { %3990 = vmax.xlane.f32.xlu0 %v3989_v4 }
 0xe64   : > { %4322 = vrot.lane.b32.xlu1 %v7888_v52, %s7443_s17 }
 0xe6d   : > { %4324 = vrot.lane.b32.xlu0 %v7871_v44, %s7443_s17 }
 0xece   : > { %v3973_v27 = vpop.xlane.xlu1 %3972 }
 0xecf   : > { %v3993_v30 = vsub.f32 %v6694_v3, %v3973_v27 }
 0xed0   : > { %v3970_v35 = vpop.xlane.xlu0 %3969 }
 0xed1   : > { %v4002_v36 = vmul.f32 1.442695, %v3993_v30  ;;  %v3992_v57 = vsub.f32 %v3929_v26, %v3970_v35 }
 0xed3   : > { %7120 = vpow2.f32 %v4002_v36  ;;  %v4000_v34 = vmul.f32 1.442695, %v3992_v57 }
 0xed4   : > { %v3979_v52 = vpop.xlane.xlu0 %3978 }
 0xed5   : > { %7122 = vpow2.f32 %v4000_v34  ;;  %v3995_v4 = vsub.f32 %v6697_v8, %v3979_v52 }
 0xed7   : > { %v4006_v36 = vmul.f32 1.442695, %v3995_v4 }
 0xed8   : > { %v3976_v3 = vpop.xlane.xlu0 %3975  ;;  %v3982_v26 = vpop.xlane.xlu1 %3981 }
 0xed9   : > { %v3994_v7 = vsub.f32 %v3939_v49, %v3976_v3  ;;  %v3996_v30 = vsub.f32 %v3949_v0, %v3982_v26 }
 0xedb   : > { %v4004_v27 = vmul.f32 1.442695, %v3994_v7 }
 0xedc   : > { %v3985_v37 = vpop.xlane.xlu0 %3984  ;;  %v3988_v35 = vpop.xlane.xlu1 %3987 }
 0xedd   : > { %v3997_v57 = vsub.f32 %v6700_v22, %v3985_v37  ;;  %7124 = vpow2.f32 %v4004_v27 }
 0xede   : > { %7126 = vpow2.f32 %v4006_v36 }
 0xedf   : > { %v4010_v43 = vmul.f32 1.442695, %v3997_v57 }
 0xee0   : > { %v9049_v15 = vpop.eup %7120  ;;  %v3991_v34 = vpop.xlane.xlu0 %3990 }
 0xee1   : > { %v4019_v45 = vsel %vm1038_vm1, %v9049_v15, 0.0 }
 0xee2   : > { %v9053_v32 = vpop.eup %7122  ;;  %4020 = vadd.xlane.f32.xlu0 %v4019_v45  ;;  %v4008_v45 = vmul.f32 1.442695, %v3996_v30 }
 0xee3   : > { %v4016_v44 = vsel %vm1038_vm1, %v9053_v32, 0.0 }
 0xee4   : > { %4017 = vadd.xlane.f32.xlu1 %v4016_v44  ;;  %v3998_v44 = vsub.f32 %v3959_v21, %v3988_v35  ;;  %7128 = vpow2.f32 %v4008_v45 }
 0xee5   : > { %7130 = vpow2.f32 %v4010_v43 }
 0xee6   : > { %v4012_v19 = vmul.f32 1.442695, %v3998_v44 }
 0xee8   : > { %7132 = vpow2.f32 %v4012_v19 }
 0xeea   : > { %v9061_v49 = vpop.eup %7124 }
 0xeeb   : > { %v9063_v8 = vpop.eup %7126  ;;  %v4022_v22 = vsel %vm1038_vm1, %v9061_v49, 0.0 }
 0xeec   : > { %v4025_v21 = vsel %vm1038_vm1, %v9063_v8, 0.0 }
 0xef1   : > { %v9067_v0 = vpop.eup %7128 }
 0xef2   : > { %v4028_v19 = vsel %vm1038_vm1, %v9067_v0, 0.0 }
 0xef5   : > { %4318 = vrot.lane.b32.xlu1 %v7931_v11, %s7443_s17  ;;  %v3999_v11 = vsub.f32 %v6703_v18, %v3991_v34  ;;  %v9071_v18 = vpop.eup %7130 }
 0xef6   : > { %v9075_v43 = vpop.eup %7132  ;;  %v4031_v52 = vsel %vm1038_vm1, %v9071_v18, 0.0 }
 0xef7   : > { %v4034_v26 = vsel %vm1038_vm1, %v9075_v43, 0.0 }
 0xef8   : > { %4320 = vrot.lane.b32.xlu0 %v7908_v60, %s7443_s17  ;;  %v4014_v60 = vmul.f32 1.442695, %v3999_v11 }
 0xefa   : > { %7134 = vpow2.f32 %v4014_v60 }
 0xf07   : > { %v9079_v3 = vpop.eup %7134 }
 0xf08   : > { %v4037_v7 = vsel %vm1038_vm1, %v9079_v3, 0.0 }
 0xf17   : > { %4023 = vadd.xlane.f32.xlu0 %v4022_v22 }
 0xf19   : > { %4026 = vadd.xlane.f32.xlu1 %v4025_v21 }
 0xf1b   : > { %4029 = vadd.xlane.f32.xlu0 %v4028_v19 }
 0xf1d   : > { %4032 = vadd.xlane.f32.xlu1 %v4031_v52 }
 0xf1f   : > { %4035 = vadd.xlane.f32.xlu0 %v4034_v26 }
 0xf21   : > { %4038 = vadd.xlane.f32.xlu1 %v4037_v7 }
 0xf32   : > { %4314 = vrot.lane.b32.xlu1 %v7914_v61, %s7443_s17 }
 0xf35   : > { %4316 = vrot.lane.b32.xlu0 %v7893_v53, %s7443_s17  ;;  %v4323_v53 = vpop.permute.xlu1 %4322 }
 0xf36   : > { %4292 = vrot.lane.b32.xlu1 %v7988_v23, %s7443_s17 }
 0xf39   : > { %4290 = vrot.lane.b32.xlu0 %v7839_v12, %s7443_s17  ;;  %v4325_v12 = vpop.permute.xlu0 %4324 }
 0xf3a   : > { %4296 = vrot.lane.b32.xlu1 %v7960_v17, %s7443_s17 }
 0xf3d   : > { %4294 = vrot.lane.b32.xlu0 %v7994_v25, %s7443_s17 }
 0xf3e   : > { %4300 = vrot.lane.b32.xlu1 %v8009_v14, %s7443_s17 }
 0xf41   : > { %4298 = vrot.lane.b32.xlu0 %v7971_v20, %s7443_s17 }
 0xf42   : > { %4304 = vrot.lane.b32.xlu1 %v7991_v24, %s7443_s17 }
 0xf45   : > { %4302 = vrot.lane.b32.xlu0 %v8012_v16, %s7443_s17 }
 0xf46   : > { %4577 = vrot.lane.b32.xlu1 %v7867_v40, %s7443_s17 }
 0xf6b   : > { %v4021_v61 = vpop.xlane.xlu0 %4020 }
 0xf6c   : > { %7136 = vrcp.f32 %v4021_v61 }
 0xf6d   : > { %v4018_v17 = vpop.xlane.xlu1 %4017 }
 0xf6e   : > { %7138 = vrcp.f32 %v4018_v17 }
 0xf6f   : > { %v4321_v40 = vpop.permute.xlu0 %4320 }
 0xf71   : > { %v4319_v24 = vpop.permute.xlu1 %4318 }
 0xf79   : > { %v7137_v23 = vpop.eup %7136 }
 0xf7a   : > { %v4049_v20 = vmul.f32 %v7137_v23, %v9049_v15 }
 0xf7b   : > { %v7139_v25 = vpop.eup %7138 }
 0xf7c   : > { %v4048_v14 = vmul.f32 %v7139_v25, %v9053_v32 }
 0xf7e   : > { %6720 = vmatprep.mubr.msk.f32.mxu1 %vm1038_vm1, %v4048_v14 }
 0xf7f   : > { %6721 = vmatmul.mubr.msk.f32.vlgmr.msra.gmra.mxu1 %vm1038_vm1, %v4049_v20 }
 0xf80   : > { %6733 = vmatpush3.xpose.msk.msra.mxu1 %vm884_vm0, %v9015_v59 }
 0xf81   : > { %6734 = vmatprep.subr.msk.mxu1 %vm884_vm0, %v9047_v54 }
 0xf84   : > { %6735 = vmatpush3.xpose.msk.msra.mxu1 %vm884_vm0, %v9047_v54 }
 0xf85   : > { %6736 = vmatprep.subr.msk.mxu1 %vm884_vm0, %v4325_v12 }
 0xf88   : > { %6737 = vmatpush3.xpose.msk.msra.mxu1 %vm884_vm0, %v4325_v12 }
 0xf89   : > { %6738 = vmatprep.subr.msk.mxu1 %vm884_vm0, %v4323_v53 }
 0xf8c   : > { %6739 = vmatpush3.xpose.msk.msra.mxu1 %vm884_vm0, %v4323_v53 }
 0xf8d   : > { %6740 = vmatprep.subr.msk.mxu1 %vm884_vm0, %v4321_v40 }
 0xf90   : > { %6741 = vmatpush3.xpose.msk.msra.mxu1 %vm884_vm0, %v4321_v40 }
 0xf91   : > { %6742 = vmatprep.subr.msk.mxu1 %vm884_vm0, %v4319_v24 }
 0xf94   : > { %6743 = vmatpush3.xpose.msk.msra.mxu1 %vm884_vm0, %v4319_v24 }
 0xfa0   : > { %v4024_v16 = vpop.xlane.xlu0 %4023 }
 0xfa1   : > { %7140 = vrcp.f32 %v4024_v16 }
 0xfa2   : > { %v4027_v59 = vpop.xlane.xlu1 %4026 }
 0xfa3   : > { %7142 = vrcp.f32 %v4027_v59 }
 0xfa4   : > { %v4030_v54 = vpop.xlane.xlu0 %4029 }
 0xfa5   : > { %7144 = vrcp.f32 %v4030_v54 }
 0xfa6   : > { %v4033_v15 = vpop.xlane.xlu1 %4032 }
 0xfa7   : > { %7146 = vrcp.f32 %v4033_v15 }
 0xfa8   : > { %v4036_v32 = vpop.xlane.xlu0 %4035 }
 0xfa9   : > { %7148 = vrcp.f32 %v4036_v32 }
 0xfaa   : > { %v4039_v37 = vpop.xlane.xlu1 %4038 }
 0xfab   : > { %7150 = vrcp.f32 %v4039_v37 }
 0xfac   : > { %v4317_v4 = vpop.permute.xlu0 %4316 }
 0xfad   : > { %6744 = vmatprep.subr.msk.mxu1 %vm884_vm0, %v4317_v4 }
 0xfae   : > { %v7141_v27 = vpop.eup %7140  ;;  %6745 = vmatpush3.xpose.msk.msra.mxu1 %vm884_vm0, %v4317_v4  ;;  %v4315_v30 = vpop.permute.xlu1 %4314 }
 0xfaf   : > { %6746 = vmatprep.subr.msk.mxu1 %vm884_vm0, %v4315_v30  ;;  %v4050_v35 = vmul.f32 %v7141_v27, %v9061_v49 }
 0xfb0   : > { %v7143_v36 = vpop.eup %7142  ;;  %v4291_v60 = vpop.permute.xlu0 %4290 }
 0xfb1   : > { %6723 = vmatprep.mubr.msk.f32.mxu1 %vm1038_vm1, %v4050_v35  ;;  %v4051_v57 = vmul.f32 %v7143_v36, %v9063_v8 }
 0xfb2   : > { %v7145_v34 = vpop.eup %7144  ;;  %6747 = vmatpush3.xpose.msk.msra.mxu1 %vm884_vm0, %v4315_v30  ;;  %v4293_v45 = vpop.permute.xlu1 %4292 }
 0xfb3   : > { %6724 = vmatmul.mubr.msk.f32.gmra.mxu1 %vm1038_vm1, %v4051_v57  ;;  %v4052_v44 = vmul.f32 %v7145_v34, %v9067_v0 }
 0xfb4   : > { %v7147_v11 = vpop.eup %7146  ;;  %v4295_v7 = vpop.permute.xlu0 %4294 }
 0xfb5   : > { %6726 = vmatprep.mubr.msk.f32.mxu1 %vm1038_vm1, %v4052_v44  ;;  %v4053_v22 = vmul.f32 %v7147_v11, %v9071_v18 }
 0xfb6   : > { %v7149_v49 = vpop.eup %7148  ;;  %v4297_v21 = vpop.permute.xlu1 %4296 }
 0xfb7   : > { %6727 = vmatmul.mubr.msk.f32.gmra.mxu1 %vm1038_vm1, %v4053_v22  ;;  %v4054_v8 = vmul.f32 %v7149_v49, %v9075_v43 }
 0xfb8   : > { %v7151_v19 = vpop.eup %7150  ;;  %v4299_v18 = vpop.permute.xlu0 %4298 }
 0xfb9   : > { %6729 = vmatprep.mubr.msk.f32.mxu1 %vm1038_vm1, %v4054_v8  ;;  %v4055_v52 = vmul.f32 %v7151_v19, %v9079_v3  ;;  %v9825_v3 = vmov 0.0  }
 0xfba   : > { %v4301_v26 = vpop.permute.xlu1 %4300 }
 0xfbb   : > { %6730 = vmatmul.mubr.msk.f32.gmra.mxu1 %vm1038_vm1, %v4055_v52 }
 0xfbc   : > { %6748 = vmatprep.mubr.msk.f32.mxu1 %vm884_vm0, %v4291_v60  ;;  %v4303_v43 = vpop.permute.xlu0 %4302 }
 0xfbe   : > { %v4305_v0 = vpop.permute.xlu1 %4304 }
 0xfbf   : > { %6749 = vmatmul.mubr.msk.f32.vlgmr.msra.gmra.mxu1 %vm884_vm0, %v4293_v45 }
 0xfc0   : > { %6751 = vmatprep.mubr.msk.f32.mxu1 %vm884_vm0, %v4295_v7 }
 0xfc2   : > { %v4578_v12 = vpop.permute.xlu1 %4577 }
 0xfc3   : > { %6752 = vmatmul.mubr.msk.f32.gmra.mxu1 %vm884_vm0, %v4297_v21  ;;  %6760 = vmatprep.subr.mxu0 %v4578_v12 }
 0xfc4   : > { %6754 = vmatprep.mubr.msk.f32.mxu1 %vm884_vm0, %v4299_v18  ;;  %6761 = vmatpush3.msra.mxu0 %v4578_v12 }
 0xfc7   : > { %6755 = vmatmul.mubr.msk.f32.gmra.mxu1 %vm884_vm0, %v4301_v26 }
 0xfc8   : > { %6757 = vmatprep.mubr.msk.f32.mxu1 %vm884_vm0, %v4303_v43 }
 0xfcb   : > { %6758 = vmatmul.mubr.msk.f32.gmra.mxu1 %vm884_vm0, %v4305_v0 }
 0xfcc   : > { %5128 = vmatprep.mubr.f32.mxu1 %v9825_v3 }
0x103f   : > { %v9150_v53 = vpop.f32.mrf.mxu1 }
0x1041   : > { %v9152_v61 = vpop.f32.mrf.mxu1 }
0x1073   : > { %v9154_v17 = vpop.f32.mrf.mxu1 }
0x1075   : > { %v9156_v23 = vpop.f32.mrf.mxu1 }
0x1077   : > { %v9158_v25 = vpop.f32.mrf.mxu1 }
0x1079   : > { %v9160_v14 = vpop.f32.mrf.mxu1 }
0x107b   : > { %v9162_v20 = vpop.f32.mrf.mxu1 }
0x107d   : > { %v9164_v40 = vpop.f32.mrf.mxu1 }
0x107f   : > { %v6750_v24 = vpop.f32.mrf.mxu1 }
0x1080   : > { %v4470_v16 = vsel %vm1038_vm1, %v6750_v24, -inf }
0x1081   : > { %4471 = vmax.xlane.f32.xlu1 %v4470_v16  ;;  %v4428_v59 = vpop.f32.mrf.mxu1 }
0x1082   : > { %v4467_v54 = vsel %vm1038_vm1, %v4428_v59, -inf }
0x1083   : > { %4468 = vmax.xlane.f32.xlu0 %v4467_v54  ;;  %v6753_v15 = vpop.f32.mrf.mxu1 }
0x1084   : > { %v4476_v32 = vsel %vm1038_vm1, %v6753_v15, -inf }
0x1085   : > { %v4438_v37 = vpop.f32.mrf.mxu1 }
0x1086   : > { %v4473_v4 = vsel %vm1038_vm1, %v4438_v37, -inf }
0x1087   : > { %4477 = vmax.xlane.f32.xlu0 %v4476_v32  ;;  %v6756_v27 = vpop.f32.mrf.mxu1 }
0x1088   : > { %v4482_v36 = vsel %vm1038_vm1, %v6756_v27, -inf }
0x1089   : > { %v4448_v30 = vpop.f32.mrf.mxu1 }
0x108a   : > { %v4479_v35 = vsel %vm1038_vm1, %v4448_v30, -inf }
0x108b   : > { %4474 = vmax.xlane.f32.xlu0 %v4473_v4  ;;  %v6759_v57 = vpop.f32.mrf.mxu1 }
0x108c   : > { %v4488_v34 = vsel %vm1038_vm1, %v6759_v57, -inf }
0x1092   : > { %4573 = vrot.lane.b32.xlu1 %v7882_v50, %s7443_s17  ;;  %v9181_v50 = vpop.f32.mrf.mxu1 }
0x10a1   : > { %4575 = vrot.lane.b32.xlu0 %v7875_v46, %s7443_s17  ;;  %v4485_v46 = vsel %vm1038_vm1, %v9181_v50, -inf }
0x10b6   : > { %4480 = vmax.xlane.f32.xlu1 %v4479_v35 }
0x10c0   : > { %4483 = vmax.xlane.f32.xlu0 %v4482_v36 }
0x10c4   : > { %4489 = vmax.xlane.f32.xlu0 %v4488_v34 }
0x10c7   : > { %4569 = vrot.lane.b32.xlu1 %v7903_v58, %s7443_s17 }
0x10da   : > { %4571 = vrot.lane.b32.xlu0 %v7895_v55, %s7443_s17 }
0x10eb   : > { %4486 = vmax.xlane.f32.xlu1 %v4485_v46 }
0x10fc   : > { %4567 = vrot.lane.b32.xlu1 %v7916_v63, %s7443_s17 }
0x110a   : > { %v4472_v45 = vpop.xlane.xlu1 %4471 }
0x110b   : > { %v4492_v44 = vsub.f32 %v6750_v24, %v4472_v45 }
0x110c   : > { %v4469_v11 = vpop.xlane.xlu0 %4468 }
0x110d   : > { %v4501_v60 = vmul.f32 1.442695, %v4492_v44  ;;  %v4491_v22 = vsub.f32 %v4428_v59, %v4469_v11 }
0x110e   : > { %v4574_v7 = vpop.permute.xlu1 %4573 }
0x110f   : > { %7152 = vpow2.f32 %v4501_v60  ;;  %v4499_v49 = vmul.f32 1.442695, %v4491_v22 }
0x1110   : > { %v4478_v58 = vpop.xlane.xlu0 %4477 }
0x1111   : > { %7154 = vpow2.f32 %v4499_v49  ;;  %v4494_v21 = vsub.f32 %v6753_v15, %v4478_v58 }
0x1113   : > { %v4505_v55 = vmul.f32 1.442695, %v4494_v21 }
0x1114   : > { %v4475_v8 = vpop.xlane.xlu0 %4474 }
0x1115   : > { %7156 = vpow2.f32 %v4505_v55  ;;  %v4493_v19 = vsub.f32 %v4438_v37, %v4475_v8 }
0x1117   : > { %v4503_v52 = vmul.f32 1.442695, %v4493_v19  ;;  %v9843_v19 = vld [vmem:[#allocation43_spill] sm:$0xff] }
0x1118   : > { %v4576_v26 = vpop.permute.xlu0 %4575 }
0x1119   : > { %7158 = vpow2.f32 %v4503_v52  ;;  %6762 = vmatprep.subr.mxu0 %v4576_v26 }
0x111a   : > { %6763 = vmatpush3.msra.mxu0 %v4576_v26 }
0x111b   : > { %6764 = vmatprep.subr.mxu0 %v4574_v7 }
0x111c   : > { %v9187_v63 = vpop.eup %7152  ;;  %6765 = vmatpush3.msra.mxu0 %v4574_v7 }
0x111d   : > { %v4518_v0 = vsel %vm1038_vm1, %v9187_v63, 0.0 }
0x111e   : > { %v9191_v18 = vpop.eup %7154  ;;  %4519 = vadd.xlane.f32.xlu0 %v4518_v0 }
0x111f   : > { %v4515_v12 = vsel %vm1038_vm1, %v9191_v18, 0.0 }
0x1120   : > { %4516 = vadd.xlane.f32.xlu1 %v4515_v12 }
0x1122   : > { %v9195_v43 = vpop.eup %7156 }
0x1123   : > { %v4524_v24 = vsel %vm1038_vm1, %v9195_v43, 0.0 }
0x1124   : > { %4525 = vadd.xlane.f32.xlu0 %v4524_v24 }
0x1126   : > { %v9199_v16 = vpop.eup %7158 }
0x1127   : > { %v4521_v59 = vsel %vm1038_vm1, %v9199_v16, 0.0 }
0x1128   : > { %4522 = vadd.xlane.f32.xlu1 %v4521_v59 }
0x113f   : > { %v4481_v54 = vpop.xlane.xlu1 %4480 }
0x1140   : > { %v4495_v15 = vsub.f32 %v4448_v30, %v4481_v54 }
0x1142   : > { %v4507_v32 = vmul.f32 1.442695, %v4495_v15 }
0x1143   : > { %v4570_v60 = vpop.permute.xlu1 %4569 }
0x1144   : > { %7160 = vpow2.f32 %v4507_v32 }
0x1149   : > { %v4484_v37 = vpop.xlane.xlu0 %4483 }
0x114a   : > { %v4496_v4 = vsub.f32 %v6756_v27, %v4484_v37 }
0x114c   : > { %v4509_v35 = vmul.f32 1.442695, %v4496_v4 }
0x114d   : > { %v4490_v36 = vpop.xlane.xlu0 %4489 }
0x114e   : > { %7162 = vpow2.f32 %v4509_v35  ;;  %v4498_v34 = vsub.f32 %v6759_v57, %v4490_v36 }
0x1150   : > { %v4513_v46 = vmul.f32 1.442695, %v4498_v34 }
0x1151   : > { %v9203_v45 = vpop.eup %7160  ;;  %v4572_v44 = vpop.permute.xlu0 %4571 }
0x1152   : > { %7164 = vpow2.f32 %v4513_v46  ;;  %6766 = vmatprep.subr.mxu0 %v4572_v44  ;;  %v4527_v11 = vsel %vm1038_vm1, %v9203_v45, 0.0 }
0x1153   : > { %6767 = vmatpush3.msra.mxu0 %v4572_v44  ;;  %4528 = vadd.xlane.f32.xlu1 %v4527_v11 }
0x1154   : > { %6768 = vmatprep.subr.mxu0 %v4570_v60 }
0x1155   : > { %6769 = vmatpush3.msra.mxu0 %v4570_v60 }
0x115b   : > { %v9207_v30 = vpop.eup %7162 }
0x115c   : > { %v4530_v27 = vsel %vm1038_vm1, %v9207_v30, 0.0 }
0x115d   : > { %4531 = vadd.xlane.f32.xlu0 %v4530_v27 }
0x115f   : > { %v9211_v57 = vpop.eup %7164 }
0x1160   : > { %v4536_v22 = vsel %vm1038_vm1, %v9211_v57, 0.0 }
0x1161   : > { %4537 = vadd.xlane.f32.xlu1 %v4536_v22 }
0x1172   : > { %4563 = vrot.lane.b32.xlu1 %v9809_v56, %s7443_s17 }
0x1174   : > { %v4487_v49 = vpop.xlane.xlu1 %4486 }
0x1175   : > { %v4497_v58 = vsub.f32 %v9181_v50, %v4487_v49  ;;  %v9842_v50 = vld [vmem:[#allocation39_spill] sm:$0xff] }
0x1176   : > { %1732 = vrot.lane.b32.xlu1 %v8547_v39, %s7443_s17 }
0x1177   : > { %v4511_v21 = vmul.f32 1.442695, %v4497_v58 }
0x1178   : > { %v4568_v55 = vpop.permute.xlu1 %4567 }
0x1179   : > { %7166 = vpow2.f32 %v4511_v21  ;;  %6770 = vmatprep.subr.mxu0 %v4568_v55 }
0x117a   : > { %2231 = vrot.lane.b32.xlu1 %v8563_v38, %s7442_s15  ;;  %6771 = vmatpush3.msra.mxu0 %v4568_v55  ;;  %v9826_v38 = vld [vmem:[#allocation31_spill] sm:$0xff] }
0x117e   : > { %2730 = vrot.lane.b32.xlu1 %v8715_v31, %s7441_s30  ;;  %v9831_v31 = vld [vmem:[#allocation34_spill] sm:$0xff] }
0x1182   : > { %3229 = vrot.lane.b32.xlu1 %v8867_v51, %s7440_s19  ;;  %v9833_v51 = vld [vmem:[#allocation38_spill] sm:$0xff] }
0x1186   : > { %v9226_v56 = vpop.eup %7166  ;;  %3728 = vrot.lane.b32.xlu1 %v9019_v28, %s7439_s14  ;;  %v9835_v28 = vld [vmem:[#allocation42_spill] sm:$0xff] }
0x1187   : > { %v4533_v39 = vsel %vm1038_vm1, %v9226_v56, 0.0 }
0x1188   : > { %4534 = vadd.xlane.f32.xlu0 %v4533_v39 }
0x118a   : > { %4227 = vrot.lane.b32.xlu1 %v9150_v53, %s7438_s25  ;;  %v9839_v53 = vld [vmem:[#allocation41_spill] sm:$0xff] }
0x118e   : > { %1736 = vrot.lane.b32.xlu1 %v8551_v41, %s7443_s17 }
0x1192   : > { %2235 = vrot.lane.b32.xlu1 %v8567_v5, %s7442_s15  ;;  %v9828_v5 = vld [vmem:[#allocation44_spill] sm:$0xff] }
0x1196   : > { %2734 = vrot.lane.b32.xlu1 %v8719_v33, %s7441_s30  ;;  %v9832_v33 = vld [vmem:[#allocation36_spill] sm:$0xff] }
0x119a   : > { %3233 = vrot.lane.b32.xlu1 %v8871_v6, %s7440_s19  ;;  %v9834_v6 = vld [vmem:[#allocation30_spill] sm:$0xff] }
0x119e   : > { %3732 = vrot.lane.b32.xlu1 %v9023_v62, %s7439_s14  ;;  %4565 = vrot.lane.b32.xlu0 %v7925_v10, %s7443_s17  ;;  %v9827_v10 = vld [vmem:[#allocation40_spill] sm:$0xff]  ;;  %v9837_v62 = vld [vmem:[#allocation33_spill] sm:$0xff] }
0x11a2   : > { %4231 = vrot.lane.b32.xlu1 %v9154_v17, %s7438_s25  ;;  %1730 = vrot.lane.b32.xlu0 %v8549_v9, %s7443_s17  ;;  %v9829_v9 = vld [vmem:[#allocation46_spill] sm:$0xff] }
0x11a6   : > { %1740 = vrot.lane.b32.xlu1 %v8555_v48, %s7443_s17  ;;  %2229 = vrot.lane.b32.xlu0 %v8565_v2, %s7442_s15 }
0x11a7   : > { %v4520_v0 = vpop.xlane.xlu0 %4519 }
0x11a9   : > { %v4517_v41 = vpop.xlane.xlu1 %4516 }
0x11aa   : > { %7168 = vrcp.f32 %v4517_v41  ;;  %2239 = vrot.lane.b32.xlu1 %v8571_v1, %s7442_s15  ;;  %2728 = vrot.lane.b32.xlu0 %v9826_v38, %s7441_s30  ;;  %v9830_v1 = vld [vmem:[#allocation32_spill] sm:$0xff] }
0x11ab   : > { %7170 = vrcp.f32 %v4520_v0  ;;  %v4775_v0 = vld [vmem:[#allocation7 + $0x50] sm:$0xff] }
0x11ad   : > { %v4526_v12 = vpop.xlane.xlu0 %4525 }
0x11ae   : > { %2738 = vrot.lane.b32.xlu1 %v9827_v10, %s7441_s30  ;;  %3227 = vrot.lane.b32.xlu0 %v9828_v5, %s7440_s19 }
0x11b1   : > { %v4523_v17 = vpop.xlane.xlu1 %4522 }
0x11b2   : > { %3237 = vrot.lane.b32.xlu1 %v9829_v9, %s7440_s19  ;;  %3726 = vrot.lane.b32.xlu0 %v9021_v47, %s7439_s14  ;;  %v9836_v47 = vld [vmem:[#allocation45_spill] sm:$0xff]  ;;  %7172 = vrcp.f32 %v4523_v17 }
0x11b3   : > { %7174 = vrcp.f32 %v4526_v12  ;;  %v4773_v12 = vld [vmem:[#allocation7 + $0x40] sm:$0xff] }
0x11b6   : > { %3736 = vrot.lane.b32.xlu1 %v9027_v29, %s7439_s14  ;;  %4225 = vrot.lane.b32.xlu0 %v9152_v61, %s7438_s25  ;;  %v9838_v29 = vld [vmem:[#allocation37_spill] sm:$0xff]  ;;  %v9840_v61 = vld [vmem:[#allocation47_spill] sm:$0xff] }
0x11b7   : > { %v7169_v48 = vpop.eup %7168 }
0x11b8   : > { %v4547_v2 = vmul.f32 %v7169_v48, %v9191_v18  ;;  %v7171_v37 = vpop.eup %7170 }
0x11b9   : > { %v4548_v34 = vmul.f32 %v7171_v37, %v9187_v63  ;;  %v4767_v37 = vld [vmem:[#allocation7 + $0x10] sm:$0xff] }
0x11ba   : > { %4235 = vrot.lane.b32.xlu1 %v9158_v25, %s7438_s25  ;;  %1734 = vrot.lane.b32.xlu0 %v9830_v1, %s7443_s17 }
0x11bb   : > { %6776 = vmatprep.mubr.msk.f32.mxu0 %vm1038_vm1, %v4547_v2 }
0x11be   : > { %1744 = vrot.lane.b32.xlu1 %v9831_v31, %s7443_s17  ;;  %2233 = vrot.lane.b32.xlu0 %v9832_v33, %s7442_s15 }
0x11bf   : > { %v7173_v35 = vpop.eup %7172 }
0x11c0   : > { %v7175_v46 = vpop.eup %7174  ;;  %v4549_v11 = vmul.f32 %v7173_v35, %v9199_v16  ;;  %v4765_v35 = vld [vmem:[#allocation7] sm:$0xff] }
0x11c1   : > { %v4550_v22 = vmul.f32 %v7175_v46, %v9195_v43  ;;  %v9844_v46 = vld [vmem:[#allocation48_spill] sm:$0xff] }
0x11c2   : > { %2243 = vrot.lane.b32.xlu1 %v9833_v51, %s7442_s15  ;;  %2732 = vrot.lane.b32.xlu0 %v9834_v6, %s7441_s30 }
0x11c6   : > { %2742 = vrot.lane.b32.xlu1 %v9835_v28, %s7441_s30  ;;  %3231 = vrot.lane.b32.xlu0 %v9836_v47, %s7440_s19 }
0x11ca   : > { %3730 = vrot.lane.b32.xlu0 %v9025_v13, %s7439_s14 }
0x11ce   : > { %4229 = vrot.lane.b32.xlu0 %v9156_v23, %s7438_s25  ;;  %v9841_v23 = vld [vmem:[#allocation35_spill] sm:$0xff] }
0x11d2   : > { %1738 = vrot.lane.b32.xlu0 %v9837_v62, %s7443_s17 }
0x11d6   : > { %2237 = vrot.lane.b32.xlu0 %v9838_v29, %s7442_s15 }
0x11da   : > { %2736 = vrot.lane.b32.xlu0 %v9839_v53, %s7441_s30 }
0x11dc   : > { %v4529_v13 = vpop.xlane.xlu1 %4528 }
0x11dd   : > { %7176 = vrcp.f32 %v4529_v13 }
0x11de   : > { %3235 = vrot.lane.b32.xlu0 %v9840_v61, %s7440_s19 }
0x11e2   : > { %3734 = vrot.lane.b32.xlu0 %v9029_v42, %s7439_s14 }
0x11e6   : > { %4233 = vrot.lane.b32.xlu0 %v9160_v14, %s7438_s25  ;;  %v4532_v59 = vpop.xlane.xlu0 %4531 }
0x11e7   : > { %7178 = vrcp.f32 %v4532_v59  ;;  %v4771_v59 = vld [vmem:[#allocation7 + $0x30] sm:$0xff] }
0x11ea   : > { %1742 = vrot.lane.b32.xlu0 %v9841_v23, %s7443_s17  ;;  %v4538_v25 = vpop.xlane.xlu1 %4537  ;;  %v7177_v60 = vpop.eup %7176  ;;  %s7356_s17 = sshll.u32 %s7444_s29, 4  ;;  %s7357_s17 = int_to_ptr.vmem [resolvable:$false] %s7356_s17 }
0x11eb   : > { %v4551_v58 = vmul.f32 %v7177_v60, %v9203_v45 }
0x11ee   : > { %2241 = vrot.lane.b32.xlu0 %v9842_v50, %s7442_s15  ;;  %v4564_v8 = vpop.permute.xlu1 %4563 }
0x11f2   : > { %2740 = vrot.lane.b32.xlu0 %v9843_v19, %s7441_s30  ;;  %v1733_v52 = vpop.permute.xlu1 %1732  ;;  %s490_s30 = sand.u32 1, %s7416_s26  }
0x11f3   : > { %1756 = vst.msk [vmem:[#allocation3 + $0x8] sm:$0xff] %vm1754_vm2, %v1733_v52  ;;  %v4780_v52 = vld [vmem:[#allocation7 + $0x78] sm:$0xff]  ;;  %s5728_s16 = sshll.u32 %s490_s30, 6 }
0x11f4   : > { %v7179_v49 = vpop.eup %7178  ;;  %s9680_s23 = scalar_lea.vmem [#allocation12], %s5728_s16  ;;  %s7358_s16 = scalar_lea.vmem %s7357_s17, 2048 }
0x11f5   : > { %v4552_v55 = vmul.f32 %v7179_v49, %v9207_v30  ;;  %v9847_v49 = vld [vmem:[#allocation51_spill] sm:$0xff]  ;;  %s5613_s24 = sshll.u32 %s9680_s23, 4  ;;  %s9702_s24 = int_to_ptr.vmem [resolvable:$true] %s5613_s24 }
0x11f6   : > { %v2232_v42 = vpop.permute.xlu1 %2231  ;;  %s7352_s15 = scalar_lea.vmem %s9702_s24, 1024  ;;  %p7359_p4 = scmp.lt.s32.totalorder %s9702_s24, %s7357_s17 }
0x11f7   : > { %2255 = vst.msk [vmem:[#allocation3 + $0x8] sm:$0xff] %vm2253_vm3, %v2232_v42  ;;  %v4779_v42 = vld [vmem:[#allocation7 + $0x70] sm:$0xff]  ;;  %p7353_p9 = scmp.ne.s32.totalorder %s9702_s24, %s7352_s15  ;;  %p7360_p7 = scmp.lt.s32.totalorder %s7358_s16, %s7352_s15 }
0x11f9   : > { %p7354_p12 = pnand %p7353_p9, %p7555_p5  ;;  %p7361_p8 = por %p7360_p7, %p7359_p4 }
0x11fa   : > { %v2731_v14 = vpop.permute.xlu1 %2730 }
0x11fb   : > { %2754 = vst.msk [vmem:[#allocation3 + $0x8] sm:$0xff] %vm2752_vm4, %v2731_v14  ;;  %v4778_v14 = vld [vmem:[#allocation7 + $0x68] sm:$0xff]  ;;  %p7355_p13 = pneg %p7354_p12 }
0x11fd   : > { %p7362_p11 = pnand %p7361_p8, %p7355_p13 }
0x11fe   : > { %v3230_v26 = vpop.permute.xlu1 %3229 }
0x11ff   : > { %3253 = vst.msk [vmem:[#allocation3 + $0x8] sm:$0xff] %vm3251_vm5, %v3230_v26  ;;  %v4777_v26 = vld [vmem:[#allocation7 + $0x60] sm:$0xff] }
0x1202   : > { %v3729_v7 = vpop.permute.xlu1 %3728 }
0x1203   : > { %3752 = vst.msk [vmem:[#allocation3 + $0x8] sm:$0xff] %vm3750_vm6, %v3729_v7  ;;  %v4776_v7 = vld [vmem:[#allocation7 + $0x58] sm:$0xff] }
0x1206   : > { %v4228_v18 = vpop.permute.xlu1 %4227 }
0x1207   : > { %4251 = vst.msk [vmem:[#allocation3 + $0x8] sm:$0xff] %vm4249_vm7, %v4228_v18  ;;  %v4774_v18 = vld [vmem:[#allocation7 + $0x48] sm:$0xff] }
0x120a   : > { %v1737_v24 = vpop.permute.xlu1 %1736 }
0x120b   : > { %1758 = vst.msk [vmem:[#allocation3 + $0x18] sm:$0xff] %vm1754_vm2, %v1737_v24  ;;  %v4772_v24 = vld [vmem:[#allocation7 + $0x38] sm:$0xff] }
0x120e   : > { %v2236_v54 = vpop.permute.xlu1 %2235 }
0x120f   : > { %2257 = vst.msk [vmem:[#allocation3 + $0x18] sm:$0xff] %vm2253_vm3, %v2236_v54  ;;  %v4770_v54 = vld [vmem:[#allocation7 + $0x28] sm:$0xff] }
0x1211   : > { %v4535_v15 = vpop.xlane.xlu0 %4534 }
0x1212   : > { %7180 = vrcp.f32 %v4535_v15  ;;  %v2735_v32 = vpop.permute.xlu1 %2734  ;;  %v4769_v15 = vld [vmem:[#allocation7 + $0x20] sm:$0xff] }
0x1213   : > { %2756 = vst.msk [vmem:[#allocation3 + $0x18] sm:$0xff] %vm2752_vm4, %v2735_v32  ;;  %7182 = vrcp.f32 %v4538_v25  ;;  %v4768_v32 = vld [vmem:[#allocation7 + $0x18] sm:$0xff] }
0x1215   : > { %v4566_v4 = vpop.permute.xlu0 %4565 }
0x1216   : > { %6772 = vmatprep.subr.mxu0 %v4566_v4  ;;  %v3234_v36 = vpop.permute.xlu1 %3233 }
0x1217   : > { %3255 = vst.msk [vmem:[#allocation3 + $0x18] sm:$0xff] %vm3251_vm5, %v3234_v36  ;;  %6773 = vmatpush3.msra.mxu0 %v4566_v4  ;;  %v4766_v4 = vld [vmem:[#allocation7 + $0x8] sm:$0xff] }
0x1218   : > { %6774 = vmatprep.subr.mxu0 %v4564_v8 }
0x1219   : > { %v1731_v44 = vpop.permute.xlu0 %1730  ;;  %6775 = vmatpush3.msra.mxu0 %v4564_v8 }
0x121a   : > { %1755 = vst.msk [vmem:[#allocation3] sm:$0xff] %vm1754_vm2, %v1731_v44  ;;  %6777 = vmatmul.mubr.msk.f32.vlgmr.msra.gmra.mxu0 %vm1038_vm1, %v4548_v34  ;;  %v3733_v27 = vpop.permute.xlu1 %3732  ;;  %6788 = vmatprep.subr.mxu0 %v4780_v52 }
0x121b   : > { %3754 = vst.msk [vmem:[#allocation3 + $0x18] sm:$0xff] %vm3750_vm6, %v3733_v27  ;;  %6779 = vmatprep.mubr.msk.f32.mxu0 %vm1038_vm1, %v4549_v11  ;;  %6789 = vmatpush3.msra.mxu0 %v4780_v52  ;;  %v9845_v11 = vld [vmem:[#allocation49_spill] sm:$0xff]  ;;  %v9846_v27 = vld [vmem:[#allocation50_spill] sm:$0xff]  ;;  %v9850_v52 = vld [vmem:[#allocation24_spill] sm:$0xff] }
0x121c   : > { %6790 = vmatprep.subr.mxu0 %v4779_v42 }
0x121d   : > { %v2230_v63 = vpop.permute.xlu0 %2229  ;;  %6791 = vmatpush3.msra.mxu0 %v4779_v42 }
0x121e   : > { %2254 = vst.msk [vmem:[#allocation3] sm:$0xff] %vm2253_vm3, %v2230_v63  ;;  %6780 = vmatmul.mubr.msk.f32.gmra.mxu0 %vm1038_vm1, %v4550_v22  ;;  %v4232_v16 = vpop.permute.xlu1 %4231  ;;  %6792 = vmatprep.subr.mxu0 %v4778_v14 }
0x121f   : > { %v7181_v21 = vpop.eup %7180  ;;  %4253 = vst.msk [vmem:[#allocation3 + $0x18] sm:$0xff] %vm4249_vm7, %v4232_v16  ;;  %6782 = vmatprep.mubr.msk.f32.mxu0 %vm1038_vm1, %v4551_v58  ;;  %6793 = vmatpush3.msra.mxu0 %v4778_v14 }
0x1220   : > { %v4553_v39 = vmul.f32 %v7181_v21, %v9226_v56  ;;  %v7183_v41 = vpop.eup %7182  ;;  %6794 = vmatprep.subr.mxu0 %v4777_v26 }
0x1221   : > { %v2729_v43 = vpop.permute.xlu0 %2728  ;;  %v4554_v38 = vmul.f32 %v7183_v41, %v9211_v57  ;;  %6795 = vmatpush3.msra.mxu0 %v4777_v26  ;;  %v9851_v26 = vld [vmem:[#allocation25_spill] sm:$0xff] }
0x1222   : > { %2753 = vst.msk [vmem:[#allocation3] sm:$0xff] %vm2752_vm4, %v2729_v43  ;;  %6783 = vmatmul.mubr.msk.f32.gmra.mxu0 %vm1038_vm1, %v4552_v55  ;;  %v1741_v45 = vpop.permute.xlu1 %1740  ;;  %6796 = vmatprep.subr.mxu0 %v4776_v7 }
0x1223   : > { %1760 = vst.msk [vmem:[#allocation3 + $0x28] sm:$0xff] %vm1754_vm2, %v1741_v45  ;;  %6785 = vmatprep.mubr.msk.f32.mxu0 %vm1038_vm1, %v4553_v39  ;;  %6797 = vmatpush3.msra.mxu0 %v4776_v7 }
0x1224   : > { %6798 = vmatprep.subr.mxu0 %v4775_v0 }
0x1225   : > { %v3228_v10 = vpop.permute.xlu0 %3227  ;;  %6799 = vmatpush3.msra.mxu0 %v4775_v0 }
0x1226   : > { %3252 = vst.msk [vmem:[#allocation3] sm:$0xff] %vm3251_vm5, %v3228_v10  ;;  %6786 = vmatmul.mubr.msk.f32.gmra.mxu0 %vm1038_vm1, %v4554_v38  ;;  %v2240_v30 = vpop.permute.xlu1 %2239  ;;  %6800 = vmatprep.subr.mxu0 %v4774_v18 }
0x1227   : > { %2259 = vst.msk [vmem:[#allocation3 + $0x28] sm:$0xff] %vm2253_vm3, %v2240_v30  ;;  %6801 = vmatpush3.msra.mxu0 %v4774_v18 }
0x1228   : > { %6802 = vmatprep.subr.mxu0 %v4773_v12 }
0x1229   : > { %v3727_v56 = vpop.permute.xlu0 %3726  ;;  %6803 = vmatpush3.msra.mxu0 %v4773_v12 }
0x122a   : > { %3751 = vst.msk [vmem:[#allocation3] sm:$0xff] %vm3750_vm6, %v3727_v56  ;;  %v2739_v5 = vpop.permute.xlu1 %2738  ;;  %6804 = vmatprep.subr.mxu0 %v4772_v24 }
0x122b   : > { %2758 = vst.msk [vmem:[#allocation3 + $0x28] sm:$0xff] %vm2752_vm4, %v2739_v5  ;;  %6805 = vmatpush3.msra.mxu0 %v4772_v24  ;;  %v9852_v24 = vld [vmem:[#allocation27_spill] sm:$0xff] }
0x122c   : > { %6806 = vmatprep.subr.mxu0 %v4771_v59 }
0x122d   : > { %v4226_v9 = vpop.permute.xlu0 %4225  ;;  %6807 = vmatpush3.msra.mxu0 %v4771_v59 }
0x122e   : > { %4250 = vst.msk [vmem:[#allocation3] sm:$0xff] %vm4249_vm7, %v4226_v9  ;;  %v3238_v48 = vpop.permute.xlu1 %3237  ;;  %6808 = vmatprep.subr.mxu0 %v4770_v54 }
0x122f   : > { %3257 = vst.msk [vmem:[#allocation3 + $0x28] sm:$0xff] %vm3251_vm5, %v3238_v48  ;;  %6809 = vmatpush3.msra.mxu0 %v4770_v54  ;;  %v9853_v54 = vld [vmem:[#allocation26_spill] sm:$0xff] }
0x1230   : > { %6810 = vmatprep.subr.mxu0 %v4769_v15 }
0x1231   : > { %v1735_v57 = vpop.permute.xlu0 %1734  ;;  %6811 = vmatpush3.msra.mxu0 %v4769_v15 }
0x1232   : > { %1757 = vst.msk [vmem:[#allocation3 + $0x10] sm:$0xff] %vm1754_vm2, %v1735_v57  ;;  %v3737_v2 = vpop.permute.xlu1 %3736  ;;  %6812 = vmatprep.subr.mxu0 %v4768_v32 }
0x1233   : > { %3756 = vst.msk [vmem:[#allocation3 + $0x28] sm:$0xff] %vm3750_vm6, %v3737_v2  ;;  %6813 = vmatpush3.msra.mxu0 %v4768_v32 }
0x1234   : > { %6814 = vmatprep.subr.mxu0 %v4767_v37 }
0x1235   : > { %v2234_v1 = vpop.permute.xlu0 %2233  ;;  %6815 = vmatpush3.msra.mxu0 %v4767_v37 }
0x1236   : > { %2256 = vst.msk [vmem:[#allocation3 + $0x10] sm:$0xff] %vm2253_vm3, %v2234_v1  ;;  %v4236_v31 = vpop.permute.xlu1 %4235  ;;  %6816 = vmatprep.subr.mxu0 %v4766_v4 }
0x1237   : > { %4255 = vst.msk [vmem:[#allocation3 + $0x28] sm:$0xff] %vm4249_vm7, %v4236_v31  ;;  %6817 = vmatpush3.msra.mxu0 %v4766_v4 }
0x1238   : > { %6818 = vmatprep.subr.mxu0 %v4765_v35 }
0x1239   : > { %v2733_v33 = vpop.permute.xlu0 %2732  ;;  %6819 = vmatpush3.msra.mxu0 %v4765_v35  ;;  %v9854_v35 = vld [vmem:[#allocation29_spill] sm:$0xff] }
0x123a   : > { %2755 = vst.msk [vmem:[#allocation3 + $0x10] sm:$0xff] %vm2752_vm4, %v2733_v33  ;;  %v1745_v51 = vpop.permute.xlu1 %1744 }
0x123b   : > { %1762 = vst.msk [vmem:[#allocation3 + $0x38] sm:$0xff] %vm1754_vm2, %v1745_v51 }
0x123d   : > { %v3232_v6 = vpop.permute.xlu0 %3231 }
0x123e   : > { %3254 = vst.msk [vmem:[#allocation3 + $0x10] sm:$0xff] %vm3251_vm5, %v3232_v6  ;;  %v2244_v28 = vpop.permute.xlu1 %2243 }
0x123f   : > { %2261 = vst.msk [vmem:[#allocation3 + $0x38] sm:$0xff] %vm2253_vm3, %v2244_v28  ;;  %v5923_v28 = vld [vmem:[%s9751_s4] ss:$0 sm:$0xff] }
0x1241   : > { %v3731_v47 = vpop.permute.xlu0 %3730 }
0x1242   : > { %3753 = vst.msk [vmem:[#allocation3 + $0x10] sm:$0xff] %vm3750_vm6, %v3731_v47  ;;  %v2743_v62 = vpop.permute.xlu1 %2742 }
0x1243   : > { %2760 = vst.msk [vmem:[#allocation3 + $0x38] sm:$0xff] %vm2752_vm4, %v2743_v62 }
0x1245   : > { %v4230_v29 = vpop.permute.xlu0 %4229 }
0x1246   : > { %4252 = vst.msk [vmem:[#allocation3 + $0x10] sm:$0xff] %vm4249_vm7, %v4230_v29 }
0x1249   : > { %v1739_v53 = vpop.permute.xlu0 %1738 }
0x124a   : > { %1759 = vst.msk [vmem:[#allocation3 + $0x20] sm:$0xff] %vm1754_vm2, %v1739_v53  ;;  %v9848_v53 = vld [vmem:[#allocation23_spill] sm:$0xff] }
0x124d   : > { %v2238_v61 = vpop.permute.xlu0 %2237 }
0x124e   : > { %2258 = vst.msk [vmem:[#allocation3 + $0x20] sm:$0xff] %vm2253_vm3, %v2238_v61 }
0x1251   : > { %v2737_v17 = vpop.permute.xlu0 %2736 }
0x1252   : > { %2757 = vst.msk [vmem:[#allocation3 + $0x20] sm:$0xff] %vm2752_vm4, %v2737_v17 }
0x1255   : > { %v3236_v13 = vpop.permute.xlu0 %3235 }
0x1256   : > { %3256 = vst.msk [vmem:[#allocation3 + $0x20] sm:$0xff] %vm3251_vm5, %v3236_v13  ;;  %v9849_v13 = vld [vmem:[#allocation22_spill] sm:$0xff] }
0x1259   : > { %v3735_v23 = vpop.permute.xlu0 %3734 }
0x125a   : > { %3755 = vst.msk [vmem:[#allocation3 + $0x20] sm:$0xff] %vm3750_vm6, %v3735_v23 }
0x125d   : > { %v4234_v25 = vpop.permute.xlu0 %4233 }
0x125e   : > { %4254 = vst.msk [vmem:[#allocation3 + $0x20] sm:$0xff] %vm4249_vm7, %v4234_v25 }
0x1261   : > { %v1743_v50 = vpop.permute.xlu0 %1742 }
0x1262   : > { %1761 = vst.msk [vmem:[#allocation3 + $0x30] sm:$0xff] %vm1754_vm2, %v1743_v50 }
0x1265   : > { %v2242_v8 = vpop.permute.xlu0 %2241 }
0x1266   : > { %2260 = vst.msk [vmem:[#allocation3 + $0x30] sm:$0xff] %vm2253_vm3, %v2242_v8 }
0x1269   : > { %v2741_v19 = vpop.permute.xlu0 %2740 }
0x126a   : > { %2759 = vst.msk [vmem:[#allocation3 + $0x30] sm:$0xff] %vm2752_vm4, %v2741_v19 }
0x12da   : > { %v6778_v36 = vpop.f32.mrf.mxu0 }
0x12db   : > { %4726 = vrot.lane.b32.xlu1 %v6778_v36, %s7437_s27 }
0x12dc   : > { %v4677_v34 = vpop.f32.mrf.mxu0 }
0x12dd   : > { %4724 = vrot.lane.b32.xlu0 %v4677_v34, %s7437_s27 }
0x12de   : > { %v6781_v44 = vpop.f32.mrf.mxu0 }
0x12df   : > { %3241 = vrot.lane.b32.xlu1 %v9844_v46, %s7440_s19  ;;  %v9855_v46 = vld [vmem:[#allocation28_spill] sm:$0xff] }
0x12e0   : > { %v4687_v60 = vpop.f32.mrf.mxu0 }
0x12e1   : > { %3239 = vrot.lane.b32.xlu0 %v9845_v11, %s7440_s19  ;;  %v5051_v11 = vld [vmem:[#allocation9 + $0xf8] sm:$0xff]  ;;  %s9707_s19 = scalar_lea.sflag [#allocation6], %s490_s30 }
0x12e2   : > { %v6784_v22 = vpop.f32.mrf.mxu0  ;;  %5064 = vmatprep.subr.mxu1 %v5051_v11  ;;  %v5020_v11 = vld [vmem:[#allocation9] sm:$0xff] }
0x12e3   : > { %4730 = vrot.lane.b32.xlu1 %v6781_v44, %s7437_s27 }
0x12e4   : > { %v4697_v63 = vpop.f32.mrf.mxu0 }
0x12e5   : > { %4728 = vrot.lane.b32.xlu0 %v4687_v60, %s7437_s27  ;;  %v5050_v60 = vld [vmem:[#allocation9 + $0xf0] sm:$0xff] }
0x12e6   : > { %v6787_v58 = vpop.f32.mrf.mxu0  ;;  %5065 = vmatpush1.msra.mxu1 %v5050_v60 }
0x12e7   : > { %3740 = vrot.lane.b32.xlu1 %v9846_v27, %s7439_s14  ;;  %v5049_v27 = vld [vmem:[#allocation9 + $0xe8] sm:$0xff] }
0x12e8   : > { %v4707_v16 = vpop.f32.mrf.mxu0  ;;  %5066 = vmatprep.subr.mxu1 %v5049_v27 }
0x12e9   : > { %3738 = vrot.lane.b32.xlu0 %v9847_v49, %s7439_s14  ;;  %v5047_v49 = vld [vmem:[#allocation9 + $0xd8] sm:$0xff]  ;;  %s9700_s14 = scalar_lea.hbm %s9760_s13, %s5935_s21 }
0x12eb   : > { %4734 = vrot.lane.b32.xlu1 %v6784_v22, %s7437_s27  ;;  %v5048_v22 = vld [vmem:[#allocation9 + $0xe0] sm:$0xff] }
0x12ec   : > { %5067 = vmatpush1.msra.mxu1 %v5048_v22 }
0x12ed   : > { %4732 = vrot.lane.b32.xlu0 %v4697_v63, %s7437_s27  ;;  %v5046_v63 = vld [vmem:[#allocation9 + $0xd0] sm:$0xff]  ;;  %5068 = vmatprep.subr.mxu1 %v5047_v49 }
0x12ee   : > { %5069 = vmatpush1.msra.mxu1 %v5046_v63 }
0x12ef   : > { %4239 = vrot.lane.b32.xlu1 %v9162_v20, %s7438_s25 }
0x12f1   : > { %4237 = vrot.lane.b32.xlu0 %v9164_v40, %s7438_s25 }
0x12f3   : > { %4738 = vrot.lane.b32.xlu1 %v6787_v58, %s7437_s27 }
0x12f5   : > { %4736 = vrot.lane.b32.xlu0 %v4707_v16, %s7437_s27 }
0x134d   : > { %v4727_v21 = vpop.permute.xlu1 %4726 }
0x134e   : > { %4750 = vst.msk [vmem:[#allocation3 + $0x8] sm:$0xff] %vm4748_vm8, %v4727_v21 }
0x134f   : > { %v4725_v55 = vpop.permute.xlu0 %4724 }
0x1350   : > { %4749 = vst.msk [vmem:[#allocation3] sm:$0xff] %vm4748_vm8, %v4725_v55 }
0x1351   : > { %v3242_v39 = vpop.permute.xlu1 %3241 }
0x1352   : > { %3259 = vst.msk [vmem:[#allocation3 + $0x38] sm:$0xff] %vm3251_vm5, %v3242_v39 }
0x1353   : > { %v3240_v20 = vpop.permute.xlu0 %3239 }
0x1354   : > { %3258 = vst.msk [vmem:[#allocation3 + $0x30] sm:$0xff] %vm3251_vm5, %v3240_v20 }
0x1355   : > { %v4731_v41 = vpop.permute.xlu1 %4730  ;;  %v4758_v45 = vld [vmem:[#allocation3 + $0x8] sm:$0xff] }
0x1356   : > { %4752 = vst.msk [vmem:[#allocation3 + $0x18] sm:$0xff] %vm4748_vm8, %v4731_v41 }
0x1357   : > { %v4729_v40 = vpop.permute.xlu0 %4728  ;;  %v4757_v43 = vld [vmem:[#allocation3] sm:$0xff] }
0x1358   : > { %4751 = vst.msk [vmem:[#allocation3 + $0x10] sm:$0xff] %vm4748_vm8, %v4729_v40  ;;  %6820 = vmatprep.mubr.f32.mxu0 %v4757_v43 }
0x1359   : > { %6821 = vmatmul.mubr.f32.vlgmr.msra.gmra.mxu0 %v4758_v45  ;;  %v3741_v38 = vpop.permute.xlu1 %3740 }
0x135a   : > { %3758 = vst.msk [vmem:[#allocation3 + $0x38] sm:$0xff] %vm3750_vm6, %v3741_v38 }
0x135b   : > { %v3739_v10 = vpop.permute.xlu0 %3738 }
0x135c   : > { %3757 = vst.msk [vmem:[#allocation3 + $0x30] sm:$0xff] %vm3750_vm6, %v3739_v10 }
0x135d   : > { %v4735_v30 = vpop.permute.xlu1 %4734  ;;  %v4760_v9 = vld [vmem:[#allocation3 + $0x18] sm:$0xff] }
0x135e   : > { %4754 = vst.msk [vmem:[#allocation3 + $0x28] sm:$0xff] %vm4748_vm8, %v4735_v30 }
0x135f   : > { %v4733_v56 = vpop.permute.xlu0 %4732  ;;  %v4759_v5 = vld [vmem:[#allocation3 + $0x10] sm:$0xff] }
0x1360   : > { %4753 = vst.msk [vmem:[#allocation3 + $0x20] sm:$0xff] %vm4748_vm8, %v4733_v56  ;;  %6823 = vmatprep.mubr.f32.mxu0 %v4759_v5 }
0x1361   : > { %6824 = vmatmul.mubr.f32.gmra.mxu0 %v4760_v9  ;;  %v4240_v48 = vpop.permute.xlu1 %4239  ;;  %v5045_v9 = vld [vmem:[#allocation9 + $0xc8] sm:$0xff] }
0x1362   : > { %4257 = vst.msk [vmem:[#allocation3 + $0x38] sm:$0xff] %vm4249_vm7, %v4240_v48  ;;  %5070 = vmatprep.subr.mxu1 %v5045_v9 }
0x1363   : > { %v4238_v57 = vpop.permute.xlu0 %4237 }
0x1364   : > { %4256 = vst.msk [vmem:[#allocation3 + $0x30] sm:$0xff] %vm4249_vm7, %v4238_v57 }
0x1365   : > { %v4739_v2 = vpop.permute.xlu1 %4738  ;;  %v4762_v33 = vld [vmem:[#allocation3 + $0x28] sm:$0xff] }
0x1366   : > { %4756 = vst.msk [vmem:[#allocation3 + $0x38] sm:$0xff] %vm4748_vm8, %v4739_v2  ;;  %v5044_v2 = vld [vmem:[#allocation9 + $0xc0] sm:$0xff] }
0x1367   : > { %v4737_v1 = vpop.permute.xlu0 %4736  ;;  %v4761_v31 = vld [vmem:[#allocation3 + $0x20] sm:$0xff]  ;;  %5071 = vmatpush1.msra.mxu1 %v5044_v2 }
0x1368   : > { %4755 = vst.msk [vmem:[#allocation3 + $0x30] sm:$0xff] %vm4748_vm8, %v4737_v1  ;;  %6826 = vmatprep.mubr.f32.mxu0 %v4761_v31 }
0x1369   : > { %6827 = vmatmul.mubr.f32.gmra.mxu0 %v4762_v33 }
0x136d   : > { %v4764_v6 = vld [vmem:[#allocation3 + $0x38] sm:$0xff] }
0x136f   : > { %v4763_v51 = vld [vmem:[#allocation3 + $0x30] sm:$0xff] }
0x1370   : > { %6829 = vmatprep.mubr.f32.mxu0 %v4763_v51  ;;  %v5043_v51 = vld [vmem:[#allocation9 + $0xb8] sm:$0xff] }
0x1371   : > { %6830 = vmatmul.mubr.f32.gmra.mxu0 %v4764_v6  ;;  %5072 = vmatprep.subr.mxu1 %v5043_v51  ;;  %v5042_v6 = vld [vmem:[#allocation9 + $0xb0] sm:$0xff] }
0x1372   : > { %5073 = vmatpush1.msra.mxu1 %v5042_v6 }
0x1419   : > { %v6822_v47 = vpop.f32.mrf.mxu0 }
0x141a   : > { %v4860_v62 = vadd.f32 %v6822_v47, %v5923_v28 }
0x141b   : > { %v4854_v29 = vpop.f32.mrf.mxu0 }
0x141c   : > { %v4894_v61 = vadd.f32 %v4860_v62, %v9848_v53  ;;  %v4855_v17 = vadd.f32 %v5923_v28, %v4854_v29  ;;  %v5041_v62 = vld [vmem:[#allocation9 + $0xa8] sm:$0xff]  ;;  %v5040_v29 = vld [vmem:[#allocation9 + $0xa0] sm:$0xff] }
0x141d   : > { %5074 = vmatprep.subr.mxu1 %v5041_v62  ;;  %v5925_v62 = vld [vmem:[%s9753_s6] ss:$0 sm:$0xff] }
0x141e   : > { %v4893_v23 = vadd.f32 %v4855_v17, %v9849_v13  ;;  %4905 = vadd.xlane.f32.xlu1 %v4894_v61  ;;  %5075 = vmatpush1.msra.mxu1 %v5040_v29  ;;  %v5039_v17 = vld [vmem:[#allocation9 + $0x98] sm:$0xff] }
0x141f   : > { %5076 = vmatprep.subr.mxu1 %v5039_v17 }
0x1420   : > { %4903 = vadd.xlane.f32.xlu0 %v4893_v23 }
0x1421   : > { %v6825_v25 = vpop.f32.mrf.mxu0 }
0x1422   : > { %v4870_v19 = vadd.f32 %v6825_v25, %v5923_v28 }
0x1423   : > { %v4864_v50 = vpop.f32.mrf.mxu0 }
0x1424   : > { %v4865_v8 = vadd.f32 %v5923_v28, %v4864_v50  ;;  %v4896_v7 = vadd.f32 %v4870_v19, %v9851_v26  ;;  %v5037_v50 = vld [vmem:[#allocation9 + $0x88] sm:$0xff]  ;;  %v5036_v19 = vld [vmem:[#allocation9 + $0x80] sm:$0xff]  ;;  %v5034_v26 = vld [vmem:[#allocation9 + $0x70] sm:$0xff] }
0x1426   : > { %v4895_v42 = vadd.f32 %v4865_v8, %v9850_v52 }
0x1428   : > { %4907 = vadd.xlane.f32.xlu0 %v4895_v42 }
0x1429   : > { %v6828_v14 = vpop.f32.mrf.mxu0 }
0x142a   : > { %v4880_v0 = vadd.f32 %v6828_v14, %v5923_v28  ;;  %v5035_v14 = vld [vmem:[#allocation9 + $0x78] sm:$0xff] }
0x142b   : > { %v4874_v18 = vpop.f32.mrf.mxu0 }
0x142c   : > { %v4875_v12 = vadd.f32 %v5923_v28, %v4874_v18  ;;  %4909 = vadd.xlane.f32.xlu0 %v4896_v7  ;;  %v4898_v59 = vadd.f32 %v4880_v0, %v9852_v24  ;;  %v5033_v18 = vld [vmem:[#allocation9 + $0x68] sm:$0xff] }
0x142e   : > { %v4897_v15 = vadd.f32 %v4875_v12, %v9853_v54  ;;  %v5032_v12 = vld [vmem:[#allocation9 + $0x60] sm:$0xff]  ;;  %v5030_v54 = vld [vmem:[#allocation9 + $0x50] sm:$0xff] }
0x1430   : > { %4913 = vadd.xlane.f32.xlu0 %v4898_v59  ;;  %4911 = vadd.xlane.f32.xlu1 %v4897_v15 }
0x1431   : > { %v6831_v32 = vpop.f32.mrf.mxu0 }
0x1432   : > { %v4890_v37 = vadd.f32 %v6831_v32, %v5923_v28  ;;  %v5028_v32 = vld [vmem:[#allocation9 + $0x40] sm:$0xff] }
0x1433   : > { %v4884_v4 = vpop.f32.mrf.mxu0 }
0x1434   : > { %v9410_v36 = vadd.f32 %v4890_v37, %v9854_v35  ;;  %v4885_v34 = vadd.f32 %v5923_v28, %v4884_v4  ;;  %v5027_v37 = vld [vmem:[#allocation9 + $0x38] sm:$0xff]  ;;  %v5026_v4 = vld [vmem:[#allocation9 + $0x30] sm:$0xff]  ;;  %v5025_v35 = vld [vmem:[#allocation9 + $0x28] sm:$0xff] }
0x1436   : > { %v9413_v44 = vadd.f32 %v4885_v34, %v9855_v46  ;;  %4917 = vadd.xlane.f32.xlu0 %v9410_v36  ;;  %v5023_v34 = vld [vmem:[#allocation9 + $0x18] sm:$0xff]  ;;  %v5022_v46 = vld [vmem:[#allocation9 + $0x10] sm:$0xff] }
0x1438   : > { %4915 = vadd.xlane.f32.xlu1 %v9413_v44 }
0x14a7   : > { %v4906_v58 = vpop.xlane.xlu1 %4905 }
0x14a8   : > { %v4921_v16 = vmul.f32 0.0078125, %v4906_v58 }
0x14a9   : > { %v4904_v21 = vpop.xlane.xlu0 %4903 }
0x14aa   : > { %v9417_v55 = vsub.f32 %v4894_v61, %v4921_v16  ;;  %v4920_v39 = vmul.f32 0.0078125, %v4904_v21 }
0x14ac   : > { %v9419_v20 = vsub.f32 %v4893_v23, %v4920_v39  ;;  %v4937_v41 = vmul.f32 %v9417_v55, %v9417_v55  ;;  %v5038_v23 = vld [vmem:[#allocation9 + $0x90] sm:$0xff] }
0x14ad   : > { %5077 = vmatpush1.msra.mxu1 %v5038_v23 }
0x14ae   : > { %4946 = vadd.xlane.f32.xlu0 %v4937_v41  ;;  %v4936_v40 = vmul.f32 %v9419_v20, %v9419_v20  ;;  %5078 = vmatprep.subr.mxu1 %v5037_v50 }
0x14af   : > { %5079 = vmatpush1.msra.mxu1 %v5036_v19 }
0x14b0   : > { %4944 = vadd.xlane.f32.xlu1 %v4936_v40  ;;  %5080 = vmatprep.subr.mxu1 %v5035_v14 }
0x14b1   : > { %v4908_v43 = vpop.xlane.xlu0 %4907  ;;  %5081 = vmatpush1.msra.mxu1 %v5034_v26 }
0x14b2   : > { %v4922_v45 = vmul.f32 0.0078125, %v4908_v43  ;;  %5082 = vmatprep.subr.mxu1 %v5033_v18 }
0x14b3   : > { %5083 = vmatpush1.msra.mxu1 %v5032_v12 }
0x14b4   : > { %v9425_v38 = vsub.f32 %v4895_v42, %v4922_v45 }
0x14b5   : > { %v4910_v10 = vpop.xlane.xlu0 %4909 }
0x14b6   : > { %v4923_v30 = vmul.f32 0.0078125, %v4910_v10  ;;  %v4938_v56 = vmul.f32 %v9425_v38, %v9425_v38 }
0x14b8   : > { %v9429_v5 = vsub.f32 %v4896_v7, %v4923_v30  ;;  %4948 = vadd.xlane.f32.xlu1 %v4938_v56 }
0x14b9   : > { %v4914_v48 = vpop.xlane.xlu0 %4913  ;;  %v4912_v57 = vpop.xlane.xlu1 %4911 }
0x14ba   : > { %v4925_v1 = vmul.f32 0.0078125, %v4914_v48  ;;  %v4924_v31 = vmul.f32 0.0078125, %v4912_v57  ;;  %v4939_v33 = vmul.f32 %v9429_v5, %v9429_v5 }
0x14bc   : > { %v9433_v28 = vsub.f32 %v4898_v59, %v4925_v1  ;;  %v9435_v47 = vsub.f32 %v4897_v15, %v4924_v31  ;;  %4950 = vadd.xlane.f32.xlu0 %v4939_v33  ;;  %v5031_v59 = vld [vmem:[#allocation9 + $0x58] sm:$0xff]  ;;  %v5029_v15 = vld [vmem:[#allocation9 + $0x48] sm:$0xff]  ;;  %v5924_v33 = vld [vmem:[%s9752_s5] ss:$0 sm:$0xff] }
0x14bd   : > { %5084 = vmatprep.subr.mxu1 %v5031_v59 }
0x14be   : > { %v4941_v53 = vmul.f32 %v9433_v28, %v9433_v28  ;;  %v4940_v61 = vmul.f32 %v9435_v47, %v9435_v47  ;;  %5085 = vmatpush1.msra.mxu1 %v5030_v54 }
0x14bf   : > { %v4918_v13 = vpop.xlane.xlu0 %4917  ;;  %5086 = vmatprep.subr.mxu1 %v5029_v15 }
0x14c0   : > { %v4927_v25 = vmul.f32 0.0078125, %v4918_v13  ;;  %4954 = vadd.xlane.f32.xlu0 %v4941_v53  ;;  %4952 = vadd.xlane.f32.xlu1 %v4940_v61 }
0x14c1   : > { %v4916_v8 = vpop.xlane.xlu1 %4915  ;;  %5087 = vmatpush1.msra.mxu1 %v5028_v32 }
0x14c2   : > { %v9442_v52 = vsub.f32 %v9410_v36, %v4927_v25  ;;  %v4926_v42 = vmul.f32 0.0078125, %v4916_v8  ;;  %5088 = vmatprep.subr.mxu1 %v5027_v37  ;;  %v5024_v36 = vld [vmem:[#allocation9 + $0x20] sm:$0xff] }
0x14c3   : > { %5089 = vmatpush1.msra.mxu1 %v5026_v4 }
0x14c4   : > { %v9445_v7 = vsub.f32 %v9413_v44, %v4926_v42  ;;  %v4943_v0 = vmul.f32 %v9442_v52, %v9442_v52  ;;  %5090 = vmatprep.subr.mxu1 %v5025_v35  ;;  %v5021_v44 = vld [vmem:[#allocation9 + $0x8] sm:$0xff] }
0x14c5   : > { %5091 = vmatpush1.msra.mxu1 %v5024_v36 }
0x14c6   : > { %4958 = vadd.xlane.f32.xlu0 %v4943_v0  ;;  %v4942_v24 = vmul.f32 %v9445_v7, %v9445_v7  ;;  %5092 = vmatprep.subr.mxu1 %v5023_v34 }
0x14c7   : > { %5093 = vmatpush1.msra.mxu1 %v5022_v46  ;;  %v5336_v46 = vld [vmem:[#allocation10 + $0x78] sm:$0xff] }
0x14c8   : > { %4956 = vadd.xlane.f32.xlu1 %v4942_v24  ;;  %5094 = vmatprep.subr.mxu1 %v5021_v44  ;;  %v5335_v44 = vld [vmem:[#allocation10 + $0x70] sm:$0xff] }
0x14c9   : > { %5095 = vmatpush1.msra.mxu1 %v5020_v11  ;;  %v5350_v11 = vld [vmem:[#allocation10 + $0xe8] sm:$0xff] }
0x1537   : > { %v4947_v60 = vpop.xlane.xlu0 %4946 }
0x1538   : > { %v4961_v27 = vmul.f32 0.0078125, %v4947_v60  ;;  %v5334_v60 = vld [vmem:[#allocation10 + $0x68] sm:$0xff] }
0x1539   : > { %v4945_v22 = vpop.xlane.xlu1 %4944 }
0x153a   : > { %v4969_v49 = vadd.f32 1e-05, %v4961_v27  ;;  %v4960_v63 = vmul.f32 0.0078125, %v4945_v22  ;;  %v5349_v27 = vld [vmem:[#allocation10 + $0xe0] sm:$0xff] }
0x153b   : > { %v5333_v22 = vld [vmem:[#allocation10 + $0x60] sm:$0xff] }
0x153c   : > { %7184 = vrsqrt.f32 %v4969_v49  ;;  %v4968_v58 = vadd.f32 1e-05, %v4960_v63  ;;  %v5332_v49 = vld [vmem:[#allocation10 + $0x58] sm:$0xff]  ;;  %v5347_v63 = vld [vmem:[#allocation10 + $0xd0] sm:$0xff] }
0x153e   : > { %7186 = vrsqrt.f32 %v4968_v58  ;;  %v5331_v58 = vld [vmem:[#allocation10 + $0x50] sm:$0xff] }
0x1541   : > { %v4949_v16 = vpop.xlane.xlu1 %4948 }
0x1542   : > { %v4962_v21 = vmul.f32 0.0078125, %v4949_v16  ;;  %v5346_v16 = vld [vmem:[#allocation10 + $0xc8] sm:$0xff] }
0x1544   : > { %v4970_v39 = vadd.f32 1e-05, %v4962_v21  ;;  %v5330_v21 = vld [vmem:[#allocation10 + $0x48] sm:$0xff] }
0x1545   : > { %v4951_v41 = vpop.xlane.xlu0 %4950 }
0x1546   : > { %7188 = vrsqrt.f32 %v4970_v39  ;;  %v4963_v40 = vmul.f32 0.0078125, %v4951_v41  ;;  %v5345_v39 = vld [vmem:[#allocation10 + $0xc0] sm:$0xff] }
0x1547   : > { %v5329_v41 = vld [vmem:[#allocation10 + $0x40] sm:$0xff] }
0x1548   : > { %v4971_v43 = vadd.f32 1e-05, %v4963_v40  ;;  %v5344_v40 = vld [vmem:[#allocation10 + $0xb8] sm:$0xff] }
0x1549   : > { %v7185_v45 = vpop.eup %7184  ;;  %v4955_v10 = vpop.xlane.xlu0 %4954 }
0x154a   : > { %v4953_v30 = vpop.xlane.xlu1 %4952  ;;  %7190 = vrsqrt.f32 %v4971_v43  ;;  %v4965_v56 = vmul.f32 0.0078125, %v4955_v10  ;;  %v4985_v31 = vmul.f32 %v7185_v45, %v9417_v55  ;;  %v5328_v43 = vld [vmem:[#allocation10 + $0x38] sm:$0xff]  ;;  %v5343_v45 = vld [vmem:[#allocation10 + $0xb0] sm:$0xff] }
0x154b   : > { %v4964_v9 = vmul.f32 0.0078125, %v4953_v30  ;;  %v7187_v48 = vpop.eup %7186  ;;  %v5327_v10 = vld [vmem:[#allocation10 + $0x30] sm:$0xff]  ;;  %v5342_v30 = vld [vmem:[#allocation10 + $0xa8] sm:$0xff] }
0x154c   : > { %v4984_v57 = vmul.f32 %v7187_v48, %v9419_v20  ;;  %v4973_v2 = vadd.f32 1e-05, %v4965_v56  ;;  %v4999_v20 = vmul.f32 %v5924_v33, %v4985_v31  ;;  %v5326_v56 = vld [vmem:[#allocation10 + $0x28] sm:$0xff]  ;;  %v5325_v48 = vld [vmem:[#allocation10 + $0x20] sm:$0xff]  ;;  %v5323_v31 = vld [vmem:[#allocation10 + $0x10] sm:$0xff] }
0x154d   : > { %v4972_v1 = vadd.f32 1e-05, %v4964_v9  ;;  %v5341_v9 = vld [vmem:[#allocation10 + $0xa0] sm:$0xff] }
0x154e   : > { %7192 = vrsqrt.f32 %v4973_v2  ;;  %v4998_v51 = vmul.f32 %v5924_v33, %v4984_v57  ;;  %v9463_v25 = vadd.f32 %v5925_v62, %v4999_v20  ;;  %v5340_v57 = vld [vmem:[#allocation10 + $0x98] sm:$0xff] }
0x154f   : > { %7194 = vrsqrt.f32 %v4972_v1  ;;  %v4959_v6 = vpop.xlane.xlu0 %4958  ;;  %v5324_v2 = vld [vmem:[#allocation10 + $0x18] sm:$0xff]  ;;  %v5339_v1 = vld [vmem:[#allocation10 + $0x90] sm:$0xff] }
0x1550   : > { %v4967_v29 = vmul.f32 0.0078125, %v4959_v6  ;;  %v9459_v53 = vadd.f32 %v5925_v62, %v4998_v51  ;;  %v5322_v51 = vld [vmem:[#allocation10 + $0x8] sm:$0xff]  ;;  %v5337_v6 = vld [vmem:[#allocation10 + $0x80] sm:$0xff] }
0x1551   : > { %v4957_v61 = vpop.xlane.xlu1 %4956 }
0x1552   : > { %v4975_v17 = vadd.f32 1e-05, %v4967_v29  ;;  %v4966_v13 = vmul.f32 0.0078125, %v4957_v61  ;;  %5129 = vmatmul.mubr.f32.vlgmr.msra.gmra.mxu1 %v9459_v53  ;;  %v5054_v29 = vlaneseq }
0x1553   : > { %v7189_v55 = vpop.eup %7188  ;;  %5134 = vmatprep.mubr.f32.mxu1 %v9825_v3 }
0x1554   : > { %v4974_v23 = vadd.f32 1e-05, %v4966_v13  ;;  %v4986_v50 = vmul.f32 %v7189_v55, %v9425_v38  ;;  %7196 = vrsqrt.f32 %v4975_v17  ;;  %v5055_v20 = vshrl.u32 %v5054_v29, 7  ;;  %v5052_v17 = vld [vmem:[%s9755_s8] sm:$0x3] }
0x1556   : > { %7198 = vrsqrt.f32 %v4974_v23  ;;  %5135 = vmatmul.mubr.f32.gmra.mxu1 %v9463_v25  ;;  %v5000_v8 = vmul.f32 %v5924_v33, %v4986_v50  ;;  %v5056_v61 = vsub.s32 0, %v5055_v20  ;;  %v5060_v13 = vsub.s32 1, %v5055_v20 }
0x1557   : > { %v7191_v19 = vpop.eup %7190  ;;  %5140 = vmatprep.mubr.f32.mxu1 %v9825_v3 }
0x1558   : > { %v9468_v42 = vadd.f32 %v5925_v62, %v5000_v8  ;;  %v4987_v14 = vmul.f32 %v7191_v19, %v9429_v5  ;;  %v9499_v55 = vrot.slane %v5052_v17, %v5056_v61  ;;  %v9501_v23 = vrot.slane %v5052_v17, %v5060_v13 }
0x155a   : > { %5141 = vmatmul.mubr.f32.gmra.mxu1 %v9468_v42  ;;  %v5001_v26 = vmul.f32 %v5924_v33, %v4987_v14 }
0x155b   : > { %v7193_v0 = vpop.eup %7192  ;;  %5146 = vmatprep.mubr.f32.mxu1 %v9825_v3 }
0x155c   : > { %v7195_v18 = vpop.eup %7194  ;;  %v9473_v38 = vadd.f32 %v5925_v62, %v5001_v26  ;;  %v4989_v24 = vmul.f32 %v7193_v0, %v9433_v28 }
0x155d   : > { %v4988_v12 = vmul.f32 %v7195_v18, %v9435_v47 }
0x155e   : > { %5147 = vmatmul.mubr.f32.gmra.mxu1 %v9473_v38  ;;  %v5003_v5 = vmul.f32 %v5924_v33, %v4989_v24 }
0x155f   : > { %5152 = vmatprep.mubr.f32.mxu1 %v9825_v3  ;;  %v5002_v59 = vmul.f32 %v5924_v33, %v4988_v12 }
0x1560   : > { %v9484_v4 = vadd.f32 %v5925_v62, %v5003_v5 }
0x1561   : > { %v9479_v54 = vadd.f32 %v5925_v62, %v5002_v59  ;;  %v7197_v15 = vpop.eup %7196 }
0x1562   : > { %v4991_v28 = vmul.f32 %v7197_v15, %v9442_v52  ;;  %v5351_v52 = vld [vmem:[#allocation10 + $0xf0] sm:$0xff] }
0x1563   : > { %v7199_v32 = vpop.eup %7198  ;;  %5153 = vmatmul.mubr.f32.gmra.mxu1 %v9479_v54 }
0x1564   : > { %5158 = vmatprep.mubr.f32.mxu1 %v9825_v3  ;;  %v4990_v37 = vmul.f32 %v7199_v32, %v9445_v7  ;;  %v5005_v36 = vmul.f32 %v5924_v33, %v4991_v28  ;;  %v5352_v7 = vld [vmem:[#allocation10 + $0xf8] sm:$0xff] }
0x1565   : > { %6240 = vmatprep.subr.mxu0 %v5352_v7 }
0x1566   : > { %v5004_v47 = vmul.f32 %v5924_v33, %v4990_v37  ;;  %v9493_v34 = vadd.f32 %v5925_v62, %v5005_v36  ;;  %6241 = vmatpush3.msra.mxu0 %v5336_v46  ;;  %v5338_v33 = vld [vmem:[#allocation10 + $0x88] sm:$0xff] }
0x1567   : > { %5159 = vmatmul.mubr.f32.gmra.mxu1 %v9484_v4  ;;  %6242 = vmatprep.subr.mxu0 %v5351_v52 }
0x1568   : > { %5164 = vmatprep.mubr.f32.mxu1 %v9825_v3  ;;  %v9489_v35 = vadd.f32 %v5925_v62, %v5004_v47  ;;  %6243 = vmatpush3.msra.mxu0 %v5335_v44  ;;  %v5321_v62 = vld [vmem:[#allocation10] sm:$0xff] }
0x1569   : > { %6244 = vmatprep.subr.mxu0 %v5350_v11 }
0x156a   : > { %6245 = vmatpush3.msra.mxu0 %v5334_v60 }
0x156b   : > { %5165 = vmatmul.mubr.f32.gmra.mxu1 %v9489_v35  ;;  %6246 = vmatprep.subr.mxu0 %v5349_v27 }
0x156c   : > { %5170 = vmatprep.mubr.f32.mxu1 %v9825_v3  ;;  %6247 = vmatpush3.msra.mxu0 %v5333_v22  ;;  %v5348_v3 = vld [vmem:[#allocation10 + $0xd8] sm:$0xff] }
0x156d   : > { %6248 = vmatprep.subr.mxu0 %v5348_v3 }
0x156e   : > { %6249 = vmatpush3.msra.mxu0 %v5332_v49 }
0x156f   : > { %5171 = vmatmul.mubr.f32.gmra.mxu1 %v9493_v34  ;;  %6250 = vmatprep.subr.mxu0 %v5347_v63 }
0x1570   : > { %6251 = vmatpush3.msra.mxu0 %v5331_v58 }
0x1571   : > { %6252 = vmatprep.subr.mxu0 %v5346_v16 }
0x1572   : > { %6253 = vmatpush3.msra.mxu0 %v5330_v21 }
0x1573   : > { %6254 = vmatprep.subr.mxu0 %v5345_v39 }
0x1574   : > { %6255 = vmatpush3.msra.mxu0 %v5329_v41 }
0x1575   : > { %6256 = vmatprep.subr.mxu0 %v5344_v40 }
0x1576   : > { %6257 = vmatpush3.msra.mxu0 %v5328_v43 }
0x1577   : > { %6258 = vmatprep.subr.mxu0 %v5343_v45 }
0x1578   : > { %6259 = vmatpush3.msra.mxu0 %v5327_v10 }
0x1579   : > { %6260 = vmatprep.subr.mxu0 %v5342_v30 }
0x157a   : > { %6261 = vmatpush3.msra.mxu0 %v5326_v56 }
0x157b   : > { %6262 = vmatprep.subr.mxu0 %v5341_v9 }
0x157c   : > { %6263 = vmatpush3.msra.mxu0 %v5325_v48 }
0x157d   : > { %6264 = vmatprep.subr.mxu0 %v5340_v57 }
0x157e   : > { %6265 = vmatpush3.msra.mxu0 %v5324_v2 }
0x157f   : > { %6266 = vmatprep.subr.mxu0 %v5339_v1 }
0x1580   : > { %6267 = vmatpush3.msra.mxu0 %v5323_v31 }
0x1581   : > { %6268 = vmatprep.subr.mxu0 %v5338_v33 }
0x1582   : > { %6269 = vmatpush3.msra.mxu0 %v5322_v51 }
0x1583   : > { %6270 = vmatprep.subr.mxu0 %v5337_v6 }
0x1584   : > { %6271 = vmatpush3.msra.mxu0 %v5321_v62 }
0x1612   : > { %v5130_v50 = vpop.f32.mrf.mxu1 }
0x1613   : > { %v9504_v8 = vadd.f32 %v5130_v50, %v9499_v55 }
0x1614   : > { %v5132_v19 = vpop.f32.mrf.mxu1 }
0x1615   : > { %v5193_v14 = vmul.f32 0.044715, %v9504_v8  ;;  %v9508_v26 = vadd.f32 %v5132_v19, %v9501_v23 }
0x1616   : > { %v5136_v0 = vpop.f32.mrf.mxu1 }
0x1617   : > { %v5209_v18 = vmul.f32 %v5193_v14, %v9504_v8  ;;  %v5194_v12 = vmul.f32 0.044715, %v9508_v26  ;;  %v9513_v24 = vadd.f32 %v5136_v0, %v9499_v55 }
0x1618   : > { %v5138_v59 = vpop.f32.mrf.mxu1 }
0x1619   : > { %v5225_v5 = vmul.f32 %v5209_v18, %v9504_v8  ;;  %v5210_v15 = vmul.f32 %v5194_v12, %v9508_v26  ;;  %v5195_v32 = vmul.f32 0.044715, %v9513_v24  ;;  %v9519_v37 = vadd.f32 %v5138_v59, %v9501_v23 }
0x161a   : > { %v5142_v28 = vpop.f32.mrf.mxu1 }
0x161b   : > { %v5241_v47 = vadd.f32 %v5225_v5, %v9504_v8  ;;  %v5211_v36 = vmul.f32 %v5195_v32, %v9513_v24  ;;  %v5196_v7 = vmul.f32 0.044715, %v9519_v37  ;;  %v9525_v46 = vadd.f32 %v5142_v28, %v9499_v55 }
0x161c   : > { %v5144_v52 = vpop.f32.mrf.mxu1  ;;  %v5226_v44 = vmul.f32 %v5210_v15, %v9508_v26 }
0x161d   : > { %v5257_v11 = vmul.f32 0.7978846, %v5241_v47  ;;  %v5212_v60 = vmul.f32 %v5196_v7, %v9519_v37  ;;  %v5197_v27 = vmul.f32 0.044715, %v9525_v46  ;;  %v9531_v22 = vadd.f32 %v5144_v52, %v9501_v23 }
0x161e   : > { %v5148_v3 = vpop.f32.mrf.mxu1  ;;  %v5242_v49 = vadd.f32 %v5226_v44, %v9508_v26  ;;  %v5227_v63 = vmul.f32 %v5211_v36, %v9513_v24 }
0x161f   : > { %7200 = vtanh.f32 %v5257_v11  ;;  %v5213_v58 = vmul.f32 %v5197_v27, %v9525_v46  ;;  %v5198_v16 = vmul.f32 0.044715, %v9531_v22  ;;  %v9538_v21 = vadd.f32 %v5148_v3, %v9499_v55 }
0x1620   : > { %v5150_v39 = vpop.f32.mrf.mxu1  ;;  %v5258_v41 = vmul.f32 0.7978846, %v5242_v49  ;;  %v5228_v40 = vmul.f32 %v5212_v60, %v9519_v37  ;;  %v5243_v43 = vadd.f32 %v5227_v63, %v9513_v24 }
0x1621   : > { %v5214_v45 = vmul.f32 %v5198_v16, %v9531_v22  ;;  %v5199_v10 = vmul.f32 0.044715, %v9538_v21  ;;  %v9545_v30 = vadd.f32 %v5150_v39, %v9501_v23  ;;  %v5229_v56 = vmul.f32 %v5213_v58, %v9525_v46 }
0x1622   : > { %7202 = vtanh.f32 %v5258_v41  ;;  %v5244_v9 = vadd.f32 %v5228_v40, %v9519_v37  ;;  %v5259_v48 = vmul.f32 0.7978846, %v5243_v43  ;;  %v5177_v58 = vmul.f32 0.5, %v9504_v8 }
0x1623   : > { %v5215_v57 = vmul.f32 %v5199_v10, %v9538_v21  ;;  %v5200_v2 = vmul.f32 0.044715, %v9545_v30  ;;  %v5154_v1 = vpop.f32.mrf.mxu1  ;;  %v5230_v31 = vmul.f32 %v5214_v45, %v9531_v22  ;;  %v5245_v33 = vadd.f32 %v5229_v56, %v9525_v46 }
0x1624   : > { %v9554_v51 = vadd.f32 %v5154_v1, %v9499_v55  ;;  %v5260_v6 = vmul.f32 0.7978846, %v5244_v9  ;;  %7204 = vtanh.f32 %v5259_v48  ;;  %v5178_v48 = vmul.f32 0.5, %v9508_v26 }
0x1625   : > { %v5216_v62 = vmul.f32 %v5200_v2, %v9545_v30  ;;  %v5156_v29 = vpop.f32.mrf.mxu1  ;;  %v5246_v20 = vadd.f32 %v5230_v31, %v9531_v22  ;;  %v5261_v61 = vmul.f32 0.7978846, %v5245_v33  ;;  %v5231_v17 = vmul.f32 %v5215_v57, %v9538_v21 }
0x1626   : > { %v5201_v13 = vmul.f32 0.044715, %v9554_v51  ;;  %v9561_v50 = vadd.f32 %v5156_v29, %v9501_v23  ;;  %7206 = vtanh.f32 %v5260_v6 }
0x1627   : > { %v5160_v19 = vpop.f32.mrf.mxu1  ;;  %v5262_v14 = vmul.f32 0.7978846, %v5246_v20  ;;  %7208 = vtanh.f32 %v5261_v61  ;;  %v5232_v0 = vmul.f32 %v5216_v62, %v9545_v30  ;;  %v5247_v18 = vadd.f32 %v5231_v17, %v9538_v21 }
0x1628   : > { %v5217_v12 = vmul.f32 %v5201_v13, %v9554_v51  ;;  %v5202_v59 = vmul.f32 0.044715, %v9561_v50  ;;  %v9568_v5 = vadd.f32 %v5160_v19, %v9499_v55 }
0x1629   : > { %v5162_v15 = vpop.f32.mrf.mxu1  ;;  %7210 = vtanh.f32 %v5262_v14  ;;  %v5248_v32 = vadd.f32 %v5232_v0, %v9545_v30  ;;  %v5263_v28 = vmul.f32 0.7978846, %v5247_v18 }
0x162a   : > { %v5218_v47 = vmul.f32 %v5202_v59, %v9561_v50  ;;  %v5203_v36 = vmul.f32 0.044715, %v9568_v5  ;;  %v9574_v7 = vadd.f32 %v5162_v15, %v9501_v23  ;;  %v5233_v52 = vmul.f32 %v5217_v12, %v9554_v51 }
0x162b   : > { %v5166_v44 = vpop.f32.mrf.mxu1  ;;  %v5264_v11 = vmul.f32 0.7978846, %v5248_v32  ;;  %7212 = vtanh.f32 %v5263_v28  ;;  %v5180_v32 = vmul.f32 0.5, %v9519_v37 }
0x162c   : > { %v7201_v60 = vpop.eup %7200  ;;  %v5219_v27 = vmul.f32 %v5203_v36, %v9568_v5  ;;  %v5204_v3 = vmul.f32 0.044715, %v9574_v7  ;;  %v9580_v49 = vadd.f32 %v5166_v44, %v9499_v55  ;;  %v5234_v63 = vmul.f32 %v5218_v47, %v9561_v50 }
0x162d   : > { %v5168_v16 = vpop.f32.mrf.mxu1  ;;  %v5289_v39 = vadd.f32 1.0, %v7201_v60  ;;  %7214 = vtanh.f32 %v5264_v11  ;;  %v5249_v41 = vadd.f32 %v5233_v52, %v9554_v51  ;;  %v5179_v47 = vmul.f32 0.5, %v9513_v24 }
0x162e   : > { %v5220_v40 = vmul.f32 %v5204_v3, %v9574_v7  ;;  %v5205_v43 = vmul.f32 0.044715, %v9580_v49  ;;  %v9588_v45 = vadd.f32 %v5168_v16, %v9501_v23  ;;  %v5250_v10 = vadd.f32 %v5234_v63, %v9561_v50 }
0x162f   : > { %v7203_v56 = vpop.eup %7202  ;;  %v5172_v9 = vpop.f32.mrf.mxu1  ;;  %v5305_v57 = vmul.f32 %v5289_v39, %v5177_v58  ;;  %v5265_v8 = vmul.f32 0.7978846, %v5249_v41  ;;  %v5235_v2 = vmul.f32 %v5219_v27, %v9568_v5 }
0x1630   : > { %v5221_v1 = vmul.f32 %v5205_v43, %v9580_v49  ;;  %v5206_v31 = vmul.f32 0.044715, %v9588_v45  ;;  %v9596_v33 = vadd.f32 %v5172_v9, %v9499_v55  ;;  %v5290_v6 = vadd.f32 1.0, %v7203_v56 }
0x1631   : > { %v7205_v62 = vpop.eup %7204  ;;  %v5174_v29 = vpop.f32.mrf.mxu1  ;;  %v5266_v20 = vmul.f32 0.7978846, %v5250_v10  ;;  %7216 = vtanh.f32 %v5265_v8  ;;  %v5236_v61 = vmul.f32 %v5220_v40, %v9574_v7  ;;  %v5251_v26 = vadd.f32 %v5235_v2, %v9568_v5 }
0x1632   : > { %v5222_v17 = vmul.f32 %v5206_v31, %v9588_v45  ;;  %v5207_v13 = vmul.f32 0.044715, %v9596_v33  ;;  %v9603_v19 = vadd.f32 %v5174_v29, %v9501_v23  ;;  %v5306_v14 = vmul.f32 %v5290_v6, %v5178_v48 }
0x1633   : > { %v7207_v0 = vpop.eup %7206  ;;  %v5291_v55 = vadd.f32 1.0, %v7205_v62  ;;  %7218 = vtanh.f32 %v5266_v20  ;;  %v5252_v18 = vadd.f32 %v5236_v61, %v9574_v7  ;;  %v5267_v12 = vmul.f32 0.7978846, %v5251_v26 }
0x1634   : > { %v7209_v59 = vpop.eup %7208  ;;  %v5208_v15 = vmul.f32 0.044715, %v9603_v19  ;;  %5424 = vmatprep.mubr.f32.mxu0 %v5306_v14  ;;  %v5292_v28 = vadd.f32 1.0, %v7207_v0  ;;  %v5223_v36 = vmul.f32 %v5207_v13, %v9596_v33  ;;  %v5182_v23 = vmul.f32 0.5, %v9531_v22 }
0x1635   : > { %5425 = vmatmul.mubr.f32.vlgmr.msra.gmra.mxu0 %v5305_v57  ;;  %v5268_v52 = vmul.f32 0.7978846, %v5252_v18  ;;  %7220 = vtanh.f32 %v5267_v12  ;;  %v5238_v27 = vmul.f32 %v5222_v17, %v9588_v45  ;;  %v5237_v3 = vmul.f32 %v5221_v1, %v9580_v49 }
0x1636   : > { %v7211_v44 = vpop.eup %7210  ;;  %v5224_v11 = vmul.f32 %v5208_v15, %v9603_v19  ;;  %v5308_v60 = vmul.f32 %v5292_v28, %v5180_v32  ;;  %v5307_v63 = vmul.f32 %v5291_v55, %v5179_v47  ;;  %v5293_v58 = vadd.f32 1.0, %v7209_v59 }
0x1637   : > { %v5294_v37 = vadd.f32 1.0, %v7211_v44  ;;  %7222 = vtanh.f32 %v5268_v52  ;;  %v5254_v16 = vadd.f32 %v5238_v27, %v9588_v45  ;;  %v5253_v22 = vadd.f32 %v5237_v3, %v9580_v49 }
0x1638   : > { %v7213_v24 = vpop.eup %7212  ;;  %5429 = vmatprep.mubr.f32.mxu0 %v5308_v60  ;;  %v5240_v39 = vmul.f32 %v5224_v11, %v9603_v19  ;;  %v5181_v40 = vmul.f32 0.5, %v9525_v46  ;;  %v5239_v43 = vmul.f32 %v5223_v36, %v9596_v33  ;;  %v5184_v56 = vmul.f32 0.5, %v9545_v30 }
0x1639   : > { %5430 = vmatmul.mubr.f32.gmra.mxu0 %v5307_v63  ;;  %v5310_v41 = vmul.f32 %v5294_v37, %v5182_v23  ;;  %v5270_v9 = vmul.f32 0.7978846, %v5254_v16  ;;  %v5269_v48 = vmul.f32 0.7978846, %v5253_v22  ;;  %v5295_v1 = vadd.f32 1.0, %v7213_v24 }
0x163a   : > { %v7215_v10 = vpop.eup %7214  ;;  %v5256_v57 = vadd.f32 %v5240_v39, %v9603_v19  ;;  %v5309_v8 = vmul.f32 %v5293_v58, %v5181_v40  ;;  %v5255_v31 = vadd.f32 %v5239_v43, %v9596_v33  ;;  %v5183_v46 = vmul.f32 0.5, %v9538_v21 }
0x163b   : > { %5434 = vmatprep.mubr.f32.mxu0 %v5310_v41  ;;  %v5296_v2 = vadd.f32 1.0, %v7215_v10  ;;  %7224 = vtanh.f32 %v5270_v9  ;;  %v5186_v17 = vmul.f32 0.5, %v9561_v50  ;;  %v5185_v0 = vmul.f32 0.5, %v9554_v51 }
0x163c   : > { %v5272_v6 = vmul.f32 0.7978846, %v5256_v57  ;;  %7226 = vtanh.f32 %v5269_v48  ;;  %v5271_v29 = vmul.f32 0.7978846, %v5255_v31  ;;  %v5311_v30 = vmul.f32 %v5295_v1, %v5183_v46 }
0x163d   : > { %5435 = vmatmul.mubr.f32.gmra.mxu0 %v5309_v8  ;;  %v5312_v62 = vmul.f32 %v5296_v2, %v5184_v56  ;;  %v5188_v59 = vmul.f32 0.5, %v9574_v7  ;;  %v5187_v32 = vmul.f32 0.5, %v9568_v5  ;;  %v5190_v23 = vmul.f32 0.5, %v9588_v45 }
0x163e   : > { %v7217_v20 = vpop.eup %7216  ;;  %7228 = vtanh.f32 %v5272_v6  ;;  %v5189_v44 = vmul.f32 0.5, %v9580_v49  ;;  %v5192_v7 = vmul.f32 0.5, %v9603_v19  ;;  %v5191_v58 = vmul.f32 0.5, %v9596_v33  ;;  %v5926_v49 = vld [vmem:[%s9757_s10] ss:$0 sm:$0xff] }
0x163f   : > { %5439 = vmatprep.mubr.f32.mxu0 %v5312_v62  ;;  %7230 = vtanh.f32 %v5271_v29  ;;  %v5297_v26 = vadd.f32 1.0, %v7217_v20 }
0x1640   : > { %v7219_v61 = vpop.eup %7218 }
0x1641   : > { %5440 = vmatmul.mubr.f32.gmra.mxu0 %v5311_v30  ;;  %v5298_v13 = vadd.f32 1.0, %v7219_v61  ;;  %v5313_v12 = vmul.f32 %v5297_v26, %v5185_v0 }
0x1642   : > { %v7221_v14 = vpop.eup %7220 }
0x1643   : > { %v5314_v55 = vmul.f32 %v5298_v13, %v5186_v17  ;;  %v5299_v21 = vadd.f32 1.0, %v7221_v14 }
0x1644   : > { %v7223_v18 = vpop.eup %7222 }
0x1645   : > { %5444 = vmatprep.mubr.f32.mxu0 %v5314_v55  ;;  %v5300_v15 = vadd.f32 1.0, %v7223_v18  ;;  %v5315_v47 = vmul.f32 %v5299_v21, %v5187_v32 }
0x1646   : > { %5445 = vmatmul.mubr.f32.gmra.mxu0 %v5313_v12 }
0x1647   : > { %v5316_v28 = vmul.f32 %v5300_v15, %v5188_v59 }
0x1648   : > { %v7225_v36 = vpop.eup %7224 }
0x1649   : > { %5449 = vmatprep.mubr.f32.mxu0 %v5316_v28  ;;  %v7227_v50 = vpop.eup %7226  ;;  %v5302_v51 = vadd.f32 1.0, %v7225_v36 }
0x164a   : > { %5450 = vmatmul.mubr.f32.gmra.mxu0 %v5315_v47  ;;  %v5301_v11 = vadd.f32 1.0, %v7227_v50 }
0x164b   : > { %v7229_v52 = vpop.eup %7228  ;;  %v5318_v27 = vmul.f32 %v5302_v51, %v5190_v23 }
0x164c   : > { %v7231_v60 = vpop.eup %7230  ;;  %v5304_v3 = vadd.f32 1.0, %v7229_v52  ;;  %v5317_v63 = vmul.f32 %v5301_v11, %v5189_v44 }
0x164d   : > { %v5303_v5 = vadd.f32 1.0, %v7231_v60  ;;  %5454 = vmatprep.mubr.f32.mxu0 %v5318_v27 }
0x164e   : > { %v5320_v37 = vmul.f32 %v5304_v3, %v5192_v7  ;;  %5455 = vmatmul.mubr.f32.gmra.mxu0 %v5317_v63 }
0x164f   : > { %v5319_v24 = vmul.f32 %v5303_v5, %v5191_v58 }
0x1650   : > { %5459 = vmatprep.mubr.f32.mxu0 %v5320_v37 }
0x1652   : > { %5460 = vmatmul.mubr.f32.gmra.mxu0 %v5319_v24 }
0x16f5   : > { %v6272_v45 = vpop.f32.mrf.mxu0 }
0x16f7   : > { %v6273_v16 = vpop.f32.mrf.mxu0 }
0x16f8   : > { %v6274_v22 = vadd.f32 %v6273_v16, %v6272_v45 }
0x16f9   : > { %v6275_v39 = vpop.f32.mrf.mxu0 }
0x16fa   : > { %v5427_v19 = vadd.f32 %v6274_v22, %v5926_v49 }
0x16fb   : > { %v6276_v41 = vpop.f32.mrf.mxu0 }
0x16fc   : > { %v6277_v40 = vadd.f32 %v6276_v41, %v6275_v39  ;;  %v5465_v43 = vadd.f32 %v5427_v19, %v9459_v53 }
0x16fd   : > { %v6278_v10 = vpop.f32.mrf.mxu0 }
0x16fe   : > { %v5432_v56 = vadd.f32 %v6277_v40, %v5926_v49  ;;  %5475 = vadd.xlane.f32.xlu1 %v5465_v43 }
0x16ff   : > { %v6279_v33 = vpop.f32.mrf.mxu0 }
0x1700   : > { %v6280_v9 = vadd.f32 %v6279_v33, %v6278_v10  ;;  %v5466_v48 = vadd.f32 %v5432_v56, %v9463_v25 }
0x1701   : > { %v6281_v57 = vpop.f32.mrf.mxu0 }
0x1702   : > { %v5437_v8 = vadd.f32 %v6280_v9, %v5926_v49  ;;  %5477 = vadd.xlane.f32.xlu0 %v5466_v48 }
0x1703   : > { %v6282_v2 = vpop.f32.mrf.mxu0 }
0x1704   : > { %v6283_v1 = vadd.f32 %v6282_v2, %v6281_v57  ;;  %v5467_v31 = vadd.f32 %v5437_v8, %v9468_v42 }
0x1706   : > { %v5442_v6 = vadd.f32 %v6283_v1, %v5926_v49  ;;  %v6284_v62 = vpop.f32.mrf.mxu0  ;;  %5479 = vadd.xlane.f32.xlu1 %v5467_v31 }
0x1708   : > { %v6285_v46 = vpop.f32.mrf.mxu0  ;;  %v5468_v53 = vadd.f32 %v5442_v6, %v9473_v38 }
0x1709   : > { %v6286_v29 = vadd.f32 %v6285_v46, %v6284_v62 }
0x170a   : > { %v6287_v20 = vpop.f32.mrf.mxu0  ;;  %5481 = vadd.xlane.f32.xlu0 %v5468_v53 }
0x170b   : > { %v5447_v30 = vadd.f32 %v6286_v29, %v5926_v49  ;;  %v5927_v29 = vld [vmem:[%s9758_s11] ss:$0 sm:$0xff] }
0x170c   : > { %v6288_v61 = vpop.f32.mrf.mxu0 }
0x170d   : > { %v6289_v26 = vadd.f32 %v6288_v61, %v6287_v20  ;;  %v5469_v25 = vadd.f32 %v5447_v30, %v9479_v54  ;;  %v5928_v61 = vld [vmem:[%s9759_s12] ss:$0 sm:$0xff] }
0x170e   : > { %v6290_v13 = vpop.f32.mrf.mxu0 }
0x170f   : > { %v5452_v17 = vadd.f32 %v6289_v26, %v5926_v49  ;;  %5483 = vadd.xlane.f32.xlu1 %v5469_v25 }
0x1710   : > { %v6291_v14 = vpop.f32.mrf.mxu0 }
0x1711   : > { %v5470_v42 = vadd.f32 %v5452_v17, %v9484_v4  ;;  %v6292_v0 = vadd.f32 %v6291_v14, %v6290_v13 }
0x1712   : > { %v6293_v55 = vpop.f32.mrf.mxu0 }
0x1713   : > { %5485 = vadd.xlane.f32.xlu0 %v5470_v42  ;;  %v5457_v18 = vadd.f32 %v6292_v0, %v5926_v49 }
0x1714   : > { %v6294_v12 = vpop.f32.mrf.mxu0 }
0x1715   : > { %v6295_v38 = vadd.f32 %v6294_v12, %v6293_v55  ;;  %v5471_v21 = vadd.f32 %v5457_v18, %v9489_v35 }
0x1717   : > { %v5462_v59 = vadd.f32 %v6295_v38, %v5926_v49  ;;  %5487 = vadd.xlane.f32.xlu1 %v5471_v21 }
0x1719   : > { %v5472_v15 = vadd.f32 %v5462_v59, %v9493_v34 }
0x171b   : > { %5489 = vadd.xlane.f32.xlu0 %v5472_v15 }
0x1787   : > { %v5476_v54 = vpop.xlane.xlu1 %5475 }
0x1788   : > { %v5491_v32 = vmul.f32 0.0078125, %v5476_v54 }
0x178a   : > { %v5499_v28 = vsub.f32 %v5465_v43, %v5491_v32 }
0x178b   : > { %v5478_v47 = vpop.xlane.xlu0 %5477 }
0x178c   : > { %v5492_v36 = vmul.f32 0.0078125, %v5478_v47  ;;  %v5507_v50 = vmul.f32 %v5499_v28, %v5499_v28 }
0x178e   : > { %v9642_v4 = vsub.f32 %v5466_v48, %v5492_v36  ;;  %5515 = vadd.xlane.f32.xlu1 %v5507_v50 }
0x178f   : > { %v5480_v23 = vpop.xlane.xlu1 %5479 }
0x1790   : > { %v5493_v51 = vmul.f32 0.0078125, %v5480_v23  ;;  %v5508_v52 = vmul.f32 %v9642_v4, %v9642_v4 }
0x1792   : > { %v9646_v35 = vsub.f32 %v5467_v31, %v5493_v51  ;;  %5517 = vadd.xlane.f32.xlu0 %v5508_v52 }
0x1793   : > { %v5482_v44 = vpop.xlane.xlu0 %5481 }
0x1794   : > { %v5494_v34 = vmul.f32 0.0078125, %v5482_v44  ;;  %v5509_v11 = vmul.f32 %v9646_v35, %v9646_v35 }
0x1796   : > { %v9650_v60 = vsub.f32 %v5468_v53, %v5494_v34  ;;  %5519 = vadd.xlane.f32.xlu1 %v5509_v11 }
0x1798   : > { %v5484_v27 = vpop.xlane.xlu1 %5483  ;;  %v5510_v7 = vmul.f32 %v9650_v60, %v9650_v60 }
0x1799   : > { %v5495_v3 = vmul.f32 0.0078125, %v5484_v27 }
0x179a   : > { %5521 = vadd.xlane.f32.xlu0 %v5510_v7 }
0x179b   : > { %v9654_v63 = vsub.f32 %v5469_v25, %v5495_v3 }
0x179c   : > { %v5486_v5 = vpop.xlane.xlu0 %5485 }
0x179d   : > { %v5496_v37 = vmul.f32 0.0078125, %v5486_v5  ;;  %v5511_v58 = vmul.f32 %v9654_v63, %v9654_v63 }
0x179f   : > { %v9658_v24 = vsub.f32 %v5470_v42, %v5496_v37  ;;  %5523 = vadd.xlane.f32.xlu1 %v5511_v58 }
0x17a0   : > { %v5488_v45 = vpop.xlane.xlu1 %5487 }
0x17a1   : > { %v5512_v49 = vmul.f32 %v9658_v24, %v9658_v24  ;;  %v5497_v16 = vmul.f32 0.0078125, %v5488_v45 }
0x17a3   : > { %5525 = vadd.xlane.f32.xlu0 %v5512_v49  ;;  %v9662_v22 = vsub.f32 %v5471_v21, %v5497_v16 }
0x17a4   : > { %v5490_v39 = vpop.xlane.xlu0 %5489 }
0x17a5   : > { %v5498_v19 = vmul.f32 0.0078125, %v5490_v39  ;;  %v5513_v41 = vmul.f32 %v9662_v22, %v9662_v22 }
0x17a7   : > { %v9666_v40 = vsub.f32 %v5472_v15, %v5498_v19  ;;  %5527 = vadd.xlane.f32.xlu1 %v5513_v41 }
0x17a9   : > { %v5514_v43 = vmul.f32 %v9666_v40, %v9666_v40 }
0x17ab   : > { %5529 = vadd.xlane.f32.xlu0 %v5514_v43 }
0x1817   : > { %v5516_v10 = vpop.xlane.xlu1 %5515 }
0x1818   : > { %v5531_v56 = vmul.f32 0.0078125, %v5516_v10 }
0x181a   : > { %v5539_v33 = vadd.f32 1e-05, %v5531_v56 }
0x181b   : > { %v5518_v9 = vpop.xlane.xlu0 %5517 }
0x181c   : > { %7232 = vrsqrt.f32 %v5539_v33  ;;  %v5532_v48 = vmul.f32 0.0078125, %v5518_v9 }
0x181e   : > { %v5540_v57 = vadd.f32 1e-05, %v5532_v48 }
0x181f   : > { %v5520_v8 = vpop.xlane.xlu1 %5519 }
0x1820   : > { %7234 = vrsqrt.f32 %v5540_v57  ;;  %v5533_v2 = vmul.f32 0.0078125, %v5520_v8 }
0x1822   : > { %v5541_v1 = vadd.f32 1e-05, %v5533_v2 }
0x1823   : > { %v5522_v31 = vpop.xlane.xlu0 %5521 }
0x1824   : > { %7236 = vrsqrt.f32 %v5541_v1  ;;  %v5534_v6 = vmul.f32 0.0078125, %v5522_v31 }
0x1826   : > { %v5542_v62 = vadd.f32 1e-05, %v5534_v6 }
0x1828   : > { %7238 = vrsqrt.f32 %v5542_v62  ;;  %v5524_v46 = vpop.xlane.xlu1 %5523 }
0x1829   : > { %v7233_v53 = vpop.eup %7232  ;;  %v5535_v20 = vmul.f32 0.0078125, %v5524_v46 }
0x182a   : > { %v5555_v30 = vmul.f32 %v7233_v53, %v5499_v28 }
0x182b   : > { %v5543_v26 = vadd.f32 1e-05, %v5535_v20 }
0x182c   : > { %v5569_v25 = vmul.f32 %v5927_v29, %v5555_v30  ;;  %v5526_v17 = vpop.xlane.xlu0 %5525 }
0x182d   : > { %v7235_v13 = vpop.eup %7234  ;;  %7240 = vrsqrt.f32 %v5543_v26  ;;  %v5536_v14 = vmul.f32 0.0078125, %v5526_v17 }
0x182e   : > { %v5583_v42 = vadd.f32 %v5928_v61, %v5569_v25  ;;  %v5556_v0 = vmul.f32 %v7235_v13, %v9642_v4 }
0x182f   : > { %v5544_v55 = vadd.f32 1e-05, %v5536_v14 }
0x1830   : > { %5591 = vst [vmem:[%s9680_s23] sm:$0xff] %v5583_v42  ;;  %v5570_v18 = vmul.f32 %v5927_v29, %v5556_v0  ;;  %v5528_v38 = vpop.xlane.xlu1 %5527 }
0x1831   : > { %v7237_v12 = vpop.eup %7236  ;;  %7242 = vrsqrt.f32 %v5544_v55  ;;  %v5537_v15 = vmul.f32 0.0078125, %v5528_v38 }
0x1832   : > { %v5584_v21 = vadd.f32 %v5928_v61, %v5570_v18  ;;  %v5557_v59 = vmul.f32 %v7237_v12, %v9646_v35 }
0x1833   : > { %v5545_v32 = vadd.f32 1e-05, %v5537_v15 }
0x1834   : > { %5592 = vst [vmem:[%s9680_s23 + $0x8] sm:$0xff] %v5584_v21  ;;  %v5571_v54 = vmul.f32 %v5927_v29, %v5557_v59  ;;  %v5530_v47 = vpop.xlane.xlu0 %5529 }
0x1835   : > { %v7239_v28 = vpop.eup %7238  ;;  %7244 = vrsqrt.f32 %v5545_v32  ;;  %v5538_v4 = vmul.f32 0.0078125, %v5530_v47 }
0x1836   : > { %v5585_v36 = vadd.f32 %v5928_v61, %v5571_v54  ;;  %v5558_v50 = vmul.f32 %v7239_v28, %v9650_v60 }
0x1837   : > { %v5546_v51 = vadd.f32 1e-05, %v5538_v4 }
0x1838   : > { %5593 = vst [vmem:[%s9680_s23 + $0x10] sm:$0xff] %v5585_v36  ;;  %v5572_v23 = vmul.f32 %v5927_v29, %v5558_v50 }
0x1839   : > { %7246 = vrsqrt.f32 %v5546_v51 }
0x183a   : > { %v7241_v52 = vpop.eup %7240  ;;  %v5586_v44 = vadd.f32 %v5928_v61, %v5572_v23 }
0x183b   : > { %v5559_v35 = vmul.f32 %v7241_v52, %v9654_v63 }
0x183c   : > { %5594 = vst [vmem:[%s9680_s23 + $0x18] sm:$0xff] %v5586_v44 }
0x183d   : > { %v5573_v34 = vmul.f32 %v5927_v29, %v5559_v35 }
0x183e   : > { %v7243_v11 = vpop.eup %7242 }
0x183f   : > { %v5587_v27 = vadd.f32 %v5928_v61, %v5573_v34  ;;  %v5560_v60 = vmul.f32 %v7243_v11, %v9658_v24 }
0x1841   : > { %5595 = vst [vmem:[%s9680_s23 + $0x20] sm:$0xff] %v5587_v27  ;;  %v5574_v7 = vmul.f32 %v5927_v29, %v5560_v60 }
0x1842   : > { %v7245_v3 = vpop.eup %7244 }
0x1843   : > { %v5588_v5 = vadd.f32 %v5928_v61, %v5574_v7  ;;  %v5561_v37 = vmul.f32 %v7245_v3, %v9662_v22 }
0x1845   : > { %5596 = vst [vmem:[%s9680_s23 + $0x28] sm:$0xff] %v5588_v5  ;;  %v5575_v63 = vmul.f32 %v5927_v29, %v5561_v37 }
0x1846   : > { %v7247_v58 = vpop.eup %7246 }
0x1847   : > { %v5589_v45 = vadd.f32 %v5928_v61, %v5575_v63  ;;  %v5562_v49 = vmul.f32 %v7247_v58, %v9666_v40 }
0x1849   : > { %5597 = vst [vmem:[%s9680_s23 + $0x30] sm:$0xff] %v5589_v45  ;;  %v5576_v16 = vmul.f32 %v5927_v29, %v5562_v49 }
0x184b   : > { %v5590_v24 = vadd.f32 %v5928_v61, %v5576_v16 }
0x184d   : > { %5598 = vst [vmem:[%s9680_s23 + $0x38] sm:$0xff] %v5590_v24 }
0x184e   : > { %7365 = shalt.err (!%p7362_p11)
}
0x184f   : > { %s7366_s30 = scalar_lea.hbm %s9700_s14, 1024  ;;  %s7370_s23 = scalar_lea.hbm %s9760_s13, 2048 }
0x1850   : > { %p7367_p0 = scmp.ne.s32.totalorder %s9700_s14, %s7366_s30  ;;  %p7371_p3 = scmp.lt.s32.totalorder %s9700_s14, %s9760_s13 }
0x1851   : > { %p7372_p10 = scmp.lt.s32.totalorder %s7370_s23, %s7366_s30 }
0x1852   : > { %p7368_p1 = pnand %p7367_p0, %p7555_p5 }
0x1853   : > { %p7373_p9 = por %p7372_p10, %p7371_p3 }
0x1854   : > { %p7369_p2 = pneg %p7368_p1 }
0x1856   : > { %p7374_p12 = pnand %p7373_p9, %p7369_p2 }
0x1858   : > { %7377 = shalt.err (!%p7374_p12)
}
0x1859   : > { %s7445_s25 = smov 128   ;;  %s7446_s15 = smov 8  }
0x185a   : > { %6848 = dma.vmem_to_hbm [thread:$0]  (%p7555_p5), %s9702_s24, 1024, %s9700_s14, %s9707_s19, %s7445_s25, %s7445_s25, %s7446_s15  }
0x185b PF: > { %s9856_s29 = sld [smem:[#allocation17_spill]]  ;;  %p6875_p13 = scmp.ge.s32.totalorder %s7424_s28, 2 }
0x185d   : > { %p6864_p4 = pnand %p6875_p13, %p7559_p6 }
0x185f   : > { %p6865_p7 = pneg %p6864_p4 }
0x1861   : > { %s5628_s16 = sand.u32 1, %s9856_s29  }
0x1862   : > { %s5629_s30 = scalar_lea.sflag [#allocation6], %s5628_s16 }
0x1863   : > { %7407 = dma.done.wait (%p6865_p7), %s5629_s30, 1024  }
0x1864   : > { %7409 = vsyncadd (%p6865_p7), %s5629_s30, 4294966272  ;;  %s9858_s28 = sld [smem:[#allocation19_spill]]  ;;  %s9861_s25 = smov %s7416_s26 }
0x1865   : > { %s9859_s22 = sld [smem:[#allocation18_spill]] }
0x1866   : > { %s9860_s27 = sld [smem:[#allocation20_spill]] }
0x186a   : > { %p26_p8 = scmp.ge.s32.totalorder %s9858_s28, 4  }
0x186b   : > { %s9862_s26 = smov %s9859_s22 }
0x186c   :  { %28 = sbr.rel (!%p26_p8) target bundleno = 6 (0x6), region = 124 }
0x1871   :  { %5634 = vsyncpa [#allocation5], 1 }
0x1872   :  { %5636 = vsyncpa [#allocation5 + $0x1], 1 }
0x1873   :  { %5637 = vsyncpa [#allocation8], 1 }
0x1874   :  { %5638 = vsyncpa [#allocation11], 1 }
0x1875   :  { %5639 = vsyncpa [#allocation6], 1 }
0x1876   :  { %5641 = vsyncpa [#allocation6 + $0x1], 1 }

</bundles_post_ra>
